<compile_context>
chip_gen: v7x
topology: tpu7x:2x2x1
jax: 0.10.0
libtpu: 0.0.40
codegen_flags: <defaults>
</compile_context>

<pallas_src>
import functools

import jax
import jax.numpy as jnp
from jax import lax
from jax.experimental import pallas as pl
from jax.experimental.pallas import tpu as pltpu

TEMPERATURE = 0.07
EPS = 1e-12                      # F.normalize eps
NEG_BIG = -1e30                  # "minus infinity" for padded k columns
PAD_LABEL = jnp.iinfo(jnp.int32).min


def _round_up(x, m):
    return (x + m - 1) // m * m


def _default_tiles():
    """Per-generation default tile sizes (q-rows, k-cols)."""
    try:
        kind = jax.devices()[0].device_kind.lower()
    except Exception:  # pragma: no cover
        kind = ""
    if "v5" in kind:
        # v5e: 4x128^2 MXU, 16 MiB default scoped VMEM -> smaller q tile.
        return 128, 512
    # v6e / v7x: 256-aligned MXU; tiles sized to stay well under v7x's 64 MiB VMEM.
    return 256, 512


def _supcon_kernel(q_ref, ql_ref, k_ref, kl_ref, out_ref,
                   m_sc, l_sc, psum_sc, pcnt_sc,
                   *, inv_temp, matmul_dtype):
    ki = pl.program_id(1)

    @pl.when(ki == 0)
    def _init():
        m_sc[...] = jnp.full_like(m_sc, -jnp.inf)
        l_sc[...] = jnp.zeros_like(l_sc)
        psum_sc[...] = jnp.zeros_like(psum_sc)
        pcnt_sc[...] = jnp.zeros_like(pcnt_sc)

    q = q_ref[...].astype(jnp.float32)       # (block_q, D)
    k = k_ref[...].astype(jnp.float32)       # (block_k, D)
    ql = ql_ref[...]                         # (block_q, 1) int32
    kl = kl_ref[...]                         # (1, block_k) int32

    # F.normalize(x, dim=-1) == x * rsqrt(max(sum(x^2), eps^2)); rsqrt goes to the
    # EUP slot.  Fold 1/temperature into the q scaling so the (N, M) tile never
    # sees a divide.
    q_scale = lax.rsqrt(jnp.maximum(jnp.sum(q * q, axis=-1, keepdims=True), EPS * EPS))
    k_scale = lax.rsqrt(jnp.maximum(jnp.sum(k * k, axis=-1, keepdims=True), EPS * EPS))
    qn = (q * (q_scale * inv_temp)).astype(matmul_dtype)
    kn = (k * k_scale).astype(matmul_dtype)

    # logits tile (block_q, block_k): contract last dims directly (no explicit .T),
    # f32 accumulation on the MXU.
    s = lax.dot_general(qn, kn, (((1,), (1,)), ((), ())),
                        preferred_element_type=jnp.float32)

    valid = kl != PAD_LABEL                  # (1, block_k) bool, broadcasts over rows
    s = jnp.where(valid, s, NEG_BIG)

    # Positive-pair statistics — no materialized float mask / log_prob.
    pos = jnp.logical_and(ql == kl, valid)   # (block_q, block_k) bool
    psum_sc[...] += jnp.sum(jnp.where(pos, s, 0.0), axis=1, keepdims=True)
    pcnt_sc[...] += jnp.sum(pos.astype(jnp.float32), axis=1, keepdims=True)

    # Online logsumexp across k blocks.
    m_prev = m_sc[...]
    m_new = jnp.maximum(m_prev, jnp.max(s, axis=1, keepdims=True))
    l_sc[...] = (l_sc[...] * jnp.exp(m_prev - m_new)
                 + jnp.sum(jnp.exp(s - m_new), axis=1, keepdims=True))
    m_sc[...] = m_new

    @pl.when(ki == pl.num_programs(1) - 1)
    def _finalize():
        lse = m_sc[...] + jnp.log(l_sc[...])
        # mean_log_prob_pos = (sum of positive logits)/(# positives) - logsumexp
        out_ref[...] = psum_sc[...] * pl.reciprocal(pcnt_sc[...], approx=True) - lse


def supcon_loss(q, q_label, k, k_label, temperature=TEMPERATURE,
                block_q=None, block_k=None, matmul_dtype=jnp.bfloat16):
    """q: (N, D) float, q_label: (N,) int, k: (M, D) float, k_label: (M,) int."""
    n, d = q.shape
    m, dk = k.shape
    assert d == dk, "q and k must share the feature dimension"

    bq_def, bk_def = _default_tiles()
    block_q = block_q or bq_def
    block_k = block_k or bk_def
    # Clamp tiles to the (padded) problem size; keep (8, 128) alignment.
    block_q = min(block_q, _round_up(n, 8))
    block_k = min(block_k, _round_up(m, 128))

    n_pad = _round_up(n, block_q)
    m_pad = _round_up(m, block_k)

    qp = jnp.pad(q.astype(jnp.float32), ((0, n_pad - n), (0, 0)))
    kp = jnp.pad(k.astype(jnp.float32), ((0, m_pad - m), (0, 0)))
    qlp = jnp.pad(q_label.reshape(n, 1).astype(jnp.int32),
                  ((0, n_pad - n), (0, 0)), constant_values=PAD_LABEL)
    klp = jnp.pad(k_label.reshape(1, m).astype(jnp.int32),
                  ((0, 0), (0, m_pad - m)), constant_values=PAD_LABEL)

    grid = (n_pad // block_q, m_pad // block_k)
    kernel = functools.partial(_supcon_kernel,
                               inv_temp=1.0 / temperature,
                               matmul_dtype=matmul_dtype)

    row_mlp = pl.pallas_call(
        kernel,
        out_shape=jax.ShapeDtypeStruct((n_pad, 1), jnp.float32),
        grid_spec=pltpu.PrefetchScalarGridSpec(
            num_scalar_prefetch=0,
            grid=grid,
            in_specs=[
                pl.BlockSpec((block_q, d), lambda qi, ki: (qi, 0)),   # q features
                pl.BlockSpec((block_q, 1), lambda qi, ki: (qi, 0)),   # q labels (sublane)
                pl.BlockSpec((block_k, d), lambda qi, ki: (ki, 0)),   # k features
                pl.BlockSpec((1, block_k), lambda qi, ki: (0, ki)),   # k labels (lane)
            ],
            out_specs=pl.BlockSpec((block_q, 1), lambda qi, ki: (qi, 0)),
            scratch_shapes=[pltpu.VMEM((block_q, 1), jnp.float32)] * 4,
        ),
        compiler_params=pltpu.CompilerParams(
            dimension_semantics=("parallel", "arbitrary"),
            vmem_limit_bytes=64 * 1024 * 1024,
        ),
    )(qp, qlp, kp, klp)

    # Final reduction over N rows (tiny O(N) op); done outside so the q grid axis
    # can be "parallel" across TensorCores without a shared scalar accumulator.
    return -jnp.mean(row_mlp[:n, 0])


def supcon_loss_ref(q, q_label, k, k_label, temperature=TEMPERATURE):
    """Pure-JAX reference mirroring the PyTorch forward (concat=replace=False)."""
    q = q / jnp.maximum(jnp.linalg.norm(q, axis=-1, keepdims=True), EPS)
    k = k / jnp.maximum(jnp.linalg.norm(k, axis=-1, keepdims=True), EPS)
    ql = q_label.reshape(-1, 1)
    kl = k_label.reshape(-1, 1)
    mask = (ql == kl.T).astype(jnp.float32)
    logits = (q @ k.T) / temperature
    logits = logits - jnp.max(logits, axis=1, keepdims=True)
    exp_logits = jnp.exp(logits)
    log_prob = logits - jnp.log(jnp.sum(exp_logits, axis=1, keepdims=True))
    mean_log_prob_pos = jnp.sum(mask * log_prob, axis=1) / jnp.sum(mask, axis=1)
    return -jnp.mean(mean_log_prob_pos)


if __name__ == "__main__":
    key = jax.random.PRNGKey(0)
    kq, kk = jax.random.split(key)
    N, M, D = 320, 640, 128
    q = jax.random.normal(kq, (N, D), dtype=jnp.float32)
    k = jax.random.normal(kk, (M, D), dtype=jnp.float32)
    # labels chosen so every q row has at least one positive in k (matches typical
    # SupCon usage; a zero-positive row would NaN in torch too)
    q_label = jnp.arange(N, dtype=jnp.int32) % 7
    k_label = jnp.arange(M, dtype=jnp.int32) % 7

    # Small explicit tiles so the multi-block grid, q/k padding and the online
    # logsumexp path are all exercised regardless of the chip generation.
    loss = supcon_loss(q, q_label, k, k_label, block_q=128, block_k=256)
    loss = jax.block_until_ready(loss)

    ref = supcon_loss_ref(q, q_label, k, k_label)
    # bf16 MXU operands -> ~1e-3 relative logit error; tolerance widened accordingly.
    assert jnp.allclose(loss, ref, rtol=2e-2, atol=1e-2), (loss, ref)

    # Also exercise the device-default tile path once.
    loss2 = jax.block_until_ready(supcon_loss(q, q_label, k, k_label))
    assert jnp.allclose(loss2, ref, rtol=2e-2, atol=1e-2), (loss2, ref)

    print("KERNEL_OK")
</pallas_src>

<mosaic_0001>
module attributes {stable_mosaic.version = 11 : i64} {
  func.func @_supcon_kernel(%arg0: i32, %arg1: i32, %arg2: memref<128x128xf32, #tpu.memory_space<vmem>>, %arg3: memref<128x1xi32, #tpu.memory_space<vmem>>, %arg4: memref<256x128xf32, #tpu.memory_space<vmem>>, %arg5: memref<1x256xi32, #tpu.memory_space<vmem>>, %arg6: memref<128x1xf32, #tpu.memory_space<vmem>>, %arg7: memref<128x1xf32, #tpu.memory_space<vmem>>, %arg8: memref<128x1xf32, #tpu.memory_space<vmem>>, %arg9: memref<128x1xf32, #tpu.memory_space<vmem>>, %arg10: memref<128x1xf32, #tpu.memory_space<vmem>>) attributes {dimension_semantics = [#tpu.dimension_semantics<parallel>, #tpu.dimension_semantics<arbitrary>], iteration_bounds = array<i64: 3, 3>, scalar_prefetch = 0 : i64, scratch_operands = 4 : i64, tpu.core_type = #tpu.core_type<tc>, window_params = [{transform_indices = @transform_0, window_bounds = array<i64: 128, 128>}, {transform_indices = @transform_1, window_bounds = array<i64: 128, 1>}, {transform_indices = @transform_2, window_bounds = array<i64: 256, 128>}, {transform_indices = @transform_3, window_bounds = array<i64: 1, 256>}, {transform_indices = @transform_4, window_bounds = array<i64: 128, 1>}]} {
    %c0_i32 = arith.constant 0 : i32
    %0 = arith.cmpi eq, %arg1, %c0_i32 : i32
    %1 = arith.extui %0 : i1 to i32
    %c0_i32_0 = arith.constant 0 : i32
    %2 = arith.cmpi ne, %1, %c0_i32_0 : i32
    scf.if %2 {
      %cst_36 = arith.constant 0xFF800000 : f32
      %72 = vector.broadcast %cst_36 : f32 to vector<128x1xf32>
      %c0_37 = arith.constant 0 : index
      %c0_38 = arith.constant 0 : index
      %73 = vector.load %arg7[%c0_37, %c0_38] : memref<128x1xf32, #tpu.memory_space<vmem>>, vector<128x1xf32>
      tpu.vector_store %arg7[%c0_37, %c0_38], %72 {strides = array<i32>} : memref<128x1xf32, #tpu.memory_space<vmem>>, vector<128x1xf32>,
      %cst_39 = arith.constant 0.000000e+00 : f32
      %74 = vector.broadcast %cst_39 : f32 to vector<128x1xf32>
      %c0_40 = arith.constant 0 : index
      %c0_41 = arith.constant 0 : index
      %75 = vector.load %arg8[%c0_40, %c0_41] : memref<128x1xf32, #tpu.memory_space<vmem>>, vector<128x1xf32>
      tpu.vector_store %arg8[%c0_40, %c0_41], %74 {strides = array<i32>} : memref<128x1xf32, #tpu.memory_space<vmem>>, vector<128x1xf32>,
      %cst_42 = arith.constant 0.000000e+00 : f32
      %76 = vector.broadcast %cst_42 : f32 to vector<128x1xf32>
      %c0_43 = arith.constant 0 : index
      %c0_44 = arith.constant 0 : index
      %77 = vector.load %arg9[%c0_43, %c0_44] : memref<128x1xf32, #tpu.memory_space<vmem>>, vector<128x1xf32>
      tpu.vector_store %arg9[%c0_43, %c0_44], %76 {strides = array<i32>} : memref<128x1xf32, #tpu.memory_space<vmem>>, vector<128x1xf32>,
      %cst_45 = arith.constant 0.000000e+00 : f32
      %78 = vector.broadcast %cst_45 : f32 to vector<128x1xf32>
      %c0_46 = arith.constant 0 : index
      %c0_47 = arith.constant 0 : index
      %79 = vector.load %arg10[%c0_46, %c0_47] : memref<128x1xf32, #tpu.memory_space<vmem>>, vector<128x1xf32>
      tpu.vector_store %arg10[%c0_46, %c0_47], %78 {strides = array<i32>} : memref<128x1xf32, #tpu.memory_space<vmem>>, vector<128x1xf32>,
    } else {
    }
    %c0 = arith.constant 0 : index
    %c0_1 = arith.constant 0 : index
    %3 = vector.load %arg2[%c0, %c0_1] : memref<128x128xf32, #tpu.memory_space<vmem>>, vector<128x128xf32>
    %c0_2 = arith.constant 0 : index
    %c0_3 = arith.constant 0 : index
    %4 = vector.load %arg4[%c0_2, %c0_3] : memref<256x128xf32, #tpu.memory_space<vmem>>, vector<256x128xf32>
    %c0_4 = arith.constant 0 : index
    %c0_5 = arith.constant 0 : index
    %5 = vector.load %arg3[%c0_4, %c0_5] : memref<128x1xi32, #tpu.memory_space<vmem>>, vector<128x1xi32>
    %c0_6 = arith.constant 0 : index
    %c0_7 = arith.constant 0 : index
    %6 = vector.load %arg5[%c0_6, %c0_7] : memref<1x256xi32, #tpu.memory_space<vmem>>, vector<1x256xi32>
    %7 = arith.mulf %3, %3 : vector<128x128xf32>
    %cst = arith.constant dense<0.000000e+00> : vector<128xf32>
    %8 = vector.multi_reduction <add>, %7, %cst [1] : vector<128x128xf32> to vector<128xf32>
    %9 = vector.shape_cast %8 : vector<128xf32> to vector<128x1xf32>
    %cst_8 = arith.constant 1.000000e-24 : f32
    %10 = vector.broadcast %cst_8 : f32 to vector<128x1xf32>
    %11 = arith.maximumf %9, %10 : vector<128x1xf32>
    %12 = math.rsqrt %11 : vector<128x1xf32>
    %13 = arith.mulf %4, %4 : vector<256x128xf32>
    %cst_9 = arith.constant dense<0.000000e+00> : vector<256xf32>
    %14 = vector.multi_reduction <add>, %13, %cst_9 [1] : vector<256x128xf32> to vector<256xf32>
    %15 = vector.shape_cast %14 : vector<256xf32> to vector<256x1xf32>
    %cst_10 = arith.constant 1.000000e-24 : f32
    %16 = vector.broadcast %cst_10 : f32 to vector<256x1xf32>
    %17 = arith.maximumf %15, %16 : vector<256x1xf32>
    %18 = math.rsqrt %17 : vector<256x1xf32>
    %cst_11 = arith.constant 14.2857141 : f32
    %19 = vector.broadcast %cst_11 : f32 to vector<128x1xf32>
    %20 = arith.mulf %12, %19 : vector<128x1xf32>
    %21 = vector.broadcast %20 : vector<128x1xf32> to vector<128x128xf32>
    %22 = arith.mulf %3, %21 : vector<128x128xf32>
    %23 = arith.truncf %22 : vector<128x128xf32> to vector<128x128xbf16>
    %24 = vector.broadcast %18 : vector<256x1xf32> to vector<256x128xf32>
    %25 = arith.mulf %4, %24 : vector<256x128xf32>
    %26 = arith.truncf %25 : vector<256x128xf32> to vector<256x128xbf16>
    %cst_12 = arith.constant dense<0.000000e+00> : vector<128x256xf32>
    %27 = tpu.matmul %23, %26, %cst_12 {dimension_numbers = #tpu.dot_dimension_numbers<[1], [1], [0], [0], [0, 0, 1, 0], [], []>} : vector<128x128xbf16>, vector<256x128xbf16>, vector<128x256xf32> -> vector<128x256xf32>
    %c-2147483648_i32 = arith.constant -2147483648 : i32
    %28 = vector.broadcast %c-2147483648_i32 : i32 to vector<1x256xi32>
    %29 = arith.cmpi ne, %6, %28 : vector<1x256xi32>
    %cst_13 = arith.constant -1.000000e+30 : f32
    %30 = vector.shape_cast %29 : vector<1x256xi1> to vector<1x256xi1>
    %31 = vector.broadcast %30 : vector<1x256xi1> to vector<128x256xi1>
    %32 = vector.broadcast %cst_13 : f32 to vector<128x256xf32>
    %33 = arith.select %31, %27, %32 : vector<128x256xi1>, vector<128x256xf32>
    %34 = vector.broadcast %5 : vector<128x1xi32> to vector<128x256xi32>
    %35 = vector.broadcast %6 : vector<1x256xi32> to vector<128x256xi32>
    %36 = arith.cmpi eq, %34, %35 : vector<128x256xi32>
    %37 = vector.broadcast %29 : vector<1x256xi1> to vector<128x256xi1>
    %38 = arith.andi %36, %37 : vector<128x256xi1>
    %c0_14 = arith.constant 0 : index
    %c0_15 = arith.constant 0 : index
    %39 = vector.load %arg9[%c0_14, %c0_15] : memref<128x1xf32, #tpu.memory_space<vmem>>, vector<128x1xf32>
    %cst_16 = arith.constant 0.000000e+00 : f32
    %40 = vector.broadcast %cst_16 : f32 to vector<128x256xf32>
    %41 = arith.select %38, %33, %40 : vector<128x256xi1>, vector<128x256xf32>
    %cst_17 = arith.constant dense<0.000000e+00> : vector<128xf32>
    %42 = vector.multi_reduction <add>, %41, %cst_17 [1] : vector<128x256xf32> to vector<128xf32>
    %43 = vector.shape_cast %42 : vector<128xf32> to vector<128x1xf32>
    %44 = arith.addf %39, %43 : vector<128x1xf32>
    %c0_18 = arith.constant 0 : index
    %c0_19 = arith.constant 0 : index
    %45 = vector.load %arg9[%c0_18, %c0_19] : memref<128x1xf32, #tpu.memory_space<vmem>>, vector<128x1xf32>
    tpu.vector_store %arg9[%c0_18, %c0_19], %44 {strides = array<i32>} : memref<128x1xf32, #tpu.memory_space<vmem>>, vector<128x1xf32>,
    %c0_20 = arith.constant 0 : index
    %c0_21 = arith.constant 0 : index
    %46 = vector.load %arg10[%c0_20, %c0_21] : memref<128x1xf32, #tpu.memory_space<vmem>>, vector<128x1xf32>
    %47 = arith.extui %38 : vector<128x256xi1> to vector<128x256xi32>
    %48 = arith.sitofp %47 : vector<128x256xi32> to vector<128x256xf32>
    %cst_22 = arith.constant dense<0.000000e+00> : vector<128xf32>
    %49 = vector.multi_reduction <add>, %48, %cst_22 [1] : vector<128x256xf32> to vector<128xf32>
    %50 = vector.shape_cast %49 : vector<128xf32> to vector<128x1xf32>
    %51 = arith.addf %46, %50 : vector<128x1xf32>
    %c0_23 = arith.constant 0 : index
    %c0_24 = arith.constant 0 : index
    %52 = vector.load %arg10[%c0_23, %c0_24] : memref<128x1xf32, #tpu.memory_space<vmem>>, vector<128x1xf32>
    tpu.vector_store %arg10[%c0_23, %c0_24], %51 {strides = array<i32>} : memref<128x1xf32, #tpu.memory_space<vmem>>, vector<128x1xf32>,
    %c0_25 = arith.constant 0 : index
    %c0_26 = arith.constant 0 : index
    %53 = vector.load %arg7[%c0_25, %c0_26] : memref<128x1xf32, #tpu.memory_space<vmem>>, vector<128x1xf32>
    %cst_27 = arith.constant dense<0xFF800000> : vector<128xf32>
    %54 = vector.multi_reduction <maximumf>, %33, %cst_27 [1] : vector<128x256xf32> to vector<128xf32>
    %55 = vector.shape_cast %54 : vector<128xf32> to vector<128x1xf32>
    %56 = arith.maximumf %53, %55 : vector<128x1xf32>
    %c0_28 = arith.constant 0 : index
    %c0_29 = arith.constant 0 : index
    %57 = vector.load %arg8[%c0_28, %c0_29] : memref<128x1xf32, #tpu.memory_space<vmem>>, vector<128x1xf32>
    %58 = arith.subf %53, %56 : vector<128x1xf32>
    %59 = math.exp %58 : vector<128x1xf32>
    %60 = arith.mulf %57, %59 : vector<128x1xf32>
    %61 = vector.broadcast %56 : vector<128x1xf32> to vector<128x256xf32>
    %62 = arith.subf %33, %61 : vector<128x256xf32>
    %63 = math.exp %62 : vector<128x256xf32>
    %cst_30 = arith.constant dense<0.000000e+00> : vector<128xf32>
    %64 = vector.multi_reduction <add>, %63, %cst_30 [1] : vector<128x256xf32> to vector<128xf32>
    %65 = vector.shape_cast %64 : vector<128xf32> to vector<128x1xf32>
    %66 = arith.addf %60, %65 : vector<128x1xf32>
    %c0_31 = arith.constant 0 : index
    %c0_32 = arith.constant 0 : index
    %67 = vector.load %arg8[%c0_31, %c0_32] : memref<128x1xf32, #tpu.memory_space<vmem>>, vector<128x1xf32>
    tpu.vector_store %arg8[%c0_31, %c0_32], %66 {strides = array<i32>} : memref<128x1xf32, #tpu.memory_space<vmem>>, vector<128x1xf32>,
    %c0_33 = arith.constant 0 : index
    %c0_34 = arith.constant 0 : index
    %68 = vector.load %arg7[%c0_33, %c0_34] : memref<128x1xf32, #tpu.memory_space<vmem>>, vector<128x1xf32>
    tpu.vector_store %arg7[%c0_33, %c0_34], %56 {strides = array<i32>} : memref<128x1xf32, #tpu.memory_space<vmem>>, vector<128x1xf32>,
    %c2_i32 = arith.constant 2 : i32
    %69 = arith.cmpi eq, %arg1, %c2_i32 : i32
    %70 = arith.extui %69 : i1 to i32
    %c0_i32_35 = arith.constant 0 : i32
    %71 = arith.cmpi ne, %70, %c0_i32_35 : i32
    scf.if %71 {
      %c0_36 = arith.constant 0 : index
      %c0_37 = arith.constant 0 : index
      %72 = vector.load %arg7[%c0_36, %c0_37] : memref<128x1xf32, #tpu.memory_space<vmem>>, vector<128x1xf32>
      %c0_38 = arith.constant 0 : index
      %c0_39 = arith.constant 0 : index
      %73 = vector.load %arg8[%c0_38, %c0_39] : memref<128x1xf32, #tpu.memory_space<vmem>>, vector<128x1xf32>
      %74 = math.log %73 : vector<128x1xf32>
      %75 = arith.addf %72, %74 : vector<128x1xf32>
      %c0_40 = arith.constant 0 : index
      %c0_41 = arith.constant 0 : index
      %76 = vector.load %arg9[%c0_40, %c0_41] : memref<128x1xf32, #tpu.memory_space<vmem>>, vector<128x1xf32>
      %c0_42 = arith.constant 0 : index
      %c0_43 = arith.constant 0 : index
      %77 = vector.load %arg10[%c0_42, %c0_43] : memref<128x1xf32, #tpu.memory_space<vmem>>, vector<128x1xf32>
      %78 = tpu.reciprocal %77 {approx = true} : vector<128x1xf32> -> vector<128x1xf32>
      %79 = arith.mulf %76, %78 : vector<128x1xf32>
      %80 = arith.subf %79, %75 : vector<128x1xf32>
      %c0_44 = arith.constant 0 : index
      %c0_45 = arith.constant 0 : index
      %81 = vector.load %arg6[%c0_44, %c0_45] : memref<128x1xf32, #tpu.memory_space<vmem>>, vector<128x1xf32>
      tpu.vector_store %arg6[%c0_44, %c0_45], %80 {strides = array<i32>} : memref<128x1xf32, #tpu.memory_space<vmem>>, vector<128x1xf32>,
    } else {
    }
    return
  }
  func.func @transform_0(%arg0: i32, %arg1: i32) -> (i32, i32) {
    %c0_i32 = arith.constant 0 : i32
    %c0_i32_0 = arith.constant 0 : i32
    return %arg0, %c0_i32 : i32, i32
  }
  func.func @transform_1(%arg0: i32, %arg1: i32) -> (i32, i32) {
    %c0_i32 = arith.constant 0 : i32
    %c0_i32_0 = arith.constant 0 : i32
    return %arg0, %c0_i32 : i32, i32
  }
  func.func @transform_2(%arg0: i32, %arg1: i32) -> (i32, i32) {
    %c0_i32 = arith.constant 0 : i32
    %c0_i32_0 = arith.constant 0 : i32
    return %arg1, %c0_i32 : i32, i32
  }
  func.func @transform_3(%arg0: i32, %arg1: i32) -> (i32, i32) {
    %c0_i32 = arith.constant 0 : i32
    %c0_i32_0 = arith.constant 0 : i32
    return %c0_i32, %arg1 : i32, i32
  }
  func.func @transform_4(%arg0: i32, %arg1: i32) -> (i32, i32) {
    %c0_i32 = arith.constant 0 : i32
    %c0_i32_0 = arith.constant 0 : i32
    return %arg0, %c0_i32 : i32, i32
  }
}

</mosaic_0001>

<bundles_post_ra>
// kernel: tpu_custom_call.1
= control target key start
LH: loop header
LB: loop body
LE: loop exit
PB: predicated region body
PF: predicated region fallthrough
CT: control target
= control target key end

     0   :  { %s4714_s0 = inlined_call_operand.hbm [shape: f32[384,128], index: 0, kind: input, shape index: {}]   ;;  %s4715_s1 = inlined_call_operand.hbm [shape: s32[384,1], index: 1, kind: input, shape index: {}]   ;;  %s4716_s2 = inlined_call_operand.hbm [shape: f32[768,128], index: 2, kind: input, shape index: {}]   ;;  %s4717_s3 = inlined_call_operand.hbm [shape: s32[1,768], index: 3, kind: input, shape index: {}]   ;;  %s4718_s4 = inlined_call_operand.hbm [shape: f32[384,1], index: 4, kind: output, shape index: {}]  }
   0x1   :  { %4790 = sst [smem:[#allocation62_spill]] %s4714_s0 }
   0x2   :  { %4791 = sst [smem:[#allocation63_spill]] %s4715_s1 }
   0x3   :  { %4792 = sst [smem:[#allocation64_spill]] %s4716_s2 }
   0x4   :  { %4793 = sst [smem:[#allocation65_spill]] %s4718_s4 }
   0x5   :  { %9 = vsyncpa [#allocation7], 0 }
   0x6   :  { %11 = vsyncpa [#allocation7 + $0x1], 0 }
   0x7   :  { %12 = vsyncpa [#allocation10], 0 }
   0x8   :  { %14 = vsyncpa [#allocation10 + $0x1], 0 }
   0x9   :  { %15 = vsyncpa [#allocation13], 0 }
   0xa   :  { %17 = vsyncpa [#allocation13 + $0x1], 0 }
   0xb   :  { %18 = vsyncpa [#allocation8], 0 }
   0xc   :  { %20 = vsyncpa [#allocation8 + $0x1], 0  ;;  %s2944_s15 = smov 0   ;;  %s2946_s16 = smov 0  }
   0xd   :  { %s2948_s17 = smov 0   ;;  %s2950_s18 = smov 0  }
   0xe   :  { %s2952_s19 = smov 0   ;;  %s2954_s20 = smov 0  }
   0xf   :  { %s2956_s21 = smov 0   ;;  %s2958_s22 = smov 0  }
  0x10   :  { %s2960_s23 = smov 0   ;;  %s2962_s24 = smov 0  }
  0x11   :  { %s2964_s25 = smov 0  }
  0x12 LB: > { %4794 = sst [smem:[#allocation20_spill]] %s2876_s18  ;;  %s3000_s26 = sadd.s32 4294967295, %s2904_s25   ;;  %s2904_s25 = sphi %s2964_s25, %s26_s25   ;;  %s2900_s24 = sphi %s2962_s24, %s5087_s24   ;;  %s2896_s23 = sphi %s2960_s23, %s5086_s23   ;;  %s2892_s22 = sphi %s2958_s22, %s5085_s22   ;;  %s2888_s21 = sphi %s2956_s21, %s5084_s21   ;;  %s2884_s20 = sphi %s2954_s20, %s5083_s20   ;;  %s2880_s19 = sphi %s2952_s19, %s5082_s19   ;;  %s2876_s18 = sphi %s2950_s18, %s5081_s18   ;;  %s2872_s17 = sphi %s2948_s17, %s5080_s17   ;;  %s2868_s16 = sphi %s2946_s16, %s5079_s16   ;;  %s2864_s15 = sphi %s2944_s15, %s5078_s15  }
  0x13   : > { %4795 = sst [smem:[#allocation21_spill]] %s2888_s21  ;;  %s2154_s27 = sadd.s32 4294967294, %s2904_s25  }
  0x14   : > { %4796 = sst [smem:[#allocation22_spill]] %s2892_s22  ;;  %p52_p0 = scmp.ne.s32.totalorder %s2884_s20, %s2880_s19 }
  0x15   : > { %p4725_p1 = scmp.eq.s32.totalorder %s2904_s25, 0  ;;  %p58_p2 = scmp.ne.s32.totalorder %s2880_s19, %s2876_s18 }
  0x16   : > { %p4724_p3 = scmp.eq.s32.totalorder %s3000_s26, 0  ;;  %p160_p5 = scmp.eq.s32.totalorder %s3000_s26, 8 }
  0x17   : > { %p54_p4 = por %p4725_p1, %p52_p0  ;;  %p166_p7 = scmp.eq.s32.totalorder %s2154_s27, 8 }
  0x18   : > { %p3016_p6 = por %p4724_p3, %p58_p2  ;;  %p3020_p8 = por %p160_p5, %p52_p0 }
  0x19   : > { %p3024_p9 = por %p166_p7, %p58_p2  ;;  %p4723_p10 = scmp.lt.s32.totalorder %s2904_s25, 9 }
  0x1a   : > { %s4797_s30 = scalar_select %p3016_p6, 1, 0 }
  0x1b   : > { %s4798_s5 = scalar_select %p3020_p8, 1, 0 }
  0x1c   : > { %s4800_s6 = scalar_select %p3024_p9, 1, 0 }
  0x1d   : > { %4799 = sst [smem:[#allocation23_spill]] %s4798_s5  ;;  %s4719_s7 = sand.u32 1, %s2884_s20  }
  0x1e   : > { %4801 = sst [smem:[#allocation24_spill]] %s4800_s6  ;;  %s4720_s8 = sshll.u32 %s2900_s24, 11 }
  0x1f   : > { %s3033_s9 = sshll.u32 %s4719_s7, 7  ;;  %p3037_p11 = pnand %p4723_p10, %p54_p4 }
  0x20   : > { %s207_s11 = sand.u32 1, %s2904_s25   ;;  %s4803_s1 = sld [smem:[#allocation63_spill]] }
  0x21   : > { %s211_s27 = scalar_lea.vmem [#allocation9], %s3033_s9  ;;  %s3053_s28 = scalar_lea.sflag [#allocation10], %s207_s11 }
  0x22   : > { %s218_s29 = sshll.u32 %s211_s27, 4  ;;  %p2652_p0 = pneg %p3037_p11  ;;  %s3050_s29 = int_to_ptr.vmem [resolvable:$true] %s218_s29 }
  0x26   : > { %s3047_s14 = scalar_lea.hbm %s4803_s1, %s4720_s8  ;;  %s2655_s8 = scalar_lea.hbm %s4803_s1, 6144 }
  0x27   : > { %s2650_s7 = scalar_lea.hbm %s3047_s14, 2048  ;;  %p2656_p5 = scmp.lt.u32.totalorder %s3047_s14, %s4803_s1 }
  0x28   : > { %p2651_p13 = scmp.ne.s32.totalorder %s3047_s14, %s2650_s7  ;;  %p2657_p7 = scmp.lt.u32.totalorder %s2655_s8, %s2650_s7 }
  0x29   : > { %p2659_p3 = scmp.lt.u32.totalorder %s2650_s7, %s3047_s14 }
  0x2a   : > { %p2653_p2 = pnand %p2652_p0, %p2651_p13  ;;  %p2658_p10 = por %p2657_p7, %p2656_p5 }
  0x2c   : > { %p2654_p4 = pneg %p2653_p2  ;;  %p2660_p1 = por %p2659_p3, %p2658_p10 }
  0x2e   : > { %p2661_p12 = pnand %p2660_p1, %p2654_p4 }
  0x30   : > { %2664 = shalt.err (!%p2661_p12)
}
  0x31   : > { %s2665_s11 = scalar_lea.vmem %s3050_s29, 2048  ;;  %s2906_s27 = smov [#allocation9]  }
  0x32   : > { %p2666_p13 = scmp.ne.s32.totalorder %s3050_s29, %s2665_s11  ;;  %s2670_s12 = sshll.u32 %s2906_s27, 4  ;;  %s2671_s12 = int_to_ptr.vmem [resolvable:$false] %s2670_s12 }
  0x33   : > { %s2672_s18 = scalar_lea.vmem %s2671_s12, 4096  ;;  %p2673_p8 = scmp.lt.s32.totalorder %s3050_s29, %s2671_s12 }
  0x34   : > { %p2668_p2 = pnand %p2666_p13, %p2652_p0  ;;  %p2674_p5 = scmp.lt.s32.totalorder %s2672_s18, %s2665_s11 }
  0x36   : > { %p2669_p9 = pneg %p2668_p2  ;;  %p2675_p7 = por %p2674_p5, %p2673_p8 }
  0x38   : > { %p2676_p3 = pnand %p2675_p7, %p2669_p9 }
  0x3a   : > { %2679 = shalt.err (!%p2676_p3)
}
  0x3b   : > { %s4727_s6 = smov 128   ;;  %s4729_s7 = smov 8  }
  0x3c   : > { %2283 = dma.hbm_to_vmem [thread:$0]  (!%p3037_p11), %s3047_s14, 2048, %s3050_s29, %s3053_s28, %s4727_s6, %s4727_s6, %s4729_s7  }
  0x3d   : > { %p266_p1 = scmp.lt.s32.totalorder %s2904_s25, 10  ;;  %p4804_p8 = scmp.ge.s32.totalorder %s2904_s25, 1 }
  0x3e   : > { %s4806_s13 = sshll.u32 %s2900_s24, 11  ;;  %s4807_s0 = sld [smem:[#allocation62_spill]] }
  0x3f   : > { %p3087_p9 = pnand %p4804_p8, %p266_p1  ;;  %s190_s18 = scalar_lea.vmem [#allocation6], %s3033_s9 }
  0x40   : > { %s197_s1 = sshll.u32 %s190_s18, 4  ;;  %s4808_s29 = sand.u32 1, %s2884_s20   ;;  %s3099_s1 = int_to_ptr.vmem [resolvable:$true] %s197_s1 }
  0x41   : > { %s4805_s8 = scalar_select %p3087_p9, 1, 0 }
  0x42   : > { %s3103_s14 = scalar_lea.sflag [#allocation7], %s4808_s29 }
  0x44   : > { %s3096_s12 = scalar_lea.hbm %s4807_s0, %s4806_s13  ;;  %s2685_s27 = scalar_lea.hbm %s4807_s0, 6144 }
  0x45   : > { %s2680_s6 = scalar_lea.hbm %s3096_s12, 2048  ;;  %p2686_p13 = scmp.lt.u32.totalorder %s3096_s12, %s4807_s0 }
  0x46   : > { %p2681_p10 = scmp.ne.s32.totalorder %s3096_s12, %s2680_s6  ;;  %p2687_p2 = scmp.lt.u32.totalorder %s2685_s27, %s2680_s6 }
  0x47   : > { %p2689_p7 = scmp.lt.u32.totalorder %s2680_s6, %s3096_s12 }
  0x48   : > { %p2683_p12 = pnand %p2681_p10, %p2652_p0  ;;  %p2688_p5 = por %p2687_p2, %p2686_p13 }
  0x4a   : > { %p2684_p4 = pneg %p2683_p12  ;;  %p2690_p3 = por %p2689_p7, %p2688_p5 }
  0x4c   : > { %p2691_p1 = pnand %p2690_p3, %p2684_p4 }
  0x4e   : > { %2694 = shalt.err (!%p2691_p1)
}
  0x4f   : > { %s2695_s9 = scalar_lea.vmem %s3099_s1, 2048  ;;  %s2909_s18 = smov [#allocation6]  }
  0x50   : > { %p2696_p8 = scmp.ne.s32.totalorder %s3099_s1, %s2695_s9  ;;  %s2700_s29 = sshll.u32 %s2909_s18, 4  ;;  %s2701_s29 = int_to_ptr.vmem [resolvable:$false] %s2700_s29 }
  0x51   : > { %s2702_s4 = scalar_lea.vmem %s2701_s29, 4096  ;;  %p2703_p6 = scmp.lt.s32.totalorder %s3099_s1, %s2701_s29 }
  0x52   : > { %p2698_p10 = pnand %p2696_p8, %p2652_p0  ;;  %p2704_p13 = scmp.lt.s32.totalorder %s2702_s4, %s2695_s9 }
  0x54   : > { %p2699_p12 = pneg %p2698_p10  ;;  %p2705_p2 = por %p2704_p13, %p2703_p6 }
  0x56   : > { %p2706_p5 = pnand %p2705_p2, %p2699_p12 }
  0x58   : > { %2709 = shalt.err (!%p2706_p5)
}
  0x59   : > { %s4809_s6 = smov 8   ;;  %s4810_s7 = smov 128  }
  0x5a   : > { %2280 = dma.hbm_to_vmem [thread:$0]  (!%p3037_p11), %s3096_s12, 2048, %s3099_s1, %s3103_s14, %s4810_s7, %s4810_s7, %s4809_s6  }
  0x5b   : > { %s35_s10 = sadd.s32 1, %s2896_s23  ;;  %s97_s11 = sadd.s32 1, %s2872_s17 }
  0x5c   : > { %p36_p6 = scmp.ge.s32.totalorder %s35_s10, 3  ;;  %p104_p0 = scmp.ne.s32.totalorder %s2872_s17, %s2868_s16 }
  0x5d   : > { %p110_p4 = scmp.ne.s32.totalorder %s2868_s16, %s2864_s15  ;;  %s4812_s13 = sadd.s32 1, %s2900_s24 }
  0x5e   : > { %s5089_s10 = smov (%p36_p6, %s35_s10), 0  ;;  %s5091_s13 = smov (!%p36_p6, %s4812_s13), %s2900_s24 }
  0x5f   : > { %4811 = sst [smem:[#allocation25_spill]] %s5089_s10  ;;  %s94_s27 = ssub.s32 %s2896_s23, %s5089_s10 }
  0x60   : > { %p4813_p7 = scmp.eq.s32.totalorder %s2904_s25, 0  ;;  %p40_p11 = scmp.ge.s32.totalorder %s5091_s13, 3 }
  0x61   : > { %p95_p1 = scmp.eq.s32.totalorder %s94_s27, 0  ;;  %p4815_p8 = scmp.eq.s32.totalorder %s3000_s26, 0 }
  0x62   : > { %p3147_p3 = por %p104_p0, %p4813_p7  ;;  %s3158_s15 = sand.u32 1, %s2872_s17  }
  0x63   : > { %p3153_p10 = por %p110_p4, %p4815_p8  ;;  %s5093_s13 = smov (%p40_p11, %s5091_s13), 0 }
  0x64   : > { %s3163_s12 = scalar_select %p95_p1, %s2872_s17, %s97_s11  }
  0x65   : > { %s4816_s1 = scalar_select %p3153_p10, 1, 0 }
  0x66   : > { %s42_s14 = ssub.s32 %s2900_s24, %s5093_s13  ;;  %s2163_s18 = sshll.u32 %s3158_s15, 8 }
  0x67   : > { %p43_p12 = scmp.eq.s32.totalorder %s42_s14, 0  ;;  %s2216_s29 = sshll.u32 %s2896_s23, 12 }
  0x68   : > { %s232_s4 = scalar_lea.vmem [#allocation11], %s2163_s18  ;;  %s4817_s0 = sadd.s32 1, %s2884_s20 }
  0x69   : > { %s239_s27 = sshll.u32 %s232_s4, 4  ;;  %s4818_s2 = sld [smem:[#allocation64_spill]]  ;;  %s3179_s27 = int_to_ptr.vmem [resolvable:$true] %s239_s27 }
  0x6a   : > { %s3172_s10 = scalar_select %p43_p12, %s2884_s20, %s4817_s0  }
  0x6b   : > { %p4819_p13 = scmp.lt.s32.totalorder %s2904_s25, 9  ;;  %s2217_s14 = sshll.u32 %s2896_s23, 5 }
  0x6d   : > { %p3185_p2 = pnand %p4819_p13, %p3147_p3 }
  0x6f   : > { %s3177_s21 = scalar_lea.hbm %s4818_s2, %s2216_s29  ;;  %p2712_p6 = pneg %p3185_p2 }
  0x70   : > { %s2710_s18 = scalar_lea.hbm %s3177_s21, 4096  ;;  %s2715_s9 = scalar_lea.hbm %s4818_s2, 12288 }
  0x71   : > { %p2711_p5 = scmp.ne.s32.totalorder %s3177_s21, %s2710_s18  ;;  %p2716_p7 = scmp.lt.u32.totalorder %s3177_s21, %s4818_s2 }
  0x72   : > { %p2717_p3 = scmp.lt.u32.totalorder %s2715_s9, %s2710_s18  ;;  %p2719_p1 = scmp.lt.u32.totalorder %s2710_s18, %s3177_s21 }
  0x73   : > { %p2713_p0 = pnand %p2712_p6, %p2711_p5 }
  0x74   : > { %p2718_p11 = por %p2717_p3, %p2716_p7 }
  0x75   : > { %p2714_p4 = pneg %p2713_p0 }
  0x76   : > { %p2720_p8 = por %p2719_p1, %p2718_p11 }
  0x78   : > { %p2721_p12 = pnand %p2720_p8, %p2714_p4 }
  0x7a   : > { %2724 = shalt.err (!%p2721_p12)
}
  0x7b   : > { %s2725_s0 = scalar_lea.vmem %s3179_s27, 4096  ;;  %s2910_s22 = smov [#allocation11]  }
  0x7c   : > { %p2726_p13 = scmp.ne.s32.totalorder %s3179_s27, %s2725_s0  ;;  %s2730_s5 = sshll.u32 %s2910_s22, 4  ;;  %s2731_s5 = int_to_ptr.vmem [resolvable:$false] %s2730_s5 }
  0x7d   : > { %s2732_s29 = scalar_lea.vmem %s2731_s5, 8192  ;;  %p2733_p10 = scmp.lt.s32.totalorder %s3179_s27, %s2731_s5 }
  0x7e   : > { %p2728_p5 = pnand %p2726_p13, %p2712_p6  ;;  %p2734_p7 = scmp.lt.s32.totalorder %s2732_s29, %s2725_s0 }
  0x80   : > { %p2729_p0 = pneg %p2728_p5  ;;  %p2735_p3 = por %p2734_p7, %p2733_p10 }
  0x82   : > { %p2736_p11 = pnand %p2735_p3, %p2729_p0 }
  0x84   : > { %2739 = shalt.err (!%p2736_p11)
}
  0x85   : > { %2286 = dma.hbm_to_vmem [thread:$0]  (!%p3185_p2), %s3177_s21, 4096, %s3179_s27, %s3053_s28, %s4810_s7, %s4810_s7, %s4809_s6  }
  0x86   : > { %s3225_s0 = scalar_lea.hbm %s4717_s3, %s2217_s14  ;;  %s4821_s4 = sshll.u32 %s3158_s15, 1 }
  0x87   : > { %s253_s22 = scalar_lea.vmem [#allocation12], %s4821_s4  ;;  %s250_s29 = scalar_lea.sflag [#allocation13], %s3158_s15 }
  0x88   : > { %s261_s5 = sshll.u32 %s253_s22, 4  ;;  %s2740_s2 = scalar_lea.hbm %s3225_s0, 32  ;;  %s262_s5 = int_to_ptr.vmem [resolvable:$true] %s261_s5 }
  0x89   : > { %p2741_p10 = scmp.ne.s32.totalorder %s3225_s0, %s2740_s2  ;;  %s2745_s6 = scalar_lea.hbm %s4717_s3, 96 }
  0x8a   : > { %p2746_p8 = scmp.lt.u32.totalorder %s3225_s0, %s4717_s3  ;;  %p2747_p12 = scmp.lt.u32.totalorder %s2745_s6, %s2740_s2 }
  0x8b   : > { %p2743_p4 = pnand %p2741_p10, %p2712_p6  ;;  %p2749_p5 = scmp.lt.u32.totalorder %s2740_s2, %s3225_s0 }
  0x8c   : > { %p2748_p13 = por %p2747_p12, %p2746_p8 }
  0x8d   : > { %p2744_p1 = pneg %p2743_p4 }
  0x8e   : > { %p2750_p0 = por %p2749_p5, %p2748_p13 }
  0x90   : > { %p2751_p7 = pnand %p2750_p0, %p2744_p1 }
  0x92   : > { %2754 = shalt.err (!%p2751_p7)
}
  0x93   : > { %s2755_s15 = scalar_lea.vmem %s262_s5, 32  ;;  %s2911_s14 = smov [#allocation12]  }
  0x94   : > { %p2756_p3 = scmp.ne.s32.totalorder %s262_s5, %s2755_s15  ;;  %s2760_s18 = sshll.u32 %s2911_s14, 4  ;;  %s2761_s18 = int_to_ptr.vmem [resolvable:$false] %s2760_s18 }
  0x95   : > { %s2762_s9 = scalar_lea.vmem %s2761_s18, 64  ;;  %p2763_p4 = scmp.lt.s32.totalorder %s262_s5, %s2761_s18 }
  0x96   : > { %p2758_p11 = pnand %p2756_p3, %p2712_p6  ;;  %p2764_p9 = scmp.lt.s32.totalorder %s2762_s9, %s2755_s15 }
  0x98   : > { %p2759_p10 = pneg %p2758_p11  ;;  %p2765_p8 = por %p2764_p9, %p2763_p4 }
  0x9a   : > { %p2766_p12 = pnand %p2765_p8, %p2759_p10 }
  0x9c   : > { %2769 = shalt.err (!%p2766_p12)
}
  0x9d   : > { %2289 = dma.hbm_to_vmem [thread:$0]  (!%p3185_p2), %s3225_s0, 32, %s262_s5, %s250_s29  }
  0x9e   : > { %p4822_p1 = scmp.ne.s32.totalorder %s4805_s8, 0 }
  0xa0   : > { %270 = sbr.rel (%p4822_p1) target bundleno = 1237 (0x4d5), region = 36 }
  0xa7   : > { %s3252_s2 = sand.u32 1, %s2880_s19   ;;  %p4823_p9 = scmp.ne.s32.totalorder %s4797_s30, 0 }
  0xa8   : > { %s2170_s4 = sshll.u32 %s3252_s2, 7  ;;  %s273_s22 = scalar_lea.sflag [#allocation7], %s3252_s2 }
  0xa9   : > { %s3256_s21 = scalar_lea.vmem [#allocation6], %s2170_s4 }
  0xaa   : > { %2843 = dma.done.wait (%p4823_p9), %s273_s22, 2048  }
  0xab   : > { %2845 = vsyncadd (%p4823_p9), %s273_s22, 4294965248  ;;  %s281_s11 = sand.u32 1, %s3000_s26   ;;  %s3263_s0 = scalar_lea.vmem [#allocation9], %s2170_s4 }
  0xac   : > { %s282_s8 = scalar_lea.sflag [#allocation10], %s281_s11 }
  0xad   : > { %2847 = dma.done.wait (%p4823_p9), %s282_s8, 2048  }
  0xae   : > { %2849 = vsyncadd (%p4823_p9), %s282_s8, 4294965248  ;;  %s292_s5 = sand.u32 1, %s2868_s16   ;;  %p4824_p2 = scmp.ne.s32.totalorder %s4816_s1, 0 }
  0xaf   : > { %s2172_s29 = sshll.u32 %s292_s5, 8 }
  0xb0   : > { %s3270_s28 = scalar_lea.vmem [#allocation11], %s2172_s29 }
  0xb1   : > { %2851 = dma.done.wait (%p4824_p2), %s282_s8, 4096  }
  0xb2   : > { %2853 = vsyncadd (%p4824_p2), %s282_s8, 4294963200  ;;  %s2173_s26 = sshll.u32 %s292_s5, 1  ;;  %s300_s6 = scalar_lea.sflag [#allocation13], %s292_s5 }
  0xb3   : > { %s3276_s7 = scalar_lea.vmem [#allocation12], %s2173_s26 }
  0xb4   : > { %2855 = dma.done.wait (%p4824_p2), %s300_s6, 32  }
  0xb5   : > { %2857 = vsyncadd (%p4824_p2), %s300_s6, 4294967264  ;;  %s3282_s30 = scalar_lea.vmem [#allocation14], %s2170_s4  ;;  %s4825_s27 = sld [smem:[#allocation21_spill]] }
  0xbb   : > { %p2175_p6 = scmp.ne.s32.totalorder %s4825_s27, 0 }
  0xbc   : > { %vm353_vm0 = vcmask (!%p2175_p6), 7168   ;;  %v2912_v0 = vmov (!%p2175_p6), -inf   ;;  %v2913_v1 = vmov (!%p2175_p6), 0.0  }
  0xbd   : > { %352 = sbr.rel (%p2175_p6) target bundleno = 221 (0xdd), region = 56  ;;  %354 = vst.msk [vmem:[#allocation2] sm:$0xff] (!%p2175_p6), %vm353_vm0, %v2912_v0  ;;  %355 = vst.msk [vmem:[#allocation2 + $0x8] sm:$0xff] (!%p2175_p6), %vm353_vm0, %v2912_v0 }
  0xbe   : > { %356 = vst.msk [vmem:[#allocation2 + $0x10] sm:$0xff] (!%p2175_p6), %vm353_vm0, %v2912_v0  ;;  %357 = vst.msk [vmem:[#allocation2 + $0x18] sm:$0xff] (!%p2175_p6), %vm353_vm0, %v2912_v0 }
  0xbf   : > { %358 = vst.msk [vmem:[#allocation2 + $0x20] sm:$0xff] (!%p2175_p6), %vm353_vm0, %v2912_v0  ;;  %359 = vst.msk [vmem:[#allocation2 + $0x28] sm:$0xff] (!%p2175_p6), %vm353_vm0, %v2912_v0 }
  0xc0   : > { %360 = vst.msk [vmem:[#allocation2 + $0x30] sm:$0xff] (!%p2175_p6), %vm353_vm0, %v2912_v0  ;;  %361 = vst.msk [vmem:[#allocation2 + $0x38] sm:$0xff] (!%p2175_p6), %vm353_vm0, %v2912_v0 }
  0xc1   : > { %362 = vst.msk [vmem:[#allocation2 + $0x40] sm:$0xff] (!%p2175_p6), %vm353_vm0, %v2912_v0  ;;  %363 = vst.msk [vmem:[#allocation2 + $0x48] sm:$0xff] (!%p2175_p6), %vm353_vm0, %v2912_v0 }
  0xc2   : > { %364 = vst.msk [vmem:[#allocation2 + $0x50] sm:$0xff] (!%p2175_p6), %vm353_vm0, %v2912_v0  ;;  %365 = vst.msk [vmem:[#allocation2 + $0x58] sm:$0xff] (!%p2175_p6), %vm353_vm0, %v2912_v0 }
  0xc3   : > { %366 = vst.msk [vmem:[#allocation2 + $0x60] sm:$0xff] (!%p2175_p6), %vm353_vm0, %v2912_v0  ;;  %367 = vst.msk [vmem:[#allocation2 + $0x68] sm:$0xff] (!%p2175_p6), %vm353_vm0, %v2912_v0 }
  0xc4   : > { %368 = vst.msk [vmem:[#allocation2 + $0x70] sm:$0xff] %vm353_vm0, %v2912_v0  ;;  %369 = vst.msk [vmem:[#allocation2 + $0x78] sm:$0xff] %vm353_vm0, %v2912_v0 }
  0xc5   : > { %370 = vst.msk [vmem:[#allocation3] sm:$0xff] %vm353_vm0, %v2913_v1  ;;  %371 = vst.msk [vmem:[#allocation3 + $0x8] sm:$0xff] %vm353_vm0, %v2913_v1 }
  0xc6   : > { %372 = vst.msk [vmem:[#allocation3 + $0x10] sm:$0xff] %vm353_vm0, %v2913_v1  ;;  %373 = vst.msk [vmem:[#allocation3 + $0x18] sm:$0xff] %vm353_vm0, %v2913_v1 }
  0xc7   : > { %374 = vst.msk [vmem:[#allocation3 + $0x20] sm:$0xff] %vm353_vm0, %v2913_v1  ;;  %375 = vst.msk [vmem:[#allocation3 + $0x28] sm:$0xff] %vm353_vm0, %v2913_v1 }
  0xc8   : > { %376 = vst.msk [vmem:[#allocation3 + $0x30] sm:$0xff] %vm353_vm0, %v2913_v1  ;;  %377 = vst.msk [vmem:[#allocation3 + $0x38] sm:$0xff] %vm353_vm0, %v2913_v1 }
  0xc9   : > { %378 = vst.msk [vmem:[#allocation3 + $0x40] sm:$0xff] %vm353_vm0, %v2913_v1  ;;  %379 = vst.msk [vmem:[#allocation3 + $0x48] sm:$0xff] %vm353_vm0, %v2913_v1 }
  0xca   : > { %380 = vst.msk [vmem:[#allocation3 + $0x50] sm:$0xff] %vm353_vm0, %v2913_v1  ;;  %381 = vst.msk [vmem:[#allocation3 + $0x58] sm:$0xff] %vm353_vm0, %v2913_v1 }
  0xcb   : > { %382 = vst.msk [vmem:[#allocation3 + $0x60] sm:$0xff] %vm353_vm0, %v2913_v1  ;;  %383 = vst.msk [vmem:[#allocation3 + $0x68] sm:$0xff] %vm353_vm0, %v2913_v1 }
  0xcc   : > { %384 = vst.msk [vmem:[#allocation3 + $0x70] sm:$0xff] %vm353_vm0, %v2913_v1  ;;  %385 = vst.msk [vmem:[#allocation3 + $0x78] sm:$0xff] %vm353_vm0, %v2913_v1 }
  0xcd   : > { %386 = vst.msk [vmem:[#allocation4] sm:$0xff] %vm353_vm0, %v2913_v1  ;;  %387 = vst.msk [vmem:[#allocation4 + $0x8] sm:$0xff] %vm353_vm0, %v2913_v1 }
  0xce   : > { %388 = vst.msk [vmem:[#allocation4 + $0x10] sm:$0xff] %vm353_vm0, %v2913_v1  ;;  %389 = vst.msk [vmem:[#allocation4 + $0x18] sm:$0xff] %vm353_vm0, %v2913_v1 }
  0xcf   : > { %390 = vst.msk [vmem:[#allocation4 + $0x20] sm:$0xff] %vm353_vm0, %v2913_v1  ;;  %391 = vst.msk [vmem:[#allocation4 + $0x28] sm:$0xff] %vm353_vm0, %v2913_v1 }
  0xd0   : > { %392 = vst.msk [vmem:[#allocation4 + $0x30] sm:$0xff] %vm353_vm0, %v2913_v1  ;;  %393 = vst.msk [vmem:[#allocation4 + $0x38] sm:$0xff] %vm353_vm0, %v2913_v1 }
  0xd1   : > { %394 = vst.msk [vmem:[#allocation4 + $0x40] sm:$0xff] %vm353_vm0, %v2913_v1  ;;  %395 = vst.msk [vmem:[#allocation4 + $0x48] sm:$0xff] %vm353_vm0, %v2913_v1 }
  0xd2   : > { %396 = vst.msk [vmem:[#allocation4 + $0x50] sm:$0xff] %vm353_vm0, %v2913_v1  ;;  %397 = vst.msk [vmem:[#allocation4 + $0x58] sm:$0xff] %vm353_vm0, %v2913_v1 }
  0xd3   : > { %398 = vst.msk [vmem:[#allocation4 + $0x60] sm:$0xff] %vm353_vm0, %v2913_v1  ;;  %399 = vst.msk [vmem:[#allocation4 + $0x68] sm:$0xff] %vm353_vm0, %v2913_v1 }
  0xd4   : > { %400 = vst.msk [vmem:[#allocation4 + $0x70] sm:$0xff] %vm353_vm0, %v2913_v1  ;;  %401 = vst.msk [vmem:[#allocation4 + $0x78] sm:$0xff] %vm353_vm0, %v2913_v1 }
  0xd5   : > { %402 = vst.msk [vmem:[#allocation5] sm:$0xff] %vm353_vm0, %v2913_v1  ;;  %403 = vst.msk [vmem:[#allocation5 + $0x8] sm:$0xff] %vm353_vm0, %v2913_v1 }
  0xd6   : > { %404 = vst.msk [vmem:[#allocation5 + $0x10] sm:$0xff] %vm353_vm0, %v2913_v1  ;;  %405 = vst.msk [vmem:[#allocation5 + $0x18] sm:$0xff] %vm353_vm0, %v2913_v1 }
  0xd7   : > { %406 = vst.msk [vmem:[#allocation5 + $0x20] sm:$0xff] %vm353_vm0, %v2913_v1  ;;  %407 = vst.msk [vmem:[#allocation5 + $0x28] sm:$0xff] %vm353_vm0, %v2913_v1 }
  0xd8   : > { %408 = vst.msk [vmem:[#allocation5 + $0x30] sm:$0xff] %vm353_vm0, %v2913_v1  ;;  %409 = vst.msk [vmem:[#allocation5 + $0x38] sm:$0xff] %vm353_vm0, %v2913_v1 }
  0xd9   : > { %410 = vst.msk [vmem:[#allocation5 + $0x40] sm:$0xff] %vm353_vm0, %v2913_v1  ;;  %411 = vst.msk [vmem:[#allocation5 + $0x48] sm:$0xff] %vm353_vm0, %v2913_v1 }
  0xda   : > { %412 = vst.msk [vmem:[#allocation5 + $0x50] sm:$0xff] %vm353_vm0, %v2913_v1  ;;  %413 = vst.msk [vmem:[#allocation5 + $0x58] sm:$0xff] %vm353_vm0, %v2913_v1 }
  0xdb   : > { %414 = vst.msk [vmem:[#allocation5 + $0x60] sm:$0xff] %vm353_vm0, %v2913_v1  ;;  %415 = vst.msk [vmem:[#allocation5 + $0x68] sm:$0xff] %vm353_vm0, %v2913_v1 }
  0xdc   : > { %416 = vst.msk [vmem:[#allocation5 + $0x70] sm:$0xff] %vm353_vm0, %v2913_v1  ;;  %417 = vst.msk [vmem:[#allocation5 + $0x78] sm:$0xff] %vm353_vm0, %v2913_v1 }
  0xdd PF: > { %v3350_v2 = vld [vmem:[%s3270_s28 + $0x80] sm:$0xff]  ;;  %v3356_v4 = vld [vmem:[%s3270_s28 + $0x88] sm:$0xff]  ;;  %v3370_v10 = vld [vmem:[%s3270_s28 + $0x90] sm:$0xff]  ;;  %s5052_s1 = sld [smem:[#allocation21_spill]] }
  0xde   : > { %v3353_v3 = vld [vmem:[%s3270_s28] sm:$0xff]  ;;  %v579_v5 = vmul.f32 %v3350_v2, %v3350_v2  ;;  %v3363_v7 = vld [vmem:[%s3270_s28 + $0x8] sm:$0xff]  ;;  %v580_v8 = vmul.f32 %v3356_v4, %v3356_v4  ;;  %v3373_v11 = vld [vmem:[%s3270_s28 + $0x98] sm:$0xff]  ;;  %v581_v12 = vmul.f32 %v3370_v10, %v3370_v10 }
  0xdf   : > { %v563_v6 = vmul.f32 %v3353_v3, %v3353_v3  ;;  %v564_v9 = vmul.f32 %v3363_v7, %v3363_v7  ;;  %v582_v13 = vmul.f32 %v3373_v11, %v3373_v11  ;;  %v3380_v14 = vld [vmem:[%s3270_s28 + $0x10] sm:$0xff]  ;;  %v3383_v15 = vld [vmem:[%s3270_s28 + $0x18] sm:$0xff]  ;;  %v3390_v18 = vld [vmem:[%s3270_s28 + $0xa0] sm:$0xff] }
  0xe0   : > { %627 = vadd.xlane.f32.xlu0 %v579_v5  ;;  %v565_v16 = vmul.f32 %v3380_v14, %v3380_v14  ;;  %v566_v17 = vmul.f32 %v3383_v15, %v3383_v15  ;;  %v3393_v19 = vld [vmem:[%s3270_s28 + $0xa8] sm:$0xff]  ;;  %v583_v20 = vmul.f32 %v3390_v18, %v3390_v18  ;;  %v3400_v22 = vld [vmem:[%s3270_s28 + $0x20] sm:$0xff]  ;;  %v3410_v26 = vld [vmem:[%s3270_s28 + $0xb0] sm:$0xff] }
  0xe1   : > { %595 = vadd.xlane.f32.xlu1 %v563_v6  ;;  %v584_v21 = vmul.f32 %v3393_v19, %v3393_v19  ;;  %v3403_v23 = vld [vmem:[%s3270_s28 + $0x28] sm:$0xff]  ;;  %v567_v24 = vmul.f32 %v3400_v22, %v3400_v22  ;;  %v3413_v27 = vld [vmem:[%s3270_s28 + $0xb8] sm:$0xff]  ;;  %v585_v28 = vmul.f32 %v3410_v26, %v3410_v26  ;;  %v3420_v30 = vld [vmem:[%s3270_s28 + $0x30] sm:$0xff] }
  0xe2   : > { %v568_v25 = vmul.f32 %v3403_v23, %v3403_v23  ;;  %v586_v29 = vmul.f32 %v3413_v27, %v3413_v27  ;;  %v3423_v31 = vld [vmem:[%s3270_s28 + $0x38] sm:$0xff]  ;;  %v569_v32 = vmul.f32 %v3420_v30, %v3420_v30  ;;  %v3430_v34 = vld [vmem:[%s3270_s28 + $0xc0] sm:$0xff]  ;;  %v3433_v35 = vld [vmem:[%s3270_s28 + $0xc8] sm:$0xff] }
  0xe3   : > { %v570_v33 = vmul.f32 %v3423_v31, %v3423_v31  ;;  %v587_v36 = vmul.f32 %v3430_v34, %v3430_v34  ;;  %v588_v37 = vmul.f32 %v3433_v35, %v3433_v35  ;;  %v3440_v38 = vld [vmem:[%s3270_s28 + $0x40] sm:$0xff]  ;;  %v3443_v39 = vld [vmem:[%s3270_s28 + $0x48] sm:$0xff]  ;;  %v3450_v42 = vld [vmem:[%s3270_s28 + $0xd0] sm:$0xff]  ;;  %p2208_p13 = scmp.ne.s32.totalorder %s5052_s1, 2 }
  0xe4   : > { %629 = vadd.xlane.f32.xlu0 %v580_v8  ;;  %v571_v40 = vmul.f32 %v3440_v38, %v3440_v38  ;;  %v572_v41 = vmul.f32 %v3443_v39, %v3443_v39  ;;  %v3453_v43 = vld [vmem:[%s3270_s28 + $0xd8] sm:$0xff]  ;;  %v589_v44 = vmul.f32 %v3450_v42, %v3450_v42  ;;  %v3460_v46 = vld [vmem:[%s3270_s28 + $0x50] sm:$0xff]  ;;  %v3470_v50 = vld [vmem:[%s3270_s28 + $0xe0] sm:$0xff] }
  0xe5   : > { %597 = vadd.xlane.f32.xlu1 %v564_v9  ;;  %v590_v45 = vmul.f32 %v3453_v43, %v3453_v43  ;;  %v3463_v47 = vld [vmem:[%s3270_s28 + $0x58] sm:$0xff]  ;;  %v573_v48 = vmul.f32 %v3460_v46, %v3460_v46  ;;  %v3473_v51 = vld [vmem:[%s3270_s28 + $0xe8] sm:$0xff]  ;;  %v591_v52 = vmul.f32 %v3470_v50, %v3470_v50  ;;  %v3480_v54 = vld [vmem:[%s3270_s28 + $0x60] sm:$0xff] }
  0xe6   : > { %v574_v49 = vmul.f32 %v3463_v47, %v3463_v47  ;;  %v592_v53 = vmul.f32 %v3473_v51, %v3473_v51  ;;  %v3483_v55 = vld [vmem:[%s3270_s28 + $0x68] sm:$0xff]  ;;  %v575_v56 = vmul.f32 %v3480_v54, %v3480_v54  ;;  %v3490_v58 = vld [vmem:[%s3270_s28 + $0xf0] sm:$0xff]  ;;  %v3493_v59 = vld [vmem:[%s3270_s28 + $0xf8] sm:$0xff] }
  0xe7   : > { %v576_v57 = vmul.f32 %v3483_v55, %v3483_v55  ;;  %v593_v60 = vmul.f32 %v3490_v58, %v3490_v58  ;;  %v594_v61 = vmul.f32 %v3493_v59, %v3493_v59  ;;  %v3500_v62 = vld [vmem:[%s3270_s28 + $0x70] sm:$0xff]  ;;  %v3503_v63 = vld [vmem:[%s3270_s28 + $0x78] sm:$0xff]  ;;  %v3510_v5 = vld [vmem:[%s3256_s21 + $0x8] sm:$0xff] }
  0xe8   : > { %631 = vadd.xlane.f32.xlu0 %v581_v12  ;;  %v577_v0 = vmul.f32 %v3500_v62, %v3500_v62  ;;  %v578_v1 = vmul.f32 %v3503_v63, %v3503_v63  ;;  %v3513_v6 = vld [vmem:[%s3256_s21] sm:$0xff]  ;;  %v484_v8 = vmul.f32 %v3510_v5, %v3510_v5  ;;  %v3520_v12 = vld [vmem:[%s3256_s21 + $0x48] sm:$0xff] }
  0xe9   : > { %633 = vadd.xlane.f32.xlu1 %v582_v13  ;;  %v483_v9 = vmul.f32 %v3513_v6, %v3513_v6  ;;  %v3523_v13 = vld [vmem:[%s3256_s21 + $0x40] sm:$0xff] }
  0xec   : > { %599 = vadd.xlane.f32.xlu0 %v565_v16  ;;  %v492_v16 = vmul.f32 %v3520_v12, %v3520_v12 }
  0xed   : > { %601 = vadd.xlane.f32.xlu1 %v566_v17  ;;  %v491_v17 = vmul.f32 %v3523_v13, %v3523_v13 }
  0xf0   : > { %635 = vadd.xlane.f32.xlu0 %v583_v20  ;;  %v3530_v20 = vld [vmem:[%s3256_s21 + $0x18] sm:$0xff] }
  0xf1   : > { %637 = vadd.xlane.f32.xlu1 %v584_v21  ;;  %v3533_v21 = vld [vmem:[%s3256_s21 + $0x10] sm:$0xff] }
  0xf4   : > { %603 = vadd.xlane.f32.xlu0 %v567_v24  ;;  %v486_v24 = vmul.f32 %v3530_v20, %v3530_v20 }
  0xf5   : > { %605 = vadd.xlane.f32.xlu1 %v568_v25  ;;  %v485_v25 = vmul.f32 %v3533_v21, %v3533_v21 }
  0xf8   : > { %639 = vadd.xlane.f32.xlu0 %v585_v28  ;;  %v3540_v28 = vld [vmem:[%s3256_s21 + $0x58] sm:$0xff] }
  0xf9   : > { %641 = vadd.xlane.f32.xlu1 %v586_v29  ;;  %v3543_v29 = vld [vmem:[%s3256_s21 + $0x50] sm:$0xff] }
  0xfc   : > { %607 = vadd.xlane.f32.xlu0 %v569_v32  ;;  %v494_v32 = vmul.f32 %v3540_v28, %v3540_v28 }
  0xfd   : > { %609 = vadd.xlane.f32.xlu1 %v570_v33  ;;  %v493_v33 = vmul.f32 %v3543_v29, %v3543_v29 }
 0x100   : > { %643 = vadd.xlane.f32.xlu0 %v587_v36  ;;  %v3550_v36 = vld [vmem:[%s3256_s21 + $0x28] sm:$0xff] }
 0x101   : > { %645 = vadd.xlane.f32.xlu1 %v588_v37  ;;  %v3553_v37 = vld [vmem:[%s3256_s21 + $0x20] sm:$0xff] }
 0x104   : > { %611 = vadd.xlane.f32.xlu0 %v571_v40  ;;  %v488_v40 = vmul.f32 %v3550_v36, %v3550_v36 }
 0x105   : > { %613 = vadd.xlane.f32.xlu1 %v572_v41  ;;  %v487_v41 = vmul.f32 %v3553_v37, %v3553_v37 }
 0x108   : > { %647 = vadd.xlane.f32.xlu0 %v589_v44  ;;  %v3560_v44 = vld [vmem:[%s3256_s21 + $0x68] sm:$0xff] }
 0x109   : > { %649 = vadd.xlane.f32.xlu1 %v590_v45  ;;  %v3563_v45 = vld [vmem:[%s3256_s21 + $0x60] sm:$0xff] }
 0x10c   : > { %615 = vadd.xlane.f32.xlu0 %v573_v48  ;;  %v496_v48 = vmul.f32 %v3560_v44, %v3560_v44 }
 0x10d   : > { %617 = vadd.xlane.f32.xlu1 %v574_v49  ;;  %v495_v49 = vmul.f32 %v3563_v45, %v3563_v45 }
 0x110   : > { %651 = vadd.xlane.f32.xlu0 %v591_v52  ;;  %v3570_v52 = vld [vmem:[%s3256_s21 + $0x38] sm:$0xff] }
 0x111   : > { %653 = vadd.xlane.f32.xlu1 %v592_v53  ;;  %v3573_v53 = vld [vmem:[%s3256_s21 + $0x30] sm:$0xff] }
 0x112   : > { %4826 = vst [vmem:[#allocation26_spill] sm:$0xff] %v3573_v53 }
 0x114   : > { %619 = vadd.xlane.f32.xlu0 %v575_v56  ;;  %v490_v56 = vmul.f32 %v3570_v52, %v3570_v52 }
 0x115   : > { %621 = vadd.xlane.f32.xlu1 %v576_v57  ;;  %v489_v57 = vmul.f32 %v3573_v53, %v3573_v53 }
 0x118   : > { %655 = vadd.xlane.f32.xlu0 %v593_v60  ;;  %v3580_v60 = vld [vmem:[%s3256_s21 + $0x78] sm:$0xff] }
 0x119   : > { %657 = vadd.xlane.f32.xlu1 %v594_v61  ;;  %4827 = vst [vmem:[#allocation27_spill] sm:$0xff] %v3580_v60  ;;  %v3583_v61 = vld [vmem:[%s3256_s21 + $0x70] sm:$0xff] }
 0x11a   : > { %4828 = vst [vmem:[#allocation28_spill] sm:$0xff] %v3583_v61 }
 0x11c   : > { %623 = vadd.xlane.f32.xlu0 %v577_v0  ;;  %v498_v0 = vmul.f32 %v3580_v60, %v3580_v60 }
 0x11d   : > { %625 = vadd.xlane.f32.xlu1 %v578_v1  ;;  %v497_v1 = vmul.f32 %v3583_v61, %v3583_v61 }
 0x120   : > { %499 = vadd.xlane.f32.xlu0 %v483_v9  ;;  %v467_v9 = vld [vmem:[%s3263_s0 + $0x8] sm:$0xff] }
 0x121   : > { %501 = vadd.xlane.f32.xlu1 %v484_v8  ;;  %v4737_v8 = vmov 0  }
 0x122   : > { %2393 = vset.pattern.permute.xlu1 %v4737_v8  ;;  %2392 = vset.pattern.permute.xlu0 %v4737_v8 }
 0x124   : > { %515 = vadd.xlane.f32.xlu0 %v491_v17  ;;  %v469_v17 = vld [vmem:[%s3263_s0 + $0x18] sm:$0xff] }
 0x125   : > { %517 = vadd.xlane.f32.xlu1 %v492_v16  ;;  %v468_v16 = vld [vmem:[%s3263_s0 + $0x10] sm:$0xff] }
 0x128   : > { %503 = vadd.xlane.f32.xlu0 %v485_v25  ;;  %v466_v25 = vld [vmem:[%s3263_s0] sm:$0xff] }
 0x129   : > { %505 = vadd.xlane.f32.xlu1 %v486_v24  ;;  %v470_v24 = vld [vmem:[%s3263_s0 + $0x20] sm:$0xff] }
 0x12c   : > { %519 = vadd.xlane.f32.xlu0 %v493_v33  ;;  %v471_v33 = vld [vmem:[%s3263_s0 + $0x28] sm:$0xff] }
 0x12d   : > { %521 = vadd.xlane.f32.xlu1 %v494_v32  ;;  %v475_v32 = vld [vmem:[%s3263_s0 + $0x48] sm:$0xff] }
 0x130   : > { %507 = vadd.xlane.f32.xlu0 %v487_v41  ;;  %v472_v41 = vld [vmem:[%s3263_s0 + $0x30] sm:$0xff] }
 0x131   : > { %509 = vadd.xlane.f32.xlu1 %v488_v40  ;;  %v477_v40 = vld [vmem:[%s3263_s0 + $0x58] sm:$0xff] }
 0x134   : > { %523 = vadd.xlane.f32.xlu0 %v495_v49  ;;  %v473_v49 = vld [vmem:[%s3263_s0 + $0x38] sm:$0xff] }
 0x135   : > { %525 = vadd.xlane.f32.xlu1 %v496_v48  ;;  %v479_v48 = vld [vmem:[%s3263_s0 + $0x68] sm:$0xff] }
 0x138   : > { %511 = vadd.xlane.f32.xlu0 %v489_v57 }
 0x139   : > { %513 = vadd.xlane.f32.xlu1 %v490_v56 }
 0x13c   : > { %527 = vadd.xlane.f32.xlu0 %v497_v1 }
 0x13d   : > { %529 = vadd.xlane.f32.xlu1 %v498_v0 }
 0x14e   : > { %972 = vperm.xlu1 %2393, %v467_v9   ;;  %v481_v9 = vld [vmem:[%s3263_s0 + $0x78] sm:$0xff] }
 0x152   : > { %975 = vperm.xlu1 %2393, %v468_v16   ;;  %969 = vperm.xlu0 %2392, %v466_v25   ;;  %v474_v16 = vld [vmem:[%s3263_s0 + $0x40] sm:$0xff] }
 0x156   : > { %978 = vperm.xlu1 %2393, %v469_v17   ;;  %996 = vperm.xlu0 %2392, %v475_v32  }
 0x15a   : > { %981 = vperm.xlu1 %2393, %v470_v24   ;;  %1002 = vperm.xlu0 %2392, %v477_v40  }
 0x15e   : > { %984 = vperm.xlu1 %2393, %v471_v33   ;;  %1008 = vperm.xlu0 %2392, %v479_v48   ;;  %v476_v33 = vld [vmem:[%s3263_s0 + $0x50] sm:$0xff] }
 0x162   : > { %987 = vperm.xlu1 %2393, %v472_v41   ;;  %1014 = vperm.xlu0 %2392, %v481_v9  }
 0x166   : > { %990 = vperm.xlu1 %2393, %v473_v49   ;;  %v478_v49 = vld [vmem:[%s3263_s0 + $0x60] sm:$0xff] }
 0x16a   : > { %993 = vperm.xlu1 %2393, %v474_v16  }
 0x16d   : > { %v628_v56 = vpop.xlane.xlu0 %627 }
 0x16e   : > { %v596_v57 = vpop.xlane.xlu1 %595  ;;  %v675_v0 = vmax.f32 %v628_v56, 1e-24  ;;  %999 = vperm.xlu1 %2393, %v476_v33  }
 0x16f   : > { %v659_v1 = vmax.f32 %v596_v57, 1e-24 }
 0x170   : > { %2394 = vrsqrt.f32 %v675_v0 }
 0x171   : > { %v630_v17 = vpop.xlane.xlu0 %629  ;;  %2396 = vrsqrt.f32 %v659_v1  ;;  %v480_v1 = vld [vmem:[%s3263_s0 + $0x70] sm:$0xff] }
 0x172   : > { %v598_v24 = vpop.xlane.xlu1 %597  ;;  %v676_v25 = vmax.f32 %v630_v17, 1e-24  ;;  %1005 = vperm.xlu1 %2393, %v478_v49  }
 0x173   : > { %v660_v32 = vmax.f32 %v598_v24, 1e-24 }
 0x174   : > { %2398 = vrsqrt.f32 %v676_v25 }
 0x175   : > { %2400 = vrsqrt.f32 %v660_v32  ;;  %v632_v40 = vpop.xlane.xlu0 %631 }
 0x176   : > { %v634_v41 = vpop.xlane.xlu1 %633  ;;  %v677_v48 = vmax.f32 %v632_v40, 1e-24  ;;  %1011 = vperm.xlu1 %2393, %v480_v1  }
 0x177   : > { %v678_v56 = vmax.f32 %v634_v41, 1e-24 }
 0x178   : > { %2402 = vrsqrt.f32 %v677_v48 }
 0x179   : > { %2404 = vrsqrt.f32 %v678_v56  ;;  %v600_v57 = vpop.xlane.xlu0 %599 }
 0x17a   : > { %v602_v8 = vpop.xlane.xlu1 %601  ;;  %v661_v0 = vmax.f32 %v600_v57, 1e-24  ;;  %v2395_v9 = vpop.eup %2394 }
 0x17b   : > { %v662_v17 = vmax.f32 %v602_v8, 1e-24  ;;  %v2397_v16 = vpop.eup %2396  ;;  %v779_v33 = vmul.f32 %v2395_v9, %v3350_v2 }
 0x17c   : > { %2406 = vrsqrt.f32 %v661_v0  ;;  %v763_v8 = vmul.f32 %v2397_v16, %v3353_v3 }
 0x17d   : > { %2408 = vrsqrt.f32 %v662_v17  ;;  %v636_v24 = vpop.xlane.xlu0 %635 }
 0x17e   : > { %v638_v25 = vpop.xlane.xlu1 %637  ;;  %v2399_v32 = vpop.eup %2398  ;;  %v679_v61 = vmax.f32 %v636_v24, 1e-24 }
 0x17f   : > { %v680_v40 = vmax.f32 %v638_v25, 1e-24  ;;  %v2401_v41 = vpop.eup %2400  ;;  %v780_v48 = vmul.f32 %v2399_v32, %v3356_v4 }
 0x180   : > { %2410 = vrsqrt.f32 %v679_v61  ;;  %v764_v56 = vmul.f32 %v2401_v41, %v3363_v7 }
 0x181   : > { %2412 = vrsqrt.f32 %v680_v40  ;;  %v604_v49 = vpop.xlane.xlu0 %603  ;;  %v803_v0 = vpack.c.bf16 %v780_v48, %v779_v33 }
 0x182   : > { %v606_v57 = vpop.xlane.xlu1 %605  ;;  %v2403_v17 = vpop.eup %2402  ;;  %v663_v60 = vmax.f32 %v604_v49, 1e-24  ;;  %v795_v24 = vpack.c.bf16 %v764_v56, %v763_v8 }
 0x183   : > { %v664_v53 = vmax.f32 %v606_v57, 1e-24  ;;  %v2405_v25 = vpop.eup %2404  ;;  %2219 = vmatprep.subr.bf16.mxu0 %v803_v0  ;;  %2251 = vmatprep.subr.bf16.mxu1 %v803_v0  ;;  %v781_v2 = vmul.f32 %v2403_v17, %v3370_v10 }
 0x184   : > { %2414 = vrsqrt.f32 %v663_v60  ;;  %2220 = vmatpush3.bf16.xpose.msra.mxu0 %v795_v24  ;;  %2259 = vmatpush3.bf16.xpose.msra.mxu1 %v795_v24  ;;  %v782_v3 = vmul.f32 %v2405_v25, %v3373_v11 }
 0x185   : > { %2416 = vrsqrt.f32 %v664_v53  ;;  %v640_v4 = vpop.xlane.xlu0 %639 }
 0x186   : > { %v642_v7 = vpop.xlane.xlu1 %641  ;;  %v2407_v61 = vpop.eup %2406  ;;  %v681_v9 = vmax.f32 %v640_v4, 1e-24  ;;  %v804_v16 = vpack.c.bf16 %v782_v3, %v781_v2 }
 0x187   : > { %v682_v1 = vmax.f32 %v642_v7, 1e-24  ;;  %v2409_v32 = vpop.eup %2408  ;;  %v765_v40 = vmul.f32 %v2407_v61, %v3380_v14 }
 0x188   : > { %2418 = vrsqrt.f32 %v681_v9  ;;  %2221 = vmatprep.subr.bf16.mxu0 %v804_v16  ;;  %2252 = vmatprep.subr.bf16.mxu1 %v804_v16  ;;  %v766_v10 = vmul.f32 %v2409_v32, %v3383_v15 }
 0x189   : > { %2420 = vrsqrt.f32 %v682_v1  ;;  %v608_v60 = vpop.xlane.xlu0 %607 }
 0x18a   : > { %v610_v41 = vpop.xlane.xlu1 %609  ;;  %v2411_v33 = vpop.eup %2410  ;;  %v665_v11 = vmax.f32 %v608_v60, 1e-24  ;;  %v796_v48 = vpack.c.bf16 %v766_v10, %v765_v40 }
 0x18b   : > { %v666_v53 = vmax.f32 %v610_v41, 1e-24  ;;  %v2413_v8 = vpop.eup %2412  ;;  %v783_v56 = vmul.f32 %v2411_v33, %v3390_v18 }
 0x18c   : > { %2422 = vrsqrt.f32 %v665_v11  ;;  %2222 = vmatpush3.bf16.xpose.msra.mxu0 %v796_v48  ;;  %2260 = vmatpush3.bf16.xpose.msra.mxu1 %v796_v48  ;;  %v784_v14 = vmul.f32 %v2413_v8, %v3393_v19 }
 0x18d   : > { %2424 = vrsqrt.f32 %v666_v53  ;;  %v644_v49 = vpop.xlane.xlu0 %643 }
 0x18e   : > { %v646_v57 = vpop.xlane.xlu1 %645  ;;  %v2415_v0 = vpop.eup %2414  ;;  %v683_v15 = vmax.f32 %v644_v49, 1e-24  ;;  %v805_v24 = vpack.c.bf16 %v784_v14, %v783_v56 }
 0x18f   : > { %v684_v17 = vmax.f32 %v646_v57, 1e-24  ;;  %v2417_v25 = vpop.eup %2416  ;;  %v767_v2 = vmul.f32 %v2415_v0, %v3400_v22 }
 0x190   : > { %2426 = vrsqrt.f32 %v683_v15  ;;  %2223 = vmatprep.subr.bf16.mxu0 %v805_v24  ;;  %2253 = vmatprep.subr.bf16.mxu1 %v805_v24  ;;  %v768_v18 = vmul.f32 %v2417_v25, %v3403_v23 }
 0x191   : > { %2428 = vrsqrt.f32 %v684_v17  ;;  %v612_v3 = vpop.xlane.xlu0 %611 }
 0x192   : > { %v614_v4 = vpop.xlane.xlu1 %613  ;;  %v2419_v7 = vpop.eup %2418  ;;  %v667_v19 = vmax.f32 %v612_v3, 1e-24  ;;  %v797_v9 = vpack.c.bf16 %v768_v18, %v767_v2 }
 0x193   : > { %v668_v61 = vmax.f32 %v614_v4, 1e-24  ;;  %v2421_v1 = vpop.eup %2420  ;;  %v785_v16 = vmul.f32 %v2419_v7, %v3410_v26 }
 0x194   : > { %2430 = vrsqrt.f32 %v667_v19  ;;  %2224 = vmatpush3.bf16.xpose.msra.mxu0 %v797_v9  ;;  %2261 = vmatpush3.bf16.xpose.msra.mxu1 %v797_v9  ;;  %v786_v22 = vmul.f32 %v2421_v1, %v3413_v27 }
 0x195   : > { %2432 = vrsqrt.f32 %v668_v61  ;;  %v648_v32 = vpop.xlane.xlu0 %647 }
 0x196   : > { %v650_v40 = vpop.xlane.xlu1 %649  ;;  %v2423_v10 = vpop.eup %2422  ;;  %v685_v23 = vmax.f32 %v648_v32, 1e-24  ;;  %v806_v41 = vpack.c.bf16 %v786_v22, %v785_v16 }
 0x197   : > { %v686_v60 = vmax.f32 %v650_v40, 1e-24  ;;  %v2425_v33 = vpop.eup %2424  ;;  %v769_v11 = vmul.f32 %v2423_v10, %v3420_v30 }
 0x198   : > { %2434 = vrsqrt.f32 %v685_v23  ;;  %2225 = vmatprep.subr.bf16.mxu0 %v806_v41  ;;  %2254 = vmatprep.subr.bf16.mxu1 %v806_v41  ;;  %v770_v26 = vmul.f32 %v2425_v33, %v3423_v31 }
 0x199   : > { %2436 = vrsqrt.f32 %v686_v60  ;;  %v616_v53 = vpop.xlane.xlu0 %615 }
 0x19a   : > { %v618_v48 = vpop.xlane.xlu1 %617  ;;  %v2427_v8 = vpop.eup %2426  ;;  %v669_v27 = vmax.f32 %v616_v53, 1e-24  ;;  %v798_v14 = vpack.c.bf16 %v770_v26, %v769_v11 }
 0x19b   : > { %v670_v56 = vmax.f32 %v618_v48, 1e-24  ;;  %v2429_v49 = vpop.eup %2428  ;;  %v787_v57 = vmul.f32 %v2427_v8, %v3430_v34 }
 0x19c   : > { %2438 = vrsqrt.f32 %v669_v27  ;;  %2226 = vmatpush3.bf16.xpose.msra.mxu0 %v798_v14  ;;  %2262 = vmatpush3.bf16.xpose.msra.mxu1 %v798_v14  ;;  %v788_v30 = vmul.f32 %v2429_v49, %v3433_v35 }
 0x19d   : > { %2440 = vrsqrt.f32 %v670_v56  ;;  %v652_v0 = vpop.xlane.xlu0 %651 }
 0x19e   : > { %v654_v15 = vpop.xlane.xlu1 %653  ;;  %v2431_v17 = vpop.eup %2430  ;;  %v687_v31 = vmax.f32 %v652_v0, 1e-24  ;;  %v807_v25 = vpack.c.bf16 %v788_v30, %v787_v57 }
 0x19f   : > { %v688_v24 = vmax.f32 %v654_v15, 1e-24  ;;  %v2433_v2 = vpop.eup %2432  ;;  %v771_v18 = vmul.f32 %v2431_v17, %v3440_v38 }
 0x1a0   : > { %2442 = vrsqrt.f32 %v687_v31  ;;  %2227 = vmatprep.subr.bf16.mxu0 %v807_v25  ;;  %2255 = vmatprep.subr.bf16.mxu1 %v807_v25  ;;  %v772_v34 = vmul.f32 %v2433_v2, %v3443_v39 }
 0x1a1   : > { %2444 = vrsqrt.f32 %v688_v24  ;;  %v620_v3 = vpop.xlane.xlu0 %619 }
 0x1a2   : > { %v622_v4 = vpop.xlane.xlu1 %621  ;;  %v2435_v7 = vpop.eup %2434  ;;  %v671_v35 = vmax.f32 %v620_v3, 1e-24  ;;  %v799_v61 = vpack.c.bf16 %v772_v34, %v771_v18 }
 0x1a3   : > { %v672_v19 = vmax.f32 %v622_v4, 1e-24  ;;  %v2437_v9 = vpop.eup %2436  ;;  %v789_v1 = vmul.f32 %v2435_v7, %v3450_v42 }
 0x1a4   : > { %2446 = vrsqrt.f32 %v671_v35  ;;  %2228 = vmatpush3.bf16.xpose.msra.mxu0 %v799_v61  ;;  %2263 = vmatpush3.bf16.xpose.msra.mxu1 %v799_v61  ;;  %v790_v38 = vmul.f32 %v2437_v9, %v3453_v43 }
 0x1a5   : > { %2448 = vrsqrt.f32 %v672_v19  ;;  %v656_v16 = vpop.xlane.xlu0 %655 }
 0x1a6   : > { %v658_v22 = vpop.xlane.xlu1 %657  ;;  %v2439_v32 = vpop.eup %2438  ;;  %v689_v39 = vmax.f32 %v656_v16, 1e-24  ;;  %v808_v10 = vpack.c.bf16 %v790_v38, %v789_v1 }
 0x1a7   : > { %v690_v40 = vmax.f32 %v658_v22, 1e-24  ;;  %v2441_v23 = vpop.eup %2440  ;;  %v773_v60 = vmul.f32 %v2439_v32, %v3460_v46 }
 0x1a8   : > { %2450 = vrsqrt.f32 %v689_v39  ;;  %2229 = vmatprep.subr.bf16.mxu0 %v808_v10  ;;  %2256 = vmatprep.subr.bf16.mxu1 %v808_v10  ;;  %v774_v42 = vmul.f32 %v2441_v23, %v3463_v47 }
 0x1a9   : > { %2452 = vrsqrt.f32 %v690_v40  ;;  %v624_v41 = vpop.xlane.xlu0 %623 }
 0x1aa   : > { %v626_v33 = vpop.xlane.xlu1 %625  ;;  %v2443_v11 = vpop.eup %2442  ;;  %v673_v43 = vmax.f32 %v624_v41, 1e-24  ;;  %v800_v53 = vpack.c.bf16 %v774_v42, %v773_v60 }
 0x1ab   : > { %v674_v26 = vmax.f32 %v626_v33, 1e-24  ;;  %v2445_v48 = vpop.eup %2444  ;;  %v791_v8 = vmul.f32 %v2443_v11, %v3470_v50 }
 0x1ac   : > { %2454 = vrsqrt.f32 %v673_v43  ;;  %2230 = vmatpush3.bf16.xpose.msra.mxu0 %v800_v53  ;;  %2264 = vmatpush3.bf16.xpose.msra.mxu1 %v800_v53  ;;  %v792_v46 = vmul.f32 %v2445_v48, %v3473_v51 }
 0x1ad   : > { %2456 = vrsqrt.f32 %v674_v26  ;;  %v500_v56 = vpop.xlane.xlu0 %499 }
 0x1ae   : > { %v502_v27 = vpop.xlane.xlu1 %501  ;;  %v2447_v14 = vpop.eup %2446  ;;  %v531_v49 = vmax.f32 %v500_v56, 1e-24  ;;  %v809_v57 = vpack.c.bf16 %v792_v46, %v791_v8 }
 0x1af   : > { %v532_v47 = vmax.f32 %v502_v27, 1e-24  ;;  %v2449_v30 = vpop.eup %2448  ;;  %v775_v0 = vmul.f32 %v2447_v14, %v3480_v54 }
 0x1b0   : > { %2231 = vmatprep.subr.bf16.mxu0 %v809_v57  ;;  %2257 = vmatprep.subr.bf16.mxu1 %v809_v57  ;;  %v776_v50 = vmul.f32 %v2449_v30, %v3483_v55 }
 0x1b1   : > { %2458 = vrsqrt.f32 %v532_v47  ;;  %v516_v17 = vpop.xlane.xlu0 %515 }
 0x1b2   : > { %2460 = vrsqrt.f32 %v531_v49  ;;  %v518_v15 = vpop.xlane.xlu1 %517  ;;  %v2451_v31 = vpop.eup %2450  ;;  %v539_v24 = vmax.f32 %v516_v17, 1e-24  ;;  %v801_v25 = vpack.c.bf16 %v776_v50, %v775_v0 }
 0x1b3   : > { %v540_v51 = vmax.f32 %v518_v15, 1e-24  ;;  %v2453_v2 = vpop.eup %2452  ;;  %v793_v18 = vmul.f32 %v2451_v31, %v3490_v58 }
 0x1b4   : > { %2232 = vmatpush3.bf16.xpose.msra.mxu0 %v801_v25  ;;  %2265 = vmatpush3.bf16.xpose.msra.mxu1 %v801_v25  ;;  %v794_v54 = vmul.f32 %v2453_v2, %v3493_v59 }
 0x1b5   : > { %2462 = vrsqrt.f32 %v540_v51  ;;  %v504_v3 = vpop.xlane.xlu0 %503 }
 0x1b6   : > { %2464 = vrsqrt.f32 %v539_v24  ;;  %v506_v34 = vpop.xlane.xlu1 %505  ;;  %v2455_v4 = vpop.eup %2454  ;;  %v533_v7 = vmax.f32 %v504_v3, 1e-24  ;;  %v810_v35 = vpack.c.bf16 %v794_v54, %v793_v18 }
 0x1b7   : > { %v534_v55 = vmax.f32 %v506_v34, 1e-24  ;;  %v2457_v19 = vpop.eup %2456  ;;  %v777_v61 = vmul.f32 %v2455_v4, %v3500_v62 }
 0x1b8   : > { %2233 = vmatprep.subr.bf16.mxu0 %v810_v35  ;;  %2258 = vmatprep.subr.bf16.mxu1 %v810_v35  ;;  %v778_v58 = vmul.f32 %v2457_v19, %v3503_v63 }
 0x1b9   : > { %2466 = vrsqrt.f32 %v534_v55  ;;  %v520_v1 = vpop.xlane.xlu0 %519 }
 0x1ba   : > { %2468 = vrsqrt.f32 %v533_v7  ;;  %v522_v9 = vpop.xlane.xlu1 %521  ;;  %v541_v16 = vmax.f32 %v520_v1, 1e-24  ;;  %v802_v22 = vpack.c.bf16 %v778_v58, %v777_v61 }
 0x1bb   : > { %v2459_v38 = vpop.eup %2458  ;;  %v542_v59 = vmax.f32 %v522_v9, 1e-24 }
 0x1bc   : > { %v2461_v32 = vpop.eup %2460  ;;  %v724_v39 = vmul.f32 14.285714, %v2459_v38  ;;  %2234 = vmatpush3.bf16.xpose.msra.mxu0 %v802_v22  ;;  %2266 = vmatpush3.bf16.xpose.msra.mxu1 %v802_v22 }
 0x1bd   : > { %v723_v40 = vmul.f32 14.285714, %v2461_v32  ;;  %2470 = vrsqrt.f32 %v542_v59  ;;  %v508_v10 = vpop.xlane.xlu0 %507 }
 0x1be   : > { %2472 = vrsqrt.f32 %v541_v16  ;;  %v510_v62 = vpop.xlane.xlu1 %509  ;;  %v740_v23 = vmul.f32 %v724_v39, %v3510_v5  ;;  %v535_v42 = vmax.f32 %v508_v10, 1e-24 }
 0x1bf   : > { %v2463_v60 = vpop.eup %2462  ;;  %v536_v63 = vmax.f32 %v510_v62, 1e-24  ;;  %v739_v41 = vmul.f32 %v723_v40, %v3513_v6  ;;  %v4829_v40 = vld [vmem:[#allocation26_spill] sm:$0xff] }
 0x1c0   : > { %v2465_v33 = vpop.eup %2464  ;;  %v732_v11 = vmul.f32 14.285714, %v2463_v60 }
 0x1c1   : > { %v731_v43 = vmul.f32 14.285714, %v2465_v33  ;;  %2474 = vrsqrt.f32 %v536_v63  ;;  %v755_v26 = vpack.c.bf16 %v740_v23, %v739_v41  ;;  %v524_v48 = vpop.xlane.xlu0 %523  ;;  %v4830_v63 = vld [vmem:[#allocation27_spill] sm:$0xff] }
 0x1c2   : > { %2476 = vrsqrt.f32 %v535_v42  ;;  %v526_v53 = vpop.xlane.xlu1 %525  ;;  %v748_v8 = vmul.f32 %v732_v11, %v3520_v12  ;;  %v543_v56 = vmax.f32 %v524_v48, 1e-24  ;;  %v4831_v42 = vld [vmem:[#allocation28_spill] sm:$0xff] }
 0x1c3   : > { %v2467_v46 = vpop.eup %2466  ;;  %v544_v27 = vmax.f32 %v526_v53, 1e-24  ;;  %2235 = vmatprep.mubr.bf16.mxu0 %v755_v26  ;;  %v747_v5 = vmul.f32 %v731_v43, %v3523_v13  ;;  %v926_v43 = vlaneseq  ;;  %v482_v53 = vld [vmem:[%s3276_s7] sm:$0x3] }
 0x1c4   : > { %v2469_v14 = vpop.eup %2468  ;;  %v726_v47 = vmul.f32 14.285714, %v2467_v46  ;;  %2236 = vmatmul.mubr.bf16.vlgmr.msra.gmra.mrb[0].mxu0 %v755_v26  ;;  %vm924_vm1 = vcmp.ne.s32.totalorder %v482_v53, 2147483648 }
 0x1c5   : > { %v725_v6 = vmul.f32 14.285714, %v2469_v14  ;;  %2478 = vrsqrt.f32 %v544_v27  ;;  %v759_v49 = vpack.c.bf16 %v748_v8, %v747_v5  ;;  %v512_v30 = vpop.xlane.xlu0 %511  ;;  %v927_v48 = vshrl.u32 %v926_v43, 7 }
 0x1c6   : > { %2480 = vrsqrt.f32 %v543_v56  ;;  %v514_v57 = vpop.xlane.xlu1 %513  ;;  %v742_v0 = vmul.f32 %v726_v47, %v3530_v20  ;;  %v537_v12 = vmax.f32 %v512_v30, 1e-24  ;;  %v4832_v56 = vmov 0  }
 0x1c7   : > { %v2471_v50 = vpop.eup %2470  ;;  %v538_v15 = vmax.f32 %v514_v57, 1e-24  ;;  %2243 = vmatprep.mubr.bf16.mxu1 %v759_v49  ;;  %v741_v17 = vmul.f32 %v725_v6, %v3533_v21  ;;  %v928_v46 = vsub.s32 0, %v927_v48  ;;  %v932_v27 = vsub.s32 1, %v927_v48 }
 0x1c8   : > { %v2473_v31 = vpop.eup %2472  ;;  %v734_v51 = vmul.f32 14.285714, %v2471_v50  ;;  %2244 = vmatmul.mubr.bf16.vlgmr.msra.gmra.mrb[0].mxu1 %v759_v49  ;;  %v925_v5 = vsel %vm924_vm1, 1, %v4832_v56 }
 0x1c9   : > { %v733_v13 = vmul.f32 14.285714, %v2473_v31  ;;  %2482 = vrsqrt.f32 %v538_v15  ;;  %v756_v24 = vpack.c.bf16 %v742_v0, %v741_v17  ;;  %v528_v2 = vpop.xlane.xlu0 %527  ;;  %v3659_v14 = vrot.slane %v925_v5, %v928_v46 }
 0x1ca   : > { %2484 = vrsqrt.f32 %v537_v12  ;;  %v530_v25 = vpop.xlane.xlu1 %529  ;;  %v750_v18 = vmul.f32 %v734_v51, %v3540_v28  ;;  %v545_v20 = vmax.f32 %v528_v2, 1e-24  ;;  %v3661_v47 = vrot.slane %v482_v53, %v928_v46 }
 0x1cb   : > { %v2475_v54 = vpop.eup %2474  ;;  %v546_v34 = vmax.f32 %v530_v25, 1e-24  ;;  %2237 = vmatprep.mubr.bf16.mxu0 %v756_v24  ;;  %v749_v3 = vmul.f32 %v733_v13, %v3543_v29  ;;  %v3663_v6 = vrot.slane %v925_v5, %v932_v27  ;;  %v3665_v49 = vrot.slane %v482_v53, %v932_v27 }
 0x1cc   : > { %v2477_v4 = vpop.eup %2476  ;;  %v728_v55 = vmul.f32 14.285714, %v2475_v54  ;;  %2238 = vmatmul.mubr.bf16.gmra.mrb[4].mxu0 %v756_v24  ;;  %vm934_vm2 = vcmp.eq.s32.totalorder %v3659_v14, 1  ;;  %v4741_v51 = vmov 0.0   ;;  %v4870_v31 = vmov 0 }
 0x1cd   : > { %v727_v21 = vmul.f32 14.285714, %v2477_v4  ;;  %2486 = vrsqrt.f32 %v546_v34  ;;  %v760_v7 = vpack.c.bf16 %v750_v18, %v749_v3  ;;  %vm935_vm4 = vcmp.eq.s32.totalorder %v3663_v6, 1 }
 0x1ce   : > { %2488 = vrsqrt.f32 %v545_v20  ;;  %v744_v35 = vmul.f32 %v728_v55, %v3550_v36  ;;  %v973_v11 = vpop.permute.xlu1 %972  ;;  %v4902_v6 = vmov 0.0  }
 0x1cf   : > { %v2479_v19 = vpop.eup %2478  ;;  %v743_v61 = vmul.f32 %v727_v21, %v3553_v37  ;;  %2245 = vmatprep.mubr.bf16.mxu1 %v760_v7  ;;  %vm1026_vm14 = vcmp.eq.s32.totalorder %v973_v11, %v3661_v47  ;;  %vm1027_vm0 = vcmp.eq.s32.totalorder %v973_v11, %v3665_v49 }
 0x1d0   : > { %v2481_v28 = vpop.eup %2480  ;;  %v736_v58 = vmul.f32 14.285714, %v2479_v19  ;;  %2246 = vmatmul.mubr.bf16.gmra.mrb[4].mxu1 %v760_v7 }
 0x1d1   : > { %v735_v9 = vmul.f32 14.285714, %v2481_v28  ;;  %v757_v1 = vpack.c.bf16 %v744_v35, %v743_v61  ;;  %v970_v19 = vpop.permute.xlu0 %969 }
 0x1d2   : > { %v752_v29 = vmul.f32 %v736_v58, %v3560_v44 }
 0x1d3   : > { %v2483_v38 = vpop.eup %2482  ;;  %v751_v59 = vmul.f32 %v735_v9, %v3563_v45  ;;  %2239 = vmatprep.mubr.bf16.mxu0 %v757_v1 }
 0x1d4   : > { %v2485_v16 = vpop.eup %2484  ;;  %v730_v22 = vmul.f32 14.285714, %v2483_v38  ;;  %2240 = vmatmul.mubr.bf16.gmra.mrb[8].mxu0 %v757_v1 }
 0x1d5   : > { %v729_v32 = vmul.f32 14.285714, %v2485_v16  ;;  %v761_v36 = vpack.c.bf16 %v752_v29, %v751_v59  ;;  %v997_v29 = vpop.permute.xlu0 %996 }
 0x1d6   : > { %v746_v39 = vmul.f32 %v730_v22, %v3570_v52  ;;  %v3655_v52 = vpop.permute.xlu1 %975 }
 0x1d7   : > { %v2487_v37 = vpop.eup %2486  ;;  %v745_v62 = vmul.f32 %v729_v32, %v4829_v40  ;;  %2247 = vmatprep.mubr.bf16.mxu1 %v761_v36 }
 0x1d8   : > { %v2489_v10 = vpop.eup %2488  ;;  %v738_v23 = vmul.f32 14.285714, %v2487_v37  ;;  %2248 = vmatmul.mubr.bf16.gmra.mrb[8].mxu1 %v761_v36 }
 0x1d9   : > { %v737_v44 = vmul.f32 14.285714, %v2489_v10  ;;  %v758_v60 = vpack.c.bf16 %v746_v39, %v745_v62  ;;  %v3781_v59 = vpop.permute.xlu0 %1002 }
 0x1da   : > { %v754_v45 = vmul.f32 %v738_v23, %v4830_v63  ;;  %v979_v26 = vpop.permute.xlu1 %978  ;;  %v1096_v63 = vld [vmem:[#allocation4 + $0x40] sm:$0xff] }
 0x1db   : > { %v753_v41 = vmul.f32 %v737_v44, %v4831_v42  ;;  %2241 = vmatprep.mubr.bf16.mxu0 %v758_v60  ;;  %vm1030_vm3 = vcmp.eq.s32.totalorder %v979_v26, %v3661_v47  ;;  %vm1031_vm5 = vcmp.eq.s32.totalorder %v979_v26, %v3665_v49 }
 0x1dc   : > { %2242 = vmatmul.mubr.bf16.gmra.mrb[12].mxu0 %v758_v60  ;;  %vm3676_vm7 = vmand %vm1030_vm3, %vm934_vm2 }
 0x1dd   : > { %v762_v33 = vpack.c.bf16 %v754_v45, %v753_v41  ;;  %vm3683_vm9 = vmand %vm1031_vm5, %vm935_vm4  ;;  %v2182_v13 = vsel %vm3676_vm7, 1.0, %v4741_v51  ;;  %v3812_v45 = vpop.permute.xlu0 %1008 }
 0x1de   : > { %v982_v8 = vpop.permute.xlu1 %981  ;;  %v2183_v24 = vsel %vm3683_vm9, 1.0, %v4741_v51  ;;  %vm3726_vm3 = vmand %vm1026_vm14, %vm934_vm2 }
 0x1df   : > { %2249 = vmatprep.mubr.bf16.mxu1 %v762_v33  ;;  %vm1032_vm6 = vcmp.eq.s32.totalorder %v982_v8, %v3661_v47  ;;  %vm1033_vm8 = vcmp.eq.s32.totalorder %v982_v8, %v3665_v49  ;;  %v3730_v18 = vadd.f32 %v2183_v24, %v2182_v13  ;;  %vm3740_vm5 = vmand %vm1027_vm0, %vm935_vm4  ;;  %v2178_v3 = vsel %vm3726_vm3, 1.0, %v4741_v51 }
 0x1e0   : > { %2250 = vmatmul.mubr.bf16.gmra.mrb[12].mxu1 %v762_v33  ;;  %vm3690_vm11 = vmand %vm1032_vm6, %vm934_vm2  ;;  %v2179_v21 = vsel %vm3740_vm5, 1.0, %v4741_v51  ;;  %vm1024_vm6 = vcmp.eq.s32.totalorder %v970_v19, %v3661_v47 }
 0x1e1   : > { %vm3697_vm13 = vmand %vm1033_vm8, %vm935_vm4  ;;  %v2184_v25 = vsel %vm3690_vm11, 1.0, %v4741_v51  ;;  %v3757_v35 = vadd.f32 %v2179_v21, %v2178_v3  ;;  %vm1025_vm8 = vcmp.eq.s32.totalorder %v970_v19, %v3665_v49  ;;  %v3849_v2 = vpop.permute.xlu0 %1014  ;;  %v1217_v3 = vld [vmem:[#allocation5] sm:$0xff] }
 0x1e2   : > { %v3667_v57 = vpop.permute.xlu1 %984  ;;  %v2185_v54 = vsel %vm3697_vm13, 1.0, %v4741_v51 }
 0x1e3   : > { %v3747_v4 = vadd.f32 %v2185_v54, %v2184_v25 }
 0x1e6   : > { %v988_v0 = vpop.permute.xlu1 %987 }
 0x1e7   : > { %vm1036_vm10 = vcmp.eq.s32.totalorder %v988_v0, %v3661_v47  ;;  %vm1037_vm12 = vcmp.eq.s32.totalorder %v988_v0, %v3665_v49 }
 0x1e8   : > { %vm3704_vm15 = vmand %vm1036_vm10, %vm934_vm2 }
 0x1e9   : > { %vm3711_vm1 = vmand %vm1037_vm12, %vm935_vm4  ;;  %v2188_v34 = vsel %vm3704_vm15, 1.0, %v4741_v51 }
 0x1ea   : > { %v2189_v55 = vsel %vm3711_vm1, 1.0, %v4741_v51  ;;  %vm3763_vm10 = vmand %vm1024_vm6, %vm934_vm2  ;;  %v3779_v38 = vpop.permute.xlu1 %990 }
 0x1eb   : > { %v3755_v7 = vadd.f32 %v2189_v55, %v2188_v34  ;;  %vm3769_vm12 = vmand %vm1025_vm8, %vm935_vm4  ;;  %v2176_v58 = vsel %vm3763_vm10, 1.0, %v4741_v51  ;;  %vm1028_vm8 = vcmp.eq.s32.totalorder %v3655_v52, %v3661_v47 }
 0x1ec   : > { %v2177_v9 = vsel %vm3769_vm12, 1.0, %v4741_v51  ;;  %v4874_v51 = vmov 0 }
 0x1ed   : > { %v1297_v1 = vadd.f32 %v2177_v9, %v2176_v58  ;;  %v4857_v58 = vmov 0 }
 0x1ee   : > { %v994_v22 = vpop.permute.xlu1 %993 }
 0x1ef   : > { %1298 = vadd.xlane.f32.xlu0 %v1297_v1  ;;  %vm1040_vm14 = vcmp.eq.s32.totalorder %v994_v22, %v3661_v47  ;;  %vm1041_vm0 = vcmp.eq.s32.totalorder %v994_v22, %v3665_v49 }
 0x1f0   : > { %vm3808_vm6 = vmand %vm1040_vm14, %vm934_vm2  ;;  %vm1043_vm14 = vcmp.eq.s32.totalorder %v997_v29, %v3665_v49 }
 0x1f2   : > { %v1000_v22 = vpop.permute.xlu1 %999 }
 0x297   : > { %v845_v16 = vpop.f32.mrb[0].mxu0 }
 0x298   : > { %v3785_v32 = vsel %vm934_vm2, %v845_v16, -1e+30  ;;  %v847_v36 = vpop.f32.mrb[1].mxu0 }
 0x299   : > { %v3790_v39 = vsel %vm935_vm4, %v847_v36, -1e+30  ;;  %v849_v37 = vpop.f32.mrb[2].mxu0  ;;  %v1104_v0 = vsel %vm3763_vm10, %v3785_v32, 0.0  ;;  %vm1029_vm10 = vcmp.eq.s32.totalorder %v3655_v52, %v3665_v49  ;;  %v4859_v36 = vmov 0 }
 0x29a   : > { %v3795_v40 = vsel %vm934_vm2, %v849_v37, -1e+30  ;;  %v851_v62 = vpop.f32.mrb[3].mxu0  ;;  %v1393_v10 = vmax.f32 %v3785_v32, %v3790_v39  ;;  %v1105_v13 = vsel %vm3769_vm12, %v3790_v39, 0.0 }
 0x29b   : > { %v3801_v23 = vsel %vm935_vm4, %v851_v62, -1e+30  ;;  %v885_v44 = vpop.f32.mrb[0].mxu1  ;;  %v1106_v60 = vsel %vm3726_vm3, %v3795_v40, 0.0  ;;  %vm3823_vm3 = vmand %vm1041_vm0, %vm935_vm4  ;;  %v1136_v20 = vadd.f32 %v1105_v13, %v1104_v0  ;;  %vm1044_vm0 = vcmp.eq.s32.totalorder %v1000_v22, %v3661_v47 }
 0x29c   : > { %v3816_v42 = vsel %vm934_vm2, %v885_v44, -1e+30  ;;  %v887_v41 = vpop.f32.mrb[1].mxu1  ;;  %1394 = vmax.xlane.f32.xlu0 %v1393_v10  ;;  %v1107_v33 = vsel %vm3740_vm5, %v3801_v23, 0.0  ;;  %vm1042_vm5 = vcmp.eq.s32.totalorder %v997_v29, %v3661_v47  ;;  %v1396_v61 = vmax.f32 %v3795_v40, %v3801_v23 }
 0x29d   : > { %v3829_v43 = vsel %vm935_vm4, %v887_v41, -1e+30  ;;  %v889_v26 = vpop.f32.mrb[2].mxu1  ;;  %v1120_v53 = vsel %vm3808_vm6, %v3816_v42, 0.0  ;;  %v1139_v48 = vadd.f32 %v1107_v33, %v1106_v60  ;;  %vm3874_vm12 = vmand %vm1042_vm5, %vm934_vm2  ;;  %vm4744_vm5 = vcmask 7168   ;;  %v1299_v60 = vpop.xlane.xlu0 %1298 }
 0x29e   : > { %v891_v8 = vpop.f32.mrb[3].mxu1  ;;  %v1417_v46 = vmax.f32 %v3816_v42, %v3829_v43  ;;  %v1121_v27 = vsel %vm3823_vm3, %v3829_v43, 0.0  ;;  %v3857_v55 = vsel %vm934_vm2, %v889_v26, -1e+30  ;;  %v4858_v58 = vsel %vm3874_vm12, 4294967295, %v4857_v58 }
 0x29f   : > { %v855_v56 = vpop.f32.mrb[4].mxu0  ;;  %v1160_v5 = vadd.f32 %v1121_v27, %v1120_v53  ;;  %v3880_v9 = vsel %vm935_vm4, %v891_v8, -1e+30  ;;  %v1122_v44 = vsel %vm3874_vm12, %v3857_v55, 0.0  ;;  %vm1051_vm12 = vcmp.eq.s32.totalorder %v3812_v45, %v3665_v49 }
 0x2a0   : > { %1418 = vmax.xlane.f32.xlu1 %v1417_v46  ;;  %v857_v24 = vpop.f32.mrb[5].mxu0  ;;  %v3884_v1 = vsel %vm934_vm2, %v855_v56, -1e+30  ;;  %v1420_v33 = vmax.f32 %v3857_v55, %v3880_v9  ;;  %v1345_v46 = vadd.f32 %v1299_v60, %v1217_v3 }
 0x2a1   : > { %1161 = vadd.xlane.f32.xlu0 %v1160_v5  ;;  %v859_v25 = vpop.f32.mrb[6].mxu0  ;;  %v3899_v37 = vsel %vm935_vm4, %v857_v24, -1e+30 }
 0x2a2   : > { %v3853_v54 = vsel %vm934_vm2, %v859_v25, -1e+30  ;;  %v861_v34 = vpop.f32.mrb[7].mxu0  ;;  %1361 = vst.msk [vmem:[#allocation5] sm:$0xff] %vm4744_vm5, %v1345_v46  ;;  %v1399_v60 = vmax.f32 %v3884_v1, %v3899_v37 }
 0x2a3   : > { %v3861_v21 = vsel %vm935_vm4, %v861_v34, -1e+30  ;;  %v895_v19 = vpop.f32.mrb[4].mxu1  ;;  %v1110_v28 = vsel %vm3676_vm7, %v3853_v54, 0.0  ;;  %vm3893_vm7 = vmand %vm1043_vm14, %vm935_vm4 }
 0x2a4   : > { %v897_v30 = vpop.f32.mrb[5].mxu1  ;;  %1137 = vadd.xlane.f32.xlu1 %v1136_v20  ;;  %v1111_v16 = vsel %vm3683_vm9, %v3861_v21, 0.0  ;;  %v4860_v36 = vsel %vm3893_vm7, 4294967295, %v4859_v36  ;;  %vm3912_vm9 = vmand %vm1028_vm8, %vm934_vm2  ;;  %v1123_v26 = vsel %vm3893_vm7, %v3880_v9, 0.0  ;;  %vm1045_vm8 = vcmp.eq.s32.totalorder %v1000_v22, %v3665_v49 }
 0x2a5   : > { %v899_v62 = vpop.f32.mrb[6].mxu1  ;;  %1397 = vmax.xlane.f32.xlu0 %v1396_v61  ;;  %v3901_v10 = vadd.f32 %v1111_v16, %v1110_v28  ;;  %vm3926_vm14 = vmand %vm1029_vm10, %vm935_vm4  ;;  %v1108_v8 = vsel %vm3912_vm9, %v3884_v1, 0.0  ;;  %v3936_v27 = vsel %vm934_vm2, %v895_v19, -1e+30  ;;  %v3947_v0 = vsel %vm935_vm4, %v897_v30, -1e+30 }
 0x2a6   : > { %v901_v50 = vpop.f32.mrb[7].mxu1  ;;  %v1109_v5 = vsel %vm3926_vm14, %v3899_v37, 0.0  ;;  %vm3963_vm10 = vmand %vm1044_vm0, %vm934_vm2  ;;  %v1163_v20 = vadd.f32 %v1123_v26, %v1122_v44  ;;  %vm1047_vm0 = vcmp.eq.s32.totalorder %v3781_v59, %v3665_v49  ;;  %v1402_v17 = vmax.f32 %v3853_v54, %v3861_v21 }
 0x2a7   : > { %v865_v41 = vpop.f32.mrb[8].mxu0  ;;  %v1142_v61 = vadd.f32 %v1109_v5, %v1108_v8  ;;  %v1124_v16 = vsel %vm3963_vm10, %v3936_v27, 0.0  ;;  %vm1050_vm7 = vcmp.eq.s32.totalorder %v3812_v45, %v3661_v47 }
 0x2a8   : > { %v3940_v56 = vsel %vm934_vm2, %v865_v41, -1e+30  ;;  %1140 = vadd.xlane.f32.xlu1 %v1139_v48  ;;  %v867_v52 = vpop.f32.mrb[9].mxu0 }
 0x2a9   : > { %v3951_v13 = vsel %vm935_vm4, %v867_v52, -1e+30  ;;  %1421 = vmax.xlane.f32.xlu0 %v1420_v33  ;;  %v3953_v24 = vpop.f32.mrb[10].mxu0  ;;  %v1112_v48 = vsel %vm3690_vm11, %v3940_v56, 0.0  ;;  %vm3976_vm11 = vmand %vm1045_vm8, %vm935_vm4 }
 0x2aa   : > { %v3967_v34 = vpop.f32.mrb[11].mxu0  ;;  %v1113_v3 = vsel %vm3697_vm13, %v3951_v13, 0.0  ;;  %v1125_v12 = vsel %vm3976_vm11, %v3947_v0, 0.0  ;;  %vm1046_vm13 = vcmp.eq.s32.totalorder %v3781_v59, %v3661_v47 }
 0x2ab   : > { %v905_v19 = vpop.f32.mrb[8].mxu1  ;;  %v1148_v28 = vadd.f32 %v1113_v3, %v1112_v48  ;;  %v1166_v33 = vadd.f32 %v1125_v12, %v1124_v16  ;;  %v4022_v12 = vsel %vm934_vm2, %v899_v62, -1e+30  ;;  %v4872_v62 = vmov 0 }
 0x2ac   : > { %v907_v30 = vpop.f32.mrb[9].mxu1  ;;  %1164 = vadd.xlane.f32.xlu1 %v1163_v20  ;;  %v1423_v20 = vmax.f32 %v3936_v27, %v3947_v0 }
 0x2ad   : > { %v3986_v44 = vpop.f32.mrb[10].mxu1  ;;  %1143 = vadd.xlane.f32.xlu0 %v1142_v61 }
 0x2ae   : > { %v3988_v22 = vpop.f32.mrb[11].mxu1 }
 0x2af   : > { %v875_v41 = vpop.f32.mrb[12].mxu0  ;;  %v4131_v45 = vsel %vm935_vm4, %v3988_v22, -1e+30 }
 0x2b0   : > { %v3994_v26 = vsel %vm934_vm2, %v875_v41, -1e+30  ;;  %1400 = vmax.xlane.f32.xlu1 %v1399_v60  ;;  %v877_v8 = vpop.f32.mrb[13].mxu0  ;;  %v4026_v60 = vsel %vm935_vm4, %v901_v50, -1e+30 }
 0x2b1   : > { %v3998_v46 = vsel %vm935_vm4, %v877_v8, -1e+30  ;;  %1167 = vadd.xlane.f32.xlu0 %v1166_v33  ;;  %v4000_v52 = vpop.f32.mrb[14].mxu0  ;;  %v1116_v5 = vsel %vm3704_vm15, %v3994_v26, 0.0  ;;  %4869 = vst [vmem:[#allocation26_spill] sm:$0xff] %v4026_v60  ;;  %vm4030_vm15 = vmand %vm1046_vm13, %vm934_vm2  ;;  %v1006_v33 = vpop.permute.xlu1 %1005  ;;  %v1426_v8 = vmax.f32 %v4022_v12, %v4026_v60 }
 0x2b2   : > { %v4007_v48 = vpop.f32.mrb[15].mxu0  ;;  %v1117_v3 = vsel %vm3711_vm1, %v3998_v46, 0.0  ;;  %v4871_v31 = vsel %vm4030_vm15, 4294967295, %v4870_v31  ;;  %vm4038_vm1 = vmand %vm1047_vm0, %vm935_vm4  ;;  %vm1048_vm8 = vcmp.eq.s32.totalorder %v1006_v33, %v3661_v47  ;;  %vm1049_vm13 = vcmp.eq.s32.totalorder %v1006_v33, %v3665_v49 }
 0x2b3   : > { %v915_v61 = vpop.f32.mrb[12].mxu1  ;;  %v4018_v16 = vadd.f32 %v1117_v3, %v1116_v5  ;;  %v4873_v62 = vsel %vm4038_vm1, 4294967295, %v4872_v62  ;;  %v1126_v5 = vsel %vm4030_vm15, %v4022_v12, 0.0  ;;  %v4057_v3 = vsel %vm934_vm2, %v905_v19, -1e+30  ;;  %vm4065_vm0 = vmand %vm1048_vm8, %vm934_vm2 }
 0x2b4   : > { %v917_v41 = vpop.f32.mrb[13].mxu1  ;;  %1424 = vmax.xlane.f32.xlu1 %v1423_v20  ;;  %v1127_v20 = vsel %vm4038_vm1, %v4026_v60, 0.0  ;;  %v4875_v51 = vsel %vm4065_vm0, 4294967295, %v4874_v51  ;;  %vm4071_vm5 = vmand %vm1049_vm13, %vm935_vm4  ;;  %v1128_v19 = vsel %vm4065_vm0, %v4057_v3, 0.0  ;;  %vm1034_vm8 = vcmp.eq.s32.totalorder %v3667_v57, %v3661_v47 }
 0x2b5   : > { %v4034_v59 = vpop.f32.mrb[14].mxu1  ;;  %1403 = vmax.xlane.f32.xlu0 %v1402_v17  ;;  %v4061_v17 = vsel %vm935_vm4, %v907_v30, -1e+30  ;;  %v1169_v60 = vadd.f32 %v1127_v20, %v1126_v5  ;;  %v1405_v33 = vmax.f32 %v3940_v56, %v3951_v13  ;;  %vm1035_vm13 = vcmp.eq.s32.totalorder %v3667_v57, %v3665_v49  ;;  %vm4099_vm1 = vmand %vm1034_vm8, %vm934_vm2 }
 0x2b6   : > { %v4042_v50 = vpop.f32.mrb[15].mxu1  ;;  %v1129_v30 = vsel %vm4071_vm5, %v4061_v17, 0.0  ;;  %v4095_v5 = vsel %vm935_vm4, %v3967_v34, -1e+30  ;;  %vm4105_vm15 = vmand %vm1035_vm13, %vm935_vm4 }
 0x2b7   : > { %4879 = vst [vmem:[#allocation28_spill] sm:$0xff] %v4095_v5  ;;  %vm4135_vm8 = vmand %vm1050_vm7, %vm934_vm2  ;;  %v2187_v25 = vsel %vm4105_vm15, 1.0, %v4902_v6 }
 0x2b8   : > { %1146 = vadd.xlane.f32.xlu1 %v3901_v10  ;;  %v4876_v10 = vmov 0  ;;  %vm4141_vm13 = vmand %vm1051_vm12, %vm935_vm4 }
 0x2b9   : > { %1427 = vmax.xlane.f32.xlu0 %v1426_v8  ;;  %v4877_v10 = vsel %vm4071_vm5, 4294967295, %v4876_v10  ;;  %v1172_v8 = vadd.f32 %v1129_v30, %v1128_v19  ;;  %v1115_v19 = vsel %vm4105_vm15, %v4095_v5, 0.0  ;;  %v1012_v30 = vpop.permute.xlu1 %1011  ;;  %vm4969_vm15 = vnez %v4858_v58 }
 0x2ba   : > { %vm1052_vm5 = vcmp.eq.s32.totalorder %v1012_v30, %v3661_v47  ;;  %vm1053_vm7 = vcmp.eq.s32.totalorder %v1012_v30, %v3665_v49  ;;  %v4891_v30 = vmov 0 }
 0x2bb   : > { %vm4165_vm12 = vmand %vm1052_vm5, %vm934_vm2  ;;  %vm1038_vm5 = vcmp.eq.s32.totalorder %v3779_v38, %v3661_v47 }
 0x2bc   : > { %1170 = vadd.xlane.f32.xlu1 %v1169_v60  ;;  %v4090_v60 = vsel %vm934_vm2, %v3953_v24, -1e+30  ;;  %v1429_v24 = vmax.f32 %v4057_v3, %v4061_v17 }
 0x2bd   : > { %1149 = vadd.xlane.f32.xlu0 %v1148_v28  ;;  %4878 = vst [vmem:[#allocation27_spill] sm:$0xff] %v4090_v60  ;;  %v1408_v34 = vmax.f32 %v4090_v60, %v4095_v5  ;;  %v1114_v20 = vsel %vm4099_vm1, %v4090_v60, 0.0  ;;  %v4887_v5 = vmov 0  ;;  %v4157_v60 = vsel %vm934_vm2, %v915_v61, -1e+30 }
 0x2be   : > { %v4888_v5 = vsel %vm4141_vm13, 4294967295, %v4887_v5  ;;  %v1411_v61 = vmax.f32 %v3994_v26, %v3998_v46 }
 0x2c0   : > { %1406 = vmax.xlane.f32.xlu1 %v1405_v33  ;;  %v4126_v33 = vsel %vm934_vm2, %v3986_v44, -1e+30  ;;  %v1151_v44 = vadd.f32 %v1115_v19, %v1114_v20  ;;  %v4161_v20 = vsel %vm935_vm4, %v917_v41, -1e+30  ;;  %v4889_v19 = vmov 0 }
 0x2c1   : > { %1173 = vadd.xlane.f32.xlu0 %v1172_v8  ;;  %4884 = vst [vmem:[#allocation29_spill] sm:$0xff] %v4126_v33  ;;  %v4885_v8 = vmov 0  ;;  %v1432_v22 = vmax.f32 %v4126_v33, %v4131_v45  ;;  %v4890_v19 = vsel %vm4165_vm12, 4294967295, %v4889_v19  ;;  %v1132_v41 = vsel %vm4165_vm12, %v4157_v60, 0.0 }
 0x2c2   : > { %v4886_v8 = vsel %vm4135_vm8, 4294967295, %v4885_v8  ;;  %vm1054_vm12 = vcmp.eq.s32.totalorder %v3849_v2, %v3661_v47 }
 0x2c4   : > { %1430 = vmax.xlane.f32.xlu1 %v1429_v24  ;;  %v1130_v24 = vsel %vm4135_vm8, %v4126_v33, 0.0  ;;  %vm4204_vm8 = vmand %vm1038_vm5, %vm934_vm2  ;;  %vm1055_vm5 = vcmp.eq.s32.totalorder %v3849_v2, %v3665_v49 }
 0x2c5   : > { %1409 = vmax.xlane.f32.xlu0 %v1408_v34  ;;  %v1131_v34 = vsel %vm4141_vm13, %v4131_v45, 0.0  ;;  %vm4171_vm13 = vmand %vm1053_vm7, %vm935_vm4  ;;  %vm1039_vm7 = vcmp.eq.s32.totalorder %v3779_v38, %v3665_v49  ;;  %v4219_v38 = vsel %vm934_vm2, %v4034_v59, -1e+30  ;;  %v2190_v28 = vsel %vm4204_vm8, 1.0, %v4902_v6 }
 0x2c6   : > { %v1175_v33 = vadd.f32 %v1131_v34, %v1130_v24  ;;  %v4892_v30 = vsel %vm4171_vm13, 4294967295, %v4891_v30  ;;  %v1435_v24 = vmax.f32 %v4157_v60, %v4161_v20  ;;  %v4196_v34 = vsel %vm935_vm4, %v4007_v48, -1e+30  ;;  %vm4245_vm0 = vmand %vm1055_vm5, %vm935_vm4 }
 0x2c7   : > { %v4224_v48 = vsel %vm935_vm4, %v4042_v50, -1e+30 }
 0x2c8   : > { %1152 = vadd.xlane.f32.xlu1 %v1151_v44  ;;  %v1133_v44 = vsel %vm4171_vm13, %v4161_v20, 0.0  ;;  %vm4210_vm13 = vmand %vm1039_vm7, %vm935_vm4  ;;  %4897 = vst [vmem:[#allocation30_spill] sm:$0xff] %v4224_v48  ;;  %v1438_v59 = vmax.f32 %v4219_v38, %v4224_v48  ;;  %v1135_v14 = vsel %vm4245_vm0, %v4224_v48, 0.0  ;;  %v4401_v48 = vld [vmem:[#allocation2 + $0x70] sm:$0xff] }
 0x2c9   : > { %1433 = vmax.xlane.f32.xlu0 %v1432_v22  ;;  %v1178_v22 = vadd.f32 %v1133_v44, %v1132_v41  ;;  %v1119_v47 = vsel %vm4210_vm13, %v4196_v34, 0.0  ;;  %vm4239_vm7 = vmand %vm1054_vm12, %vm934_vm2  ;;  %4949 = vst [vmem:[#allocation56_spill] sm:$0xff] %v4401_v48  ;;  %v2191_v57 = vsel %vm4210_vm13, 1.0, %v4902_v6  ;;  %vm4972_vm13 = vnez %v4873_v62 }
 0x2ca   : > { %v1134_v44 = vsel %vm4239_vm7, %v4219_v38, 0.0  ;;  %v2207_v62 = vsel %vm4245_vm0, 1.0, %v4902_v6 }
 0x2cc   : > { %1176 = vadd.xlane.f32.xlu1 %v1175_v33  ;;  %v4191_v33 = vsel %vm934_vm2, %v4000_v52, -1e+30  ;;  %vm4906_vm2 = vcmask 7168  }
 0x2cd   : > { %1155 = vadd.xlane.f32.xlu0 %v4018_v16  ;;  %v1414_v16 = vmax.f32 %v4191_v33, %v4196_v34  ;;  %v1118_v41 = vsel %vm4204_vm8, %v4191_v33, 0.0  ;;  %vm4908_vm4 = vmmov %vm4906_vm2  ;;  %vm4971_vm8 = vnez %v4871_v31  ;;  %v2206_v31 = vsel %vm4239_vm7, 1.0, %v4902_v6 }
 0x2ce   : > { %v1157_v2 = vadd.f32 %v1119_v47, %v1118_v41  ;;  %v4264_v41 = vld [vmem:[#allocation2] sm:$0xff]  ;;  %vm4914_vm12 = vmmov %vm4906_vm2 }
 0x2cf   : > { %4903 = vst [vmem:[#allocation31_spill] sm:$0xff] %v4264_v41  ;;  %vm4915_vm5 = vmmov %vm4906_vm2 }
 0x2d0   : > { %1412 = vmax.xlane.f32.xlu1 %v1411_v61  ;;  %v2194_v61 = vsel %vm4969_vm15, 1.0, %v4902_v6  ;;  %vm4980_vm0 = vmmov %vm4906_vm2 }
 0x2d1   : > { %1179 = vadd.xlane.f32.xlu0 %v1178_v22  ;;  %v2192_v22 = vsel %vm3808_vm6, 1.0, %v4902_v6  ;;  %vm4910_vm6 = vmmov %vm4906_vm2 }
 0x2d2   : > { %vm4981_vm7 = vmmov %vm4980_vm0 }
 0x2d3   : > { %vm5002_vm15 = vmmov %vm4980_vm0 }
 0x2d4   : > { %1436 = vmax.xlane.f32.xlu1 %v1435_v24  ;;  %v2193_v24 = vsel %vm3823_vm3, 1.0, %v4902_v6  ;;  %vm4912_vm3 = vmmov %vm4906_vm2 }
 0x2d5   : > { %1415 = vmax.xlane.f32.xlu0 %v1414_v16  ;;  %v1321_v16 = vadd.f32 %v2193_v24, %v2192_v22  ;;  %v4284_v22 = vld [vmem:[#allocation2 + $0x8] sm:$0xff] }
 0x2d6   : > { %4909 = vst [vmem:[#allocation35_spill] sm:$0xff] %v4284_v22 }
 0x2d8   : > { %1301 = vadd.xlane.f32.xlu1 %v3757_v35  ;;  %v1181_v35 = vadd.f32 %v1135_v14, %v1134_v44  ;;  %v1088_v14 = vld [vmem:[#allocation4] sm:$0xff] }
 0x2d9   : > { %1439 = vmax.xlane.f32.xlu0 %v1438_v59  ;;  %v4269_v59 = vld [vmem:[#allocation2 + $0x40] sm:$0xff] }
 0x2da   : > { %4905 = vst [vmem:[#allocation33_spill] sm:$0xff] %v4269_v59 }
 0x2dc   : > { %1158 = vadd.xlane.f32.xlu1 %v1157_v2 }
 0x2dd   : > { %1307 = vadd.xlane.f32.xlu0 %v3730_v18 }
 0x2e0   : > { %1182 = vadd.xlane.f32.xlu1 %v1181_v35 }
 0x2e1   : > { %1310 = vadd.xlane.f32.xlu0 %v3747_v4 }
 0x2e5   : > { %1316 = vadd.xlane.f32.xlu0 %v3755_v7 }
 0x2e9   : > { %1322 = vadd.xlane.f32.xlu0 %v1321_v16 }
 0x329   : > { %v1395_v47 = vpop.xlane.xlu0 %1394 }
 0x32a   : > { %v4267_v18 = vmax.f32 %v4264_v41, %v1395_v47 }
 0x32c   : > { %4904 = vst [vmem:[#allocation32_spill] sm:$0xff] %v4267_v18  ;;  %1793 = vst.msk [vmem:[#allocation2] sm:$0xff] %vm4906_vm2, %v4267_v18  ;;  %1539 = vperm.xlu0 %2392, %v4267_v18  }
 0x32d   : > { %v1419_v7 = vpop.xlane.xlu1 %1418 }
 0x32e   : > { %v4277_v11 = vmax.f32 %v4269_v59, %v1419_v7  ;;  %v1162_v2 = vpop.xlane.xlu0 %1161 }
 0x32f   : > { %v1192_v44 = vadd.f32 %v1162_v2, %v1096_v63  ;;  %v1089_v63 = vld [vmem:[#allocation4 + $0x8] sm:$0xff] }
 0x330   : > { %4907 = vst [vmem:[#allocation34_spill] sm:$0xff] %v4277_v11  ;;  %1801 = vst.msk [vmem:[#allocation2 + $0x40] sm:$0xff] %vm4908_vm4, %v4277_v11  ;;  %1579 = vperm.xlu1 %2393, %v4277_v11   ;;  %v4291_v2 = vld [vmem:[#allocation2 + $0x48] sm:$0xff] }
 0x331   : > { %1209 = vst.msk [vmem:[#allocation4 + $0x40] sm:$0xff] %vm4910_vm6, %v1192_v44  ;;  %v1138_v24 = vpop.xlane.xlu1 %1137  ;;  %4913 = vst [vmem:[#allocation37_spill] sm:$0xff] %v4291_v2 }
 0x332   : > { %v1184_v16 = vadd.f32 %v1138_v24, %v1088_v14  ;;  %v1398_v47 = vpop.xlane.xlu0 %1397  ;;  %vm4917_vm4 = vmmov %vm4906_vm2 }
 0x333   : > { %v4288_v7 = vmax.f32 %v4284_v22, %v1398_v47  ;;  %v1097_v47 = vld [vmem:[#allocation4 + $0x48] sm:$0xff]  ;;  %vm4918_vm6 = vmmov %vm4906_vm2 }
 0x334   : > { %1201 = vst.msk [vmem:[#allocation4] sm:$0xff] %vm4912_vm3, %v1184_v16  ;;  %v1090_v16 = vld [vmem:[#allocation4 + $0x10] sm:$0xff]  ;;  %vm4921_vm3 = vmmov %vm4906_vm2 }
 0x335   : > { %4911 = vst [vmem:[#allocation36_spill] sm:$0xff] %v4288_v7  ;;  %1794 = vst.msk [vmem:[#allocation2 + $0x8] sm:$0xff] %vm4914_vm12, %v4288_v7  ;;  %v1141_v4 = vpop.xlane.xlu1 %1140  ;;  %1544 = vperm.xlu1 %2393, %v4288_v7   ;;  %v4306_v7 = vld [vmem:[#allocation2 + $0x10] sm:$0xff] }
 0x336   : > { %v1185_v44 = vadd.f32 %v1141_v4, %v1089_v63  ;;  %v1422_v14 = vpop.xlane.xlu0 %1421  ;;  %4916 = vst [vmem:[#allocation38_spill] sm:$0xff] %v4306_v7  ;;  %v1098_v4 = vld [vmem:[#allocation4 + $0x50] sm:$0xff]  ;;  %vm4923_vm12 = vmmov %vm4906_vm2 }
 0x337   : > { %v4299_v24 = vmax.f32 %v4291_v2, %v1422_v14  ;;  %v4313_v2 = vld [vmem:[#allocation2 + $0x50] sm:$0xff] }
 0x338   : > { %1202 = vst.msk [vmem:[#allocation4 + $0x8] sm:$0xff] %vm4915_vm5, %v1185_v44  ;;  %4920 = vst [vmem:[#allocation40_spill] sm:$0xff] %v4313_v2 }
 0x339   : > { %1802 = vst.msk [vmem:[#allocation2 + $0x48] sm:$0xff] %vm4906_vm2, %v4299_v24  ;;  %v1165_v35 = vpop.xlane.xlu1 %1164  ;;  %vm4926_vm5 = vmmov %vm4906_vm2 }
 0x33a   : > { %v1193_v22 = vadd.f32 %v1165_v35, %v1097_v47  ;;  %v1144_v59 = vpop.xlane.xlu0 %1143 }
 0x33b   : > { %v1186_v18 = vadd.f32 %v1144_v59, %v1090_v16  ;;  %v4320_v59 = vld [vmem:[#allocation2 + $0x18] sm:$0xff] }
 0x33c   : > { %1210 = vst.msk [vmem:[#allocation4 + $0x48] sm:$0xff] %vm4917_vm4, %v1193_v22  ;;  %4922 = vst [vmem:[#allocation41_spill] sm:$0xff] %v4320_v59 }
 0x33d   : > { %1203 = vst.msk [vmem:[#allocation4 + $0x10] sm:$0xff] %vm4918_vm6, %v1186_v18  ;;  %v1401_v63 = vpop.xlane.xlu1 %1400  ;;  %vm4929_vm4 = vmmov %vm4906_vm2 }
 0x33e   : > { %v4311_v44 = vmax.f32 %v4306_v7, %v1401_v63  ;;  %v1168_v14 = vpop.xlane.xlu0 %1167  ;;  %vm4930_vm6 = vmmov %vm4906_vm2 }
 0x33f   : > { %v1194_v11 = vadd.f32 %v1168_v14, %v1098_v4  ;;  %v1091_v4 = vld [vmem:[#allocation4 + $0x18] sm:$0xff] }
 0x340   : > { %4919 = vst [vmem:[#allocation39_spill] sm:$0xff] %v4311_v44  ;;  %1795 = vst.msk [vmem:[#allocation2 + $0x10] sm:$0xff] %vm4921_vm3, %v4311_v44  ;;  %1549 = vperm.xlu1 %2393, %v4311_v44   ;;  %v4334_v14 = vld [vmem:[#allocation2 + $0x58] sm:$0xff] }
 0x341   : > { %1211 = vst.msk [vmem:[#allocation4 + $0x50] sm:$0xff] %vm4923_vm12, %v1194_v11  ;;  %v1425_v18 = vpop.xlane.xlu1 %1424  ;;  %4927 = vst [vmem:[#allocation44_spill] sm:$0xff] %v4334_v14 }
 0x342   : > { %v4324_v22 = vmax.f32 %v4313_v2, %v1425_v18  ;;  %v1404_v47 = vpop.xlane.xlu0 %1403  ;;  %v1099_v2 = vld [vmem:[#allocation4 + $0x58] sm:$0xff]  ;;  %vm4932_vm3 = vmmov %vm4906_vm2 }
 0x343   : > { %v4327_v16 = vmax.f32 %v4320_v59, %v1404_v47  ;;  %vm4933_vm12 = vmmov %vm4906_vm2 }
 0x344   : > { %4924 = vst [vmem:[#allocation42_spill] sm:$0xff] %v4324_v22  ;;  %1803 = vst.msk [vmem:[#allocation2 + $0x50] sm:$0xff] %vm4926_vm5, %v4324_v22  ;;  %1589 = vperm.xlu1 %2393, %v4324_v22   ;;  %v1092_v22 = vld [vmem:[#allocation4 + $0x20] sm:$0xff] }
 0x345   : > { %4925 = vst [vmem:[#allocation43_spill] sm:$0xff] %v4327_v16  ;;  %1796 = vst.msk [vmem:[#allocation2 + $0x18] sm:$0xff] %vm4906_vm2, %v4327_v16  ;;  %v1147_v18 = vpop.xlane.xlu1 %1146  ;;  %1554 = vperm.xlu0 %2392, %v4327_v16   ;;  %v4349_v16 = vld [vmem:[#allocation2 + $0x20] sm:$0xff] }
 0x346   : > { %v1187_v47 = vadd.f32 %v1147_v18, %v1091_v4  ;;  %v1428_v35 = vpop.xlane.xlu0 %1427  ;;  %4931 = vst [vmem:[#allocation46_spill] sm:$0xff] %v4349_v16  ;;  %vm4936_vm5 = vmmov %vm4906_vm2 }
 0x347   : > { %v4342_v63 = vmax.f32 %v4334_v14, %v1428_v35  ;;  %v1100_v35 = vld [vmem:[#allocation4 + $0x60] sm:$0xff] }
 0x348   : > { %1204 = vst.msk [vmem:[#allocation4 + $0x18] sm:$0xff] %vm4929_vm4, %v1187_v47  ;;  %v4356_v14 = vld [vmem:[#allocation2 + $0x60] sm:$0xff]  ;;  %vm4940_vm4 = vmmov %vm4906_vm2 }
 0x349   : > { %4928 = vst [vmem:[#allocation45_spill] sm:$0xff] %v4342_v63  ;;  %1804 = vst.msk [vmem:[#allocation2 + $0x58] sm:$0xff] %vm4930_vm6, %v4342_v63  ;;  %v1171_v11 = vpop.xlane.xlu1 %1170 }
 0x34a   : > { %v1195_v59 = vadd.f32 %v1171_v11, %v1099_v2  ;;  %v1150_v7 = vpop.xlane.xlu0 %1149  ;;  %4935 = vst [vmem:[#allocation48_spill] sm:$0xff] %v4356_v14  ;;  %vm4942_vm6 = vmmov %vm4906_vm2 }
 0x34b   : > { %v1188_v41 = vadd.f32 %v1150_v7, %v1092_v22  ;;  %v4363_v7 = vld [vmem:[#allocation2 + $0x28] sm:$0xff] }
 0x34c   : > { %1212 = vst.msk [vmem:[#allocation4 + $0x58] sm:$0xff] %vm4932_vm3, %v1195_v59  ;;  %4937 = vst [vmem:[#allocation49_spill] sm:$0xff] %v4363_v7 }
 0x34d   : > { %1205 = vst.msk [vmem:[#allocation4 + $0x20] sm:$0xff] %vm4933_vm12, %v1188_v41  ;;  %v1407_v4 = vpop.xlane.xlu1 %1406  ;;  %vm4944_vm3 = vmmov %vm4906_vm2 }
 0x34e   : > { %v4354_v18 = vmax.f32 %v4349_v16, %v1407_v4  ;;  %v1174_v47 = vpop.xlane.xlu0 %1173  ;;  %vm4945_vm12 = vmmov %vm4906_vm2 }
 0x34f   : > { %v1196_v44 = vadd.f32 %v1174_v47, %v1100_v35  ;;  %v1093_v35 = vld [vmem:[#allocation4 + $0x28] sm:$0xff] }
 0x350   : > { %4934 = vst [vmem:[#allocation47_spill] sm:$0xff] %v4354_v18  ;;  %1797 = vst.msk [vmem:[#allocation2 + $0x20] sm:$0xff] %vm4936_vm5, %v4354_v18  ;;  %1559 = vperm.xlu1 %2393, %v4354_v18   ;;  %v4377_v47 = vld [vmem:[#allocation2 + $0x68] sm:$0xff] }
 0x351   : > { %1213 = vst.msk [vmem:[#allocation4 + $0x60] sm:$0xff] %vm4906_vm2, %v1196_v44  ;;  %v1431_v41 = vpop.xlane.xlu1 %1430  ;;  %4941 = vst [vmem:[#allocation52_spill] sm:$0xff] %v4377_v47 }
 0x352   : > { %v4367_v59 = vmax.f32 %v4356_v14, %v1431_v41  ;;  %v1410_v22 = vpop.xlane.xlu0 %1409  ;;  %v1101_v14 = vld [vmem:[#allocation4 + $0x68] sm:$0xff]  ;;  %vm4947_vm5 = vmmov %vm4906_vm2 }
 0x353   : > { %v4370_v11 = vmax.f32 %v4363_v7, %v1410_v22 }
 0x354   : > { %4938 = vst [vmem:[#allocation50_spill] sm:$0xff] %v4367_v59  ;;  %1805 = vst.msk [vmem:[#allocation2 + $0x60] sm:$0xff] %vm4940_vm4, %v4367_v59  ;;  %1599 = vperm.xlu1 %2393, %v4367_v59   ;;  %v1094_v59 = vld [vmem:[#allocation4 + $0x30] sm:$0xff] }
 0x355   : > { %4939 = vst [vmem:[#allocation51_spill] sm:$0xff] %v4370_v11  ;;  %1798 = vst.msk [vmem:[#allocation2 + $0x28] sm:$0xff] %vm4942_vm6, %v4370_v11  ;;  %v1153_v41 = vpop.xlane.xlu1 %1152  ;;  %1564 = vperm.xlu0 %2392, %v4370_v11  }
 0x356   : > { %v1189_v22 = vadd.f32 %v1153_v41, %v1093_v35  ;;  %v1434_v2 = vpop.xlane.xlu0 %1433  ;;  %v4393_v41 = vld [vmem:[#allocation2 + $0x30] sm:$0xff]  ;;  %vm4950_vm4 = vmmov %vm4906_vm2 }
 0x357   : > { %v4385_v4 = vmax.f32 %v4377_v47, %v1434_v2  ;;  %4946 = vst [vmem:[#allocation54_spill] sm:$0xff] %v4393_v41  ;;  %v1102_v2 = vld [vmem:[#allocation4 + $0x70] sm:$0xff]  ;;  %vm4952_vm6 = vmmov %vm4906_vm2 }
 0x358   : > { %1206 = vst.msk [vmem:[#allocation4 + $0x28] sm:$0xff] %vm4944_vm3, %v1189_v22  ;;  %vm4955_vm3 = vmmov %vm4906_vm2 }
 0x359   : > { %4943 = vst [vmem:[#allocation53_spill] sm:$0xff] %v4385_v4  ;;  %1806 = vst.msk [vmem:[#allocation2 + $0x68] sm:$0xff] %vm4945_vm12, %v4385_v4  ;;  %v1177_v44 = vpop.xlane.xlu1 %1176  ;;  %1584 = vperm.xlu0 %2392, %v4299_v24  }
 0x35a   : > { %v1197_v7 = vadd.f32 %v1177_v44, %v1101_v14  ;;  %v1156_v11 = vpop.xlane.xlu0 %1155  ;;  %vm4957_vm12 = vmmov %vm4906_vm2 }
 0x35b   : > { %v1190_v35 = vadd.f32 %v1156_v11, %v1094_v59 }
 0x35c   : > { %1214 = vst.msk [vmem:[#allocation4 + $0x68] sm:$0xff] %vm4947_vm5, %v1197_v7  ;;  %v4408_v7 = vld [vmem:[#allocation2 + $0x38] sm:$0xff]  ;;  %vm4959_vm5 = vmmov %vm4906_vm2 }
 0x35d   : > { %1207 = vst.msk [vmem:[#allocation4 + $0x30] sm:$0xff] %vm4906_vm2, %v1190_v35  ;;  %v1413_v22 = vpop.xlane.xlu1 %1412  ;;  %1594 = vperm.xlu0 %2392, %v4342_v63   ;;  %4951 = vst [vmem:[#allocation57_spill] sm:$0xff] %v4408_v7  ;;  %v1218_v35 = vld [vmem:[#allocation5 + $0x8] sm:$0xff] }
 0x35e   : > { %v4399_v18 = vmax.f32 %v4393_v41, %v1413_v22  ;;  %v1180_v47 = vpop.xlane.xlu0 %1179 }
 0x35f   : > { %v1198_v16 = vadd.f32 %v1180_v47, %v1102_v2 }
 0x360   : > { %4948 = vst [vmem:[#allocation55_spill] sm:$0xff] %v4399_v18  ;;  %1799 = vst.msk [vmem:[#allocation2 + $0x30] sm:$0xff] %vm4950_vm4, %v4399_v18  ;;  %1569 = vperm.xlu1 %2393, %v4399_v18  }
 0x361   : > { %1215 = vst.msk [vmem:[#allocation4 + $0x70] sm:$0xff] %vm4952_vm6, %v1198_v16  ;;  %v1437_v59 = vpop.xlane.xlu1 %1436  ;;  %1604 = vperm.xlu0 %2392, %v4385_v4   ;;  %v4423_v16 = vld [vmem:[#allocation2 + $0x78] sm:$0xff]  ;;  %vm4960_vm4 = vmmov %vm4906_vm2 }
 0x362   : > { %v4413_v11 = vmax.f32 %v4401_v48, %v1437_v59  ;;  %v1416_v47 = vpop.xlane.xlu0 %1415  ;;  %4956 = vst [vmem:[#allocation60_spill] sm:$0xff] %v4423_v16  ;;  %v1095_v4 = vld [vmem:[#allocation4 + $0x38] sm:$0xff]  ;;  %vm4961_vm6 = vmmov %vm4906_vm2  ;;  %v1223_v48 = vld [vmem:[#allocation5 + $0x30] sm:$0xff] }
 0x363   : > { %v4416_v44 = vmax.f32 %v4408_v7, %v1416_v47 }
 0x364   : > { %4953 = vst [vmem:[#allocation58_spill] sm:$0xff] %v4413_v11  ;;  %1807 = vst.msk [vmem:[#allocation2 + $0x70] sm:$0xff] %vm4955_vm3, %v4413_v11  ;;  %1609 = vperm.xlu1 %2393, %v4413_v11   ;;  %v1220_v11 = vld [vmem:[#allocation5 + $0x18] sm:$0xff] }
 0x365   : > { %4954 = vst [vmem:[#allocation59_spill] sm:$0xff] %v4416_v44  ;;  %1800 = vst.msk [vmem:[#allocation2 + $0x38] sm:$0xff] %vm4957_vm12, %v4416_v44  ;;  %v1302_v59 = vpop.xlane.xlu1 %1301  ;;  %1574 = vperm.xlu0 %2392, %v4416_v44  }
 0x366   : > { %v1346_v47 = vadd.f32 %v1302_v59, %v1218_v35  ;;  %v1440_v14 = vpop.xlane.xlu0 %1439  ;;  %v1103_v59 = vld [vmem:[#allocation4 + $0x78] sm:$0xff]  ;;  %vm4962_vm3 = vmmov %vm4906_vm2 }
 0x367   : > { %v4431_v2 = vmax.f32 %v4423_v16, %v1440_v14  ;;  %v1221_v14 = vld [vmem:[#allocation5 + $0x20] sm:$0xff]  ;;  %vm4963_vm12 = vmmov %vm4906_vm2 }
 0x368   : > { %1362 = vst.msk [vmem:[#allocation5 + $0x8] sm:$0xff] %vm4959_vm5, %v1346_v47  ;;  %vm4964_vm5 = vmmov %vm4906_vm2 }
 0x369   : > { %4958 = vst [vmem:[#allocation61_spill] sm:$0xff] %v4431_v2  ;;  %1808 = vst.msk [vmem:[#allocation2 + $0x78] sm:$0xff] %vm4906_vm2, %v4431_v2  ;;  %v1159_v22 = vpop.xlane.xlu1 %1158  ;;  %1614 = vperm.xlu0 %2392, %v4431_v2  }
 0x36a   : > { %v1191_v7 = vadd.f32 %v1159_v22, %v1095_v4  ;;  %v1308_v44 = vpop.xlane.xlu0 %1307  ;;  %v1225_v4 = vld [vmem:[#allocation5 + $0x40] sm:$0xff] }
 0x36b   : > { %v1348_v35 = vadd.f32 %v1308_v44, %v1220_v11 }
 0x36c   : > { %1208 = vst.msk [vmem:[#allocation4 + $0x38] sm:$0xff] %vm4960_vm4, %v1191_v7  ;;  %v2196_v7 = vsel %vm3963_vm10, 1.0, %v4902_v6  ;;  %vm4965_vm10 = vnez %v4875_v51  ;;  %vm4973_vm4 = vnez %v4886_v8 }
 0x36d   : > { %1364 = vst.msk [vmem:[#allocation5 + $0x18] sm:$0xff] %vm4961_vm6, %v1348_v35  ;;  %v1183_v47 = vpop.xlane.xlu1 %1182  ;;  %v2200_v15 = vsel %vm4965_vm10, 1.0, %v4902_v6  ;;  %v1318_v35 = vadd.f32 %v2191_v57, %v2190_v28  ;;  %v2202_v58 = vsel %vm4973_vm4, 1.0, %v4902_v6  ;;  %vm4974_vm6 = vnez %v4888_v5  ;;  %vm4986_vm10 = vmmov %vm4980_vm0 }
 0x36e   : > { %v1199_v63 = vadd.f32 %v1183_v47, %v1103_v59  ;;  %v1311_v18 = vpop.xlane.xlu0 %1310  ;;  %vm5017_vm4 = vmmov %vm4980_vm0 }
 0x36f   : > { %v1349_v41 = vadd.f32 %v1311_v18, %v1221_v14  ;;  %v2180_v18 = vsel %vm3912_vm9, 1.0, %v4902_v6  ;;  %vm4966_vm9 = vnez %v4877_v10  ;;  %v2199_v14 = vsel %vm4972_vm13, 1.0, %v4902_v6  ;;  %vm5014_vm13 = vmmov %vm4980_vm0 }
 0x370   : > { %1216 = vst.msk [vmem:[#allocation4 + $0x78] sm:$0xff] %vm4962_vm3, %v1199_v63  ;;  %v2197_v63 = vsel %vm3976_vm11, 1.0, %v4902_v6  ;;  %v2201_v29 = vsel %vm4966_vm9, 1.0, %v4902_v6  ;;  %vm4968_vm11 = vnez %v4892_v30  ;;  %v2198_v30 = vsel %vm4971_vm8, 1.0, %v4902_v6  ;;  %vm4982_vm3 = vmmov %vm4980_vm0 }
 0x371   : > { %1365 = vst.msk [vmem:[#allocation5 + $0x20] sm:$0xff] %vm4963_vm12, %v1349_v41  ;;  %v1333_v22 = vadd.f32 %v2201_v29, %v2200_v15  ;;  %v2205_v10 = vsel %vm4968_vm11, 1.0, %v4902_v6  ;;  %v1330_v47 = vadd.f32 %v2199_v14, %v2198_v30  ;;  %vm4983_vm12 = vmmov %vm4980_vm0 }
 0x372   : > { %v1317_v16 = vpop.xlane.xlu0 %1316  ;;  %vm4987_vm9 = vmmov %vm4980_vm0 }
 0x373   : > { %v1351_v2 = vadd.f32 %v1317_v16, %v1223_v48  ;;  %v2181_v48 = vsel %vm3926_vm14, 1.0, %v4902_v6  ;;  %v2186_v16 = vsel %vm4099_vm1, 1.0, %v4902_v6  ;;  %vm4967_vm14 = vnez %v4890_v19  ;;  %vm4989_vm11 = vmmov %vm4980_vm0 }
 0x374   : > { %v1303_v41 = vadd.f32 %v2181_v48, %v2180_v18  ;;  %v1312_v53 = vadd.f32 %v2187_v25, %v2186_v16  ;;  %v2204_v51 = vsel %vm4967_vm14, 1.0, %v4902_v6  ;;  %vm4970_vm1 = vnez %v4860_v36  ;;  %vm4988_vm14 = vmmov %vm4980_vm0 }
 0x375   : > { %1367 = vst.msk [vmem:[#allocation5 + $0x30] sm:$0xff] %vm4964_vm5, %v1351_v2  ;;  %v1327_v2 = vadd.f32 %v2197_v63, %v2196_v7  ;;  %v1339_v59 = vadd.f32 %v2205_v10, %v2204_v51  ;;  %v2195_v52 = vsel %vm4970_vm1, 1.0, %v4902_v6  ;;  %v2203_v36 = vsel %vm4974_vm6, 1.0, %v4902_v6  ;;  %vm4984_vm5 = vmmov %vm4980_vm0 }
 0x376   : > { %v1323_v11 = vpop.xlane.xlu0 %1322  ;;  %v1324_v19 = vadd.f32 %v2195_v52, %v2194_v61  ;;  %vm5006_vm1 = vmmov %vm4980_vm0 }
 0x377   : > { %v1353_v44 = vadd.f32 %v1323_v11, %v1225_v4  ;;  %v1336_v4 = vadd.f32 %v2203_v36, %v2202_v58  ;;  %v1342_v11 = vadd.f32 %v2207_v62, %v2206_v31  ;;  %vm5007_vm8 = vmmov %vm4980_vm0 }
 0x378   : > { %vm5033_vm6 = vmmov %vm4980_vm0 }
 0x379   : > { %1369 = vst.msk [vmem:[#allocation5 + $0x40] sm:$0xff] %vm4906_vm2, %v1353_v44  ;;  %vm4985_vm2 = vmmov %vm4980_vm0 }
 0x388   : > { %1304 = vadd.xlane.f32.xlu1 %v1303_v41  ;;  %1328 = vadd.xlane.f32.xlu0 %v1327_v2 }
 0x38c   : > { %1313 = vadd.xlane.f32.xlu1 %v1312_v53  ;;  %1334 = vadd.xlane.f32.xlu0 %v1333_v22 }
 0x390   : > { %1319 = vadd.xlane.f32.xlu1 %v1318_v35  ;;  %1340 = vadd.xlane.f32.xlu0 %v1339_v59 }
 0x394   : > { %1325 = vadd.xlane.f32.xlu1 %v1324_v19 }
 0x398   : > { %1331 = vadd.xlane.f32.xlu1 %v1330_v47 }
 0x39c   : > { %1337 = vadd.xlane.f32.xlu1 %v1336_v4 }
 0x3a0   : > { %1343 = vadd.xlane.f32.xlu1 %v1342_v11 }
 0x3ab   : > { %v1540_v44 = vpop.permute.xlu0 %1539 }
 0x3ac   : > { %v1617_v8 = vsub.f32 %v3785_v32, %v1540_v44  ;;  %v1618_v7 = vsub.f32 %v3790_v39, %v1540_v44 }
 0x3ae   : > { %v1649_v5 = vmul.f32 1.442695, %v1617_v8  ;;  %v1651_v63 = vmul.f32 1.442695, %v1618_v7 }
 0x3af   : > { %v1580_v18 = vpop.permute.xlu1 %1579 }
 0x3b0   : > { %2490 = vpow2.f32 %v1649_v5  ;;  %v1633_v48 = vsub.f32 %v3816_v42, %v1580_v18  ;;  %v1634_v50 = vsub.f32 %v3829_v43, %v1580_v18 }
 0x3b1   : > { %2492 = vpow2.f32 %v1651_v63 }
 0x3b2   : > { %v1681_v41 = vmul.f32 1.442695, %v1633_v48  ;;  %v1683_v49 = vmul.f32 1.442695, %v1634_v50 }
 0x3b4   : > { %2494 = vpow2.f32 %v1681_v41  ;;  %v1545_v6 = vpop.permute.xlu1 %1544 }
 0x3b5   : > { %2496 = vpow2.f32 %v1683_v49  ;;  %v1619_v2 = vsub.f32 %v3795_v40, %v1545_v6  ;;  %v1620_v32 = vsub.f32 %v3801_v23, %v1545_v6 }
 0x3b7   : > { %v1653_v16 = vmul.f32 1.442695, %v1619_v2  ;;  %v1655_v39 = vmul.f32 1.442695, %v1620_v32 }
 0x3b9   : > { %2498 = vpow2.f32 %v1653_v16  ;;  %v4975_v16 = vld [vmem:[#allocation26_spill] sm:$0xff] }
 0x3ba   : > { %v2491_v25 = vpop.eup %2490  ;;  %2500 = vpow2.f32 %v1655_v39 }
 0x3bb   : > { %v2493_v15 = vpop.eup %2492 }
 0x3bc   : > { %v1713_v29 = vadd.f32 %v2493_v15, %v2491_v25  ;;  %v4976_v25 = vld [vmem:[#allocation27_spill] sm:$0xff] }
 0x3be   : > { %v2495_v42 = vpop.eup %2494  ;;  %1714 = vadd.xlane.f32.xlu0 %v1713_v29  ;;  %v4977_v29 = vld [vmem:[#allocation28_spill] sm:$0xff] }
 0x3bf   : > { %v2497_v43 = vpop.eup %2496  ;;  %v1550_v53 = vpop.permute.xlu1 %1549 }
 0x3c0   : > { %v1621_v22 = vsub.f32 %v3884_v1, %v1550_v53  ;;  %v1622_v28 = vsub.f32 %v3899_v37, %v1550_v53  ;;  %v1737_v57 = vadd.f32 %v2497_v43, %v2495_v42 }
 0x3c2   : > { %v1657_v51 = vmul.f32 1.442695, %v1621_v22  ;;  %v1659_v40 = vmul.f32 1.442695, %v1622_v28  ;;  %1738 = vadd.xlane.f32.xlu0 %v1737_v57 }
 0x3c3   : > { %v2499_v23 = vpop.eup %2498  ;;  %v1590_v10 = vpop.permute.xlu1 %1589 }
 0x3c4   : > { %v2501_v35 = vpop.eup %2500  ;;  %2502 = vpow2.f32 %v1657_v51  ;;  %v1637_v59 = vsub.f32 %v3936_v27, %v1590_v10  ;;  %v1638_v61 = vsub.f32 %v3947_v0, %v1590_v10  ;;  %v1555_v47 = vpop.permute.xlu0 %1554 }
 0x3c5   : > { %2504 = vpow2.f32 %v1659_v40  ;;  %v1716_v52 = vadd.f32 %v2501_v35, %v2499_v23 }
 0x3c6   : > { %v1689_v19 = vmul.f32 1.442695, %v1637_v59  ;;  %v1691_v30 = vmul.f32 1.442695, %v1638_v61  ;;  %v4978_v59 = vld [vmem:[#allocation29_spill] sm:$0xff] }
 0x3c7   : > { %1717 = vadd.xlane.f32.xlu1 %v1716_v52 }
 0x3c8   : > { %2506 = vpow2.f32 %v1689_v19 }
 0x3c9   : > { %2508 = vpow2.f32 %v1691_v30 }
 0x3ce   : > { %v2503_v1 = vpop.eup %2502 }
 0x3cf   : > { %v2505_v37 = vpop.eup %2504  ;;  %v1560_v14 = vpop.permute.xlu1 %1559 }
 0x3d0   : > { %v1625_v58 = vsub.f32 %v3940_v56, %v1560_v14  ;;  %v1626_v36 = vsub.f32 %v3951_v13, %v1560_v14  ;;  %v1719_v4 = vadd.f32 %v2505_v37, %v2503_v1  ;;  %v1623_v56 = vsub.f32 %v3853_v54, %v1555_v47 }
 0x3d1   : > { %v1624_v13 = vsub.f32 %v3861_v21, %v1555_v47 }
 0x3d2   : > { %v2507_v31 = vpop.eup %2506  ;;  %v1665_v27 = vmul.f32 1.442695, %v1625_v58  ;;  %v1667_v62 = vmul.f32 1.442695, %v1626_v36  ;;  %1720 = vadd.xlane.f32.xlu0 %v1719_v4 }
 0x3d3   : > { %v2509_v0 = vpop.eup %2508  ;;  %v1600_v11 = vpop.permute.xlu1 %1599  ;;  %v1663_v6 = vmul.f32 1.442695, %v1624_v13 }
 0x3d4   : > { %2510 = vpow2.f32 %v1665_v27  ;;  %v1641_v44 = vsub.f32 %v4057_v3, %v1600_v11  ;;  %v1642_v8 = vsub.f32 %v4061_v17, %v1600_v11  ;;  %v1565_v7 = vpop.permute.xlu0 %1564  ;;  %v1743_v5 = vadd.f32 %v2509_v0, %v2507_v31 }
 0x3d5   : > { %2512 = vpow2.f32 %v1667_v62  ;;  %v1661_v3 = vmul.f32 1.442695, %v1623_v56  ;;  %v1627_v21 = vsub.f32 %v4976_v25, %v1565_v7 }
 0x3d6   : > { %v1697_v63 = vmul.f32 1.442695, %v1641_v44  ;;  %v1699_v18 = vmul.f32 1.442695, %v1642_v8  ;;  %1744 = vadd.xlane.f32.xlu0 %v1743_v5 }
 0x3d7   : > { %v1669_v51 = vmul.f32 1.442695, %v1627_v21 }
 0x3d8   : > { %2514 = vpow2.f32 %v1697_v63  ;;  %v1585_v48 = vpop.permute.xlu0 %1584 }
 0x3d9   : > { %2516 = vpow2.f32 %v1699_v18  ;;  %v1635_v50 = vsub.f32 %v3857_v55, %v1585_v48  ;;  %v1636_v41 = vsub.f32 %v3880_v9, %v1585_v48  ;;  %v1628_v55 = vsub.f32 %v4977_v29, %v1565_v7  ;;  %v4979_v7 = vld [vmem:[#allocation30_spill] sm:$0xff] }
 0x3db   : > { %v1685_v49 = vmul.f32 1.442695, %v1635_v50  ;;  %v1687_v17 = vmul.f32 1.442695, %v1636_v41  ;;  %v1671_v35 = vmul.f32 1.442695, %v1628_v55 }
 0x3dc   : > { %v1595_v2 = vpop.permute.xlu0 %1594  ;;  %v1219_v55 = vld [vmem:[#allocation5 + $0x10] sm:$0xff] }
 0x3dd   : > { %2518 = vpow2.f32 %v1685_v49  ;;  %v1639_v32 = vsub.f32 %v4022_v12, %v1595_v2  ;;  %v1640_v39 = vsub.f32 %v4975_v16, %v1595_v2 }
 0x3de   : > { %v2511_v54 = vpop.eup %2510  ;;  %2520 = vpow2.f32 %v1687_v17 }
 0x3df   : > { %v2513_v15 = vpop.eup %2512  ;;  %2522 = vpow2.f32 %v1661_v3  ;;  %v1693_v42 = vmul.f32 1.442695, %v1639_v32  ;;  %v1695_v9 = vmul.f32 1.442695, %v1640_v39  ;;  %v1570_v43 = vpop.permute.xlu1 %1569 }
 0x3e0   : > { %2524 = vpow2.f32 %v1663_v6  ;;  %v1629_v53 = vsub.f32 %v3994_v26, %v1570_v43  ;;  %v1630_v22 = vsub.f32 %v3998_v46, %v1570_v43  ;;  %v1605_v28 = vpop.permute.xlu0 %1604  ;;  %v1725_v12 = vadd.f32 %v2513_v15, %v2511_v54 }
 0x3e1   : > { %2526 = vpow2.f32 %v1693_v42  ;;  %v1643_v61 = vsub.f32 %v4978_v59, %v1605_v28  ;;  %v1644_v52 = vsub.f32 %v4131_v45, %v1605_v28  ;;  %v1227_v42 = vld [vmem:[#allocation5 + $0x50] sm:$0xff]  ;;  %v1222_v28 = vld [vmem:[#allocation5 + $0x28] sm:$0xff] }
 0x3e2   : > { %v2515_v57 = vpop.eup %2514  ;;  %v1673_v40 = vmul.f32 1.442695, %v1629_v53  ;;  %v1675_v23 = vmul.f32 1.442695, %v1630_v22  ;;  %1726 = vadd.xlane.f32.xlu0 %v1725_v12  ;;  %2528 = vpow2.f32 %v1695_v9  ;;  %v1229_v12 = vld [vmem:[#allocation5 + $0x60] sm:$0xff] }
 0x3e3   : > { %v2517_v10 = vpop.eup %2516  ;;  %v1610_v19 = vpop.permute.xlu1 %1609  ;;  %v1701_v58 = vmul.f32 1.442695, %v1643_v61  ;;  %v1703_v45 = vmul.f32 1.442695, %v1644_v52 }
 0x3e4   : > { %2530 = vpow2.f32 %v1673_v40  ;;  %v1645_v26 = vsub.f32 %v4157_v60, %v1610_v19  ;;  %v1646_v46 = vsub.f32 %v4161_v20, %v1610_v19  ;;  %v1575_v30 = vpop.permute.xlu0 %1574  ;;  %v1749_v1 = vadd.f32 %v2517_v10, %v2515_v57  ;;  %v1224_v10 = vld [vmem:[#allocation5 + $0x38] sm:$0xff] }
 0x3e5   : > { %2532 = vpow2.f32 %v1675_v23  ;;  %v1631_v36 = vsub.f32 %v4191_v33, %v1575_v30  ;;  %v1632_v31 = vsub.f32 %v4196_v34, %v1575_v30 }
 0x3e6   : > { %2534 = vpow2.f32 %v1669_v51  ;;  %v1705_v37 = vmul.f32 1.442695, %v1645_v26  ;;  %v1707_v14 = vmul.f32 1.442695, %v1646_v46  ;;  %1750 = vadd.xlane.f32.xlu0 %v1749_v1  ;;  %v1226_v26 = vld [vmem:[#allocation5 + $0x48] sm:$0xff]  ;;  %v1228_v1 = vld [vmem:[#allocation5 + $0x58] sm:$0xff] }
 0x3e7   : > { %v2519_v47 = vpop.eup %2518  ;;  %2536 = vpow2.f32 %v1671_v35  ;;  %v1677_v0 = vmul.f32 1.442695, %v1631_v36  ;;  %v1679_v8 = vmul.f32 1.442695, %v1632_v31  ;;  %v1231_v35 = vld [vmem:[#allocation5 + $0x70] sm:$0xff] }
 0x3e8   : > { %v2521_v4 = vpop.eup %2520  ;;  %2538 = vpow2.f32 %v1705_v37  ;;  %v1615_v60 = vpop.permute.xlu0 %1614 }
 0x3e9   : > { %v2523_v27 = vpop.eup %2522  ;;  %2540 = vpow2.f32 %v1707_v14  ;;  %v1740_v20 = vadd.f32 %v2521_v4, %v2519_v47  ;;  %v1647_v11 = vsub.f32 %v4219_v38, %v1615_v60  ;;  %v1648_v33 = vsub.f32 %v4979_v7, %v1615_v60  ;;  %v1230_v47 = vld [vmem:[#allocation5 + $0x68] sm:$0xff]  ;;  %v1232_v4 = vld [vmem:[#allocation5 + $0x78] sm:$0xff] }
 0x3ea   : > { %v2525_v62 = vpop.eup %2524  ;;  %2542 = vpow2.f32 %v1701_v58  ;;  %v4990_v60 = vld [vmem:[#allocation31_spill] sm:$0xff] }
 0x3eb   : > { %1741 = vadd.xlane.f32.xlu1 %v1740_v20  ;;  %v2527_v44 = vpop.eup %2526  ;;  %2544 = vpow2.f32 %v1703_v45  ;;  %v1722_v63 = vadd.f32 %v2525_v62, %v2523_v27  ;;  %v1709_v34 = vmul.f32 1.442695, %v1647_v11  ;;  %v1711_v48 = vmul.f32 1.442695, %v1648_v33  ;;  %v4991_v27 = vld [vmem:[#allocation32_spill] sm:$0xff]  ;;  %v4994_v11 = vld [vmem:[#allocation34_spill] sm:$0xff] }
 0x3ec   : > { %v2529_v5 = vpop.eup %2528  ;;  %2546 = vpow2.f32 %v1677_v0  ;;  %v4992_v20 = vsub.f32 %v4990_v60, %v4991_v27  ;;  %v4993_v0 = vld [vmem:[#allocation33_spill] sm:$0xff]  ;;  %v4996_v7 = vld [vmem:[#allocation35_spill] sm:$0xff]  ;;  %v4997_v33 = vld [vmem:[#allocation36_spill] sm:$0xff] }
 0x3ed   : > { %2548 = vpow2.f32 %v1679_v8  ;;  %v1746_v3 = vadd.f32 %v2529_v5, %v2527_v44  ;;  %v4995_v44 = vsub.f32 %v4993_v0, %v4994_v11  ;;  %v4998_v5 = vsub.f32 %v4996_v7, %v4997_v33  ;;  %v5022_v60 = vld [vmem:[#allocation55_spill] sm:$0xff]  ;;  %v5025_v0 = vld [vmem:[#allocation45_spill] sm:$0xff] }
 0x3ee   : > { %v2531_v18 = vpop.eup %2530  ;;  %2550 = vpow2.f32 %v1709_v34  ;;  %v1489_v62 = vmul.f32 1.442695, %v4992_v20  ;;  %v1469_v33 = vld [vmem:[#allocation3 + $0x60] sm:$0xff] }
 0x3ef   : > { %v2533_v56 = vpop.eup %2532  ;;  %1723 = vadd.xlane.f32.xlu1 %v1722_v63  ;;  %2552 = vpow2.f32 %v1711_v48  ;;  %v1505_v8 = vmul.f32 1.442695, %v4995_v44  ;;  %v1491_v63 = vmul.f32 1.442695, %v4998_v5 }
 0x3f0   : > { %v2535_v13 = vpop.eup %2534  ;;  %v1731_v50 = vadd.f32 %v2533_v56, %v2531_v18  ;;  %2554 = vpow2.f32 %v1489_v62  ;;  %v1457_v56 = vld [vmem:[#allocation3] sm:$0xff]  ;;  %v5024_v62 = vld [vmem:[#allocation44_spill] sm:$0xff] }
 0x3f1   : > { %v2537_v41 = vpop.eup %2536  ;;  %2556 = vpow2.f32 %v1505_v8  ;;  %v5026_v11 = vsub.f32 %v5024_v62, %v5025_v0 }
 0x3f2   : > { %v2539_v38 = vpop.eup %2538  ;;  %1732 = vadd.xlane.f32.xlu0 %v1731_v50  ;;  %v1728_v2 = vadd.f32 %v2537_v41, %v2535_v13  ;;  %2558 = vpow2.f32 %v1491_v63  ;;  %v1465_v50 = vld [vmem:[#allocation3 + $0x40] sm:$0xff]  ;;  %v5027_v63 = vld [vmem:[#allocation56_spill] sm:$0xff] }
 0x3f3   : > { %v2541_v49 = vpop.eup %2540  ;;  %1747 = vadd.xlane.f32.xlu1 %v1746_v3  ;;  %v4999_v3 = vld [vmem:[#allocation38_spill] sm:$0xff]  ;;  %v1511_v44 = vmul.f32 1.442695, %v5026_v11 }
 0x3f4   : > { %v1755_v17 = vadd.f32 %v2541_v49, %v2539_v38  ;;  %v2543_v6 = vpop.eup %2542  ;;  %v5000_v38 = vld [vmem:[#allocation39_spill] sm:$0xff] }
 0x3f5   : > { %v2545_v32 = vpop.eup %2544  ;;  %v5001_v49 = vsub.f32 %v4999_v3, %v5000_v38 }
 0x3f6   : > { %1756 = vadd.xlane.f32.xlu0 %v1755_v17  ;;  %v2547_v16 = vpop.eup %2546  ;;  %v1752_v39 = vadd.f32 %v2545_v32, %v2543_v6 }
 0x3f7   : > { %1729 = vadd.xlane.f32.xlu1 %v1728_v2  ;;  %v2549_v54 = vpop.eup %2548  ;;  %v1493_v17 = vmul.f32 1.442695, %v5001_v49 }
 0x3f8   : > { %v2551_v25 = vpop.eup %2550  ;;  %v1734_v21 = vadd.f32 %v2549_v54, %v2547_v16  ;;  %v5003_v54 = vld [vmem:[#allocation40_spill] sm:$0xff] }
 0x3f9   : > { %v2553_v15 = vpop.eup %2552  ;;  %2560 = vpow2.f32 %v1493_v17 }
 0x3fa   : > { %v1758_v29 = vadd.f32 %v2553_v15, %v2551_v25  ;;  %v2555_v18 = vpop.eup %2554  ;;  %v5004_v25 = vld [vmem:[#allocation42_spill] sm:$0xff] }
 0x3fb   : > { %1753 = vadd.xlane.f32.xlu1 %v1752_v39  ;;  %v1521_v34 = vmul.f32 %v2555_v18, %v1457_v56  ;;  %v2557_v13 = vpop.eup %2556  ;;  %v1458_v39 = vld [vmem:[#allocation3 + $0x8] sm:$0xff] }
 0x3fc   : > { %v1529_v6 = vmul.f32 %v2557_v13, %v1465_v50  ;;  %v2559_v32 = vpop.eup %2558  ;;  %v5028_v18 = vld [vmem:[#allocation58_spill] sm:$0xff]  ;;  %v5030_v13 = vld [vmem:[#allocation49_spill] sm:$0xff] }
 0x3fd   : > { %v5029_v56 = vsub.f32 %v5027_v63, %v5028_v18 }
 0x3ff   : > { %1735 = vadd.xlane.f32.xlu1 %v1734_v21  ;;  %v5005_v21 = vsub.f32 %v5003_v54, %v5004_v25 }
 0x401   : > { %v1509_v15 = vmul.f32 1.442695, %v5005_v21 }
 0x403   : > { %1759 = vadd.xlane.f32.xlu1 %v1758_v29  ;;  %v1522_v29 = vmul.f32 %v2559_v32, %v1458_v39  ;;  %2562 = vpow2.f32 %v1509_v15  ;;  %v5035_v32 = vld [vmem:[#allocation53_spill] sm:$0xff] }
 0x404   : > { %v1460_v15 = vld [vmem:[#allocation3 + $0x18] sm:$0xff] }
 0x415   : > { %v1305_v9 = vpop.xlane.xlu1 %1304  ;;  %v1329_v43 = vpop.xlane.xlu0 %1328 }
 0x416   : > { %v1347_v53 = vadd.f32 %v1305_v9, %v1219_v55  ;;  %v1355_v22 = vadd.f32 %v1329_v43, %v1227_v42  ;;  %v2561_v9 = vpop.eup %2560  ;;  %v1459_v43 = vld [vmem:[#allocation3 + $0x10] sm:$0xff] }
 0x418   : > { %1363 = vst.msk [vmem:[#allocation5 + $0x10] sm:$0xff] %vm4980_vm0, %v1347_v53  ;;  %v5008_v53 = vld [vmem:[#allocation46_spill] sm:$0xff] }
 0x419   : > { %1371 = vst.msk [vmem:[#allocation5 + $0x50] sm:$0xff] %vm4981_vm7, %v1355_v22  ;;  %v1314_v57 = vpop.xlane.xlu1 %1313  ;;  %v1335_v51 = vpop.xlane.xlu0 %1334  ;;  %v5009_v22 = vld [vmem:[#allocation47_spill] sm:$0xff]  ;;  %vm5040_vm7 = vmmov %vm4980_vm0 }
 0x41a   : > { %v1350_v40 = vadd.f32 %v1314_v57, %v1222_v28  ;;  %v1357_v23 = vadd.f32 %v1335_v51, %v1229_v12  ;;  %v5010_v28 = vsub.f32 %v5008_v53, %v5009_v22  ;;  %v1523_v57 = vmul.f32 %v2561_v9, %v1459_v43  ;;  %v2563_v51 = vpop.eup %2562 }
 0x41c   : > { %1366 = vst.msk [vmem:[#allocation5 + $0x28] sm:$0xff] %vm4982_vm3, %v1350_v40  ;;  %v1497_v12 = vmul.f32 1.442695, %v5010_v28  ;;  %v1463_v28 = vld [vmem:[#allocation3 + $0x30] sm:$0xff]  ;;  %vm5044_vm3 = vmmov %vm4980_vm0 }
 0x41d   : > { %1373 = vst.msk [vmem:[#allocation5 + $0x60] sm:$0xff] %vm4983_vm12, %v1357_v23  ;;  %v1320_v59 = vpop.xlane.xlu1 %1319  ;;  %v1341_v61 = vpop.xlane.xlu0 %1340  ;;  %v1467_v23 = vld [vmem:[#allocation3 + $0x50] sm:$0xff]  ;;  %vm5045_vm12 = vmmov %vm4980_vm0 }
 0x41e   : > { %v1352_v52 = vadd.f32 %v1320_v59, %v1224_v10  ;;  %v1359_v19 = vadd.f32 %v1341_v61, %v1231_v35  ;;  %2564 = vpow2.f32 %v1497_v12  ;;  %v5011_v35 = vld [vmem:[#allocation48_spill] sm:$0xff]  ;;  %v5012_v59 = vld [vmem:[#allocation50_spill] sm:$0xff] }
 0x41f   : > { %v5013_v61 = vsub.f32 %v5011_v35, %v5012_v59 }
 0x420   : > { %1368 = vst.msk [vmem:[#allocation5 + $0x38] sm:$0xff] %vm4984_vm5, %v1352_v52  ;;  %vm5046_vm5 = vmmov %vm4980_vm0 }
 0x421   : > { %1375 = vst.msk [vmem:[#allocation5 + $0x70] sm:$0xff] %vm4985_vm2, %v1359_v19  ;;  %v1326_v46 = vpop.xlane.xlu1 %1325  ;;  %v1513_v52 = vmul.f32 1.442695, %v5013_v61  ;;  %v1531_v19 = vmul.f32 %v2563_v51, %v1467_v23  ;;  %v1468_v51 = vld [vmem:[#allocation3 + $0x58] sm:$0xff]  ;;  %vm5047_vm2 = vmmov %vm4980_vm0 }
 0x422   : > { %v1354_v30 = vadd.f32 %v1326_v46, %v1226_v26  ;;  %v5041_v23 = vld [vmem:[#allocation60_spill] sm:$0xff] }
 0x423   : > { %2566 = vpow2.f32 %v1513_v52 }
 0x424   : > { %1370 = vst.msk [vmem:[#allocation5 + $0x48] sm:$0xff] %vm4986_vm10, %v1354_v30  ;;  %v5015_v30 = vld [vmem:[#allocation37_spill] sm:$0xff]  ;;  %vm5048_vm10 = vmmov %vm4980_vm0 }
 0x425   : > { %v1332_v37 = vpop.xlane.xlu1 %1331 }
 0x426   : > { %v1356_v14 = vadd.f32 %v1332_v37, %v1228_v1  ;;  %v5016_v1 = vsub.f32 %v5015_v30, %v4299_v24 }
 0x428   : > { %1372 = vst.msk [vmem:[#allocation5 + $0x58] sm:$0xff] %vm4987_vm9, %v1356_v14  ;;  %v1507_v37 = vmul.f32 1.442695, %v5016_v1  ;;  %v5018_v14 = vld [vmem:[#allocation41_spill] sm:$0xff]  ;;  %vm5049_vm9 = vmmov %vm4980_vm0 }
 0x429   : > { %v1338_v58 = vpop.xlane.xlu1 %1337 }
 0x42a   : > { %v1358_v36 = vadd.f32 %v1338_v58, %v1230_v47  ;;  %2568 = vpow2.f32 %v1507_v37  ;;  %v5019_v47 = vld [vmem:[#allocation43_spill] sm:$0xff] }
 0x42b   : > { %v5020_v58 = vsub.f32 %v5018_v14, %v5019_v47  ;;  %v1462_v14 = vld [vmem:[#allocation3 + $0x28] sm:$0xff] }
 0x42c   : > { %1374 = vst.msk [vmem:[#allocation5 + $0x68] sm:$0xff] %vm4988_vm14, %v1358_v36  ;;  %vm5050_vm14 = vmmov %vm4980_vm0 }
 0x42d   : > { %v1344_v45 = vpop.xlane.xlu1 %1343  ;;  %v1495_v36 = vmul.f32 1.442695, %v5020_v58 }
 0x42e   : > { %v1360_v31 = vadd.f32 %v1344_v45, %v1232_v4  ;;  %v2565_v4 = vpop.eup %2564  ;;  %v1461_v45 = vld [vmem:[#allocation3 + $0x20] sm:$0xff] }
 0x42f   : > { %2570 = vpow2.f32 %v1495_v36  ;;  %v1525_v24 = vmul.f32 %v2565_v4, %v1461_v45  ;;  %v2567_v8 = vpop.eup %2566 }
 0x430   : > { %1376 = vst.msk [vmem:[#allocation5 + $0x78] sm:$0xff] %vm4989_vm11, %v1360_v31  ;;  %v5021_v31 = vld [vmem:[#allocation54_spill] sm:$0xff]  ;;  %v1533_v3 = vmul.f32 %v2567_v8, %v1469_v33  ;;  %vm5051_vm11 = vmmov %vm4980_vm0 }
 0x431   : > { %v5023_v27 = vsub.f32 %v5021_v31, %v5022_v60 }
 0x433   : > { %v1501_v20 = vmul.f32 1.442695, %v5023_v27  ;;  %v1470_v27 = vld [vmem:[#allocation3 + $0x68] sm:$0xff] }
 0x434   : > { %v2569_v49 = vpop.eup %2568 }
 0x435   : > { %2572 = vpow2.f32 %v1501_v20 }
 0x436   : > { %2574 = vpow2.f32 %v1511_v44  ;;  %v1464_v44 = vld [vmem:[#allocation3 + $0x38] sm:$0xff] }
 0x439   : > { %v2571_v25 = vpop.eup %2570 }
 0x43a   : > { %v1524_v22 = vmul.f32 %v2571_v25, %v1460_v15  ;;  %v1915_v15 = vld [vmem:[#allocation5 + $0x30] sm:$0xff] (!%p2208_p13) }
 0x43f   : > { %v2573_v53 = vpop.eup %2572 }
 0x440   : > { %v2575_v12 = vpop.eup %2574  ;;  %v1527_v61 = vmul.f32 %v2573_v53, %v1463_v28  ;;  %v1916_v28 = vld [vmem:[#allocation5 + $0x38] sm:$0xff] (!%p2208_p13) }
 0x44b   : > { %v1715_v48 = vpop.xlane.xlu0 %1714 }
 0x44c   : > { %v1761_v41 = vadd.f32 %v1715_v48, %v1521_v34  ;;  %v1517_v34 = vmul.f32 1.442695, %v5029_v56  ;;  %v5031_v48 = vld [vmem:[#allocation51_spill] sm:$0xff] }
 0x44d   : > { %v5032_v50 = vsub.f32 %v5030_v13, %v5031_v48  ;;  %v1909_v48 = vld [vmem:[#allocation5] sm:$0xff] (!%p2208_p13) }
 0x44e   : > { %1777 = vst.msk [vmem:[#allocation3] sm:$0xff] %vm5002_vm15, %v1761_v41  ;;  %2576 = vpow2.f32 %v1517_v34  ;;  %vm5053_vm15 = vcmask (!%p2208_p13), 7168  }
 0x44f   : > { %v1739_v2 = vpop.xlane.xlu0 %1738  ;;  %v1499_v41 = vmul.f32 1.442695, %v5032_v50 }
 0x450   : > { %v1769_v16 = vadd.f32 %v1739_v2, %v1529_v6  ;;  %v1466_v6 = vld [vmem:[#allocation3 + $0x48] sm:$0xff]  ;;  %v5034_v2 = vld [vmem:[#allocation52_spill] sm:$0xff] }
 0x451   : > { %2578 = vpow2.f32 %v1499_v41  ;;  %v1530_v54 = vmul.f32 %v2569_v49, %v1466_v6  ;;  %v1910_v41 = vld [vmem:[#allocation5 + $0x8] sm:$0xff] (!%p2208_p13) }
 0x452   : > { %1785 = vst.msk [vmem:[#allocation3 + $0x40] sm:$0xff] %vm5006_vm1, %v1769_v16  ;;  %v5036_v16 = vsub.f32 %v5034_v2, %v5035_v32  ;;  %v1913_v2 = vld [vmem:[#allocation5 + $0x20] sm:$0xff] (!%p2208_p13)  ;;  %vm5054_vm1 = vmmov (!%p2208_p13), %vm5053_vm15 }
 0x454   : > { %v1718_v55 = vpop.xlane.xlu1 %1717  ;;  %v1515_v39 = vmul.f32 1.442695, %v5036_v16  ;;  %v1914_v16 = vld [vmem:[#allocation5 + $0x28] sm:$0xff] (!%p2208_p13) }
 0x455   : > { %v1762_v42 = vadd.f32 %v1718_v55, %v1522_v29  ;;  %v5037_v55 = vld [vmem:[#allocation57_spill] sm:$0xff] }
 0x456   : > { %2580 = vpow2.f32 %v1515_v39  ;;  %v1829_v13 = vld [vmem:[#allocation3] sm:$0xff] (!%p2208_p13) }
 0x457   : > { %1778 = vst.msk [vmem:[#allocation3 + $0x8] sm:$0xff] %vm5007_vm8, %v1762_v42  ;;  %v5038_v42 = vld [vmem:[#allocation59_spill] sm:$0xff]  ;;  %v1893_v39 = vld [vmem:[#allocation4] sm:$0xff] (!%p2208_p13)  ;;  %vm5055_vm8 = vmmov (!%p2208_p13), %vm5054_vm1 }
 0x458   : > { %v5039_v9 = vsub.f32 %v5037_v55, %v5038_v42  ;;  %v2577_v52 = vpop.eup %2576  ;;  %v1894_v42 = vld [vmem:[#allocation4 + $0x8] sm:$0xff] (!%p2208_p13) }
 0x45a   : > { %v1503_v43 = vmul.f32 1.442695, %v5039_v9 }
 0x45b   : > { %v2579_v30 = vpop.eup %2578 }
 0x45c   : > { %2582 = vpow2.f32 %v1503_v43  ;;  %v1526_v4 = vmul.f32 %v2579_v30, %v1462_v14  ;;  %v1896_v30 = vld [vmem:[#allocation4 + $0x18] sm:$0xff] (!%p2208_p13) }
 0x45e   : > { %v1830_v50 = vld [vmem:[#allocation3 + $0x8] sm:$0xff] (!%p2208_p13) }
 0x45f   : > { %v1721_v40 = vpop.xlane.xlu0 %1720 }
 0x460   : > { %v1763_v10 = vadd.f32 %v1721_v40, %v1523_v57  ;;  %v2581_v45 = vpop.eup %2580 }
 0x461   : > { %v1534_v62 = vmul.f32 %v2581_v45, %v1470_v27 }
 0x462   : > { %1779 = vst.msk [vmem:[#allocation3 + $0x10] sm:$0xff] %vm5014_vm13, %v1763_v10  ;;  %v5042_v10 = vld [vmem:[#allocation61_spill] sm:$0xff]  ;;  %vm5056_vm13 = vmmov (!%p2208_p13), %vm5054_vm1 }
 0x463   : > { %v1745_v26 = vpop.xlane.xlu0 %1744  ;;  %v5043_v35 = vsub.f32 %v5041_v23, %v5042_v10  ;;  %v1837_v23 = vld [vmem:[#allocation3 + $0x40] sm:$0xff] (!%p2208_p13) }
 0x464   : > { %v1771_v46 = vadd.f32 %v1745_v26, %v1531_v19  ;;  %v1532_v26 = vmul.f32 %v2575_v12, %v1468_v51 }
 0x465   : > { %v1519_v59 = vmul.f32 1.442695, %v5043_v35 }
 0x466   : > { %1787 = vst.msk [vmem:[#allocation3 + $0x50] sm:$0xff] %vm5017_vm4, %v1771_v46  ;;  %v1471_v46 = vld [vmem:[#allocation3 + $0x70] sm:$0xff]  ;;  %v2583_v0 = vpop.eup %2582  ;;  %vm5057_vm4 = vmmov (!%p2208_p13), %vm5054_vm1 }
 0x467   : > { %2584 = vpow2.f32 %v1519_v59  ;;  %v1535_v58 = vmul.f32 %v2577_v52, %v1471_v46  ;;  %v1528_v8 = vmul.f32 %v2583_v0, %v1464_v44  ;;  %v1815_v59 = vld [vmem:[#allocation2 + $0x10] sm:$0xff] (!%p2208_p13)  ;;  %v1817_v0 = vld [vmem:[#allocation2 + $0x20] sm:$0xff] (!%p2208_p13) }
 0x468   : > { %2586 = vlog2.f32 (!%p2208_p13), %v1829_v13 }
 0x469   : > { %2588 = vrcp.f32 (!%p2208_p13), %v1909_v48 }
 0x46a   : > { %2590 = vlog2.f32 (!%p2208_p13), %v1830_v50 }
 0x46b   : > { %2592 = vrcp.f32 (!%p2208_p13), %v1910_v41 }
 0x46d   : > { %v1839_v27 = vld [vmem:[#allocation3 + $0x50] sm:$0xff] (!%p2208_p13) }
 0x46f   : > { %v1727_v7 = vpop.xlane.xlu0 %1726 }
 0x470   : > { %v1765_v5 = vadd.f32 %v1727_v7, %v1525_v24 }
 0x471   : > { %v2585_v7 = vpop.eup %2584 }
 0x472   : > { %1781 = vst.msk [vmem:[#allocation3 + $0x20] sm:$0xff] %vm5033_vm6, %v1765_v5  ;;  %v1472_v5 = vld [vmem:[#allocation3 + $0x78] sm:$0xff]  ;;  %v2587_v25 = vpop.eup (!%p2208_p13), %2586  ;;  %vm5058_vm6 = vmmov (!%p2208_p13), %vm5054_vm1 }
 0x473   : > { %v1751_v38 = vpop.xlane.xlu0 %1750  ;;  %v1536_v18 = vmul.f32 %v2585_v7, %v1472_v5  ;;  %v1846_v55 = vmul.f32 (!%p2208_p13), 0.6931472, %v2587_v25  ;;  %v1900_v25 = vld [vmem:[#allocation4 + $0x38] sm:$0xff] (!%p2208_p13) }
 0x474   : > { %v1773_v17 = vadd.f32 %v1751_v38, %v1533_v3  ;;  %v1831_v3 = vld [vmem:[#allocation3 + $0x10] sm:$0xff] (!%p2208_p13) }
 0x475   : > { %v1911_v38 = vld [vmem:[#allocation5 + $0x10] sm:$0xff] (!%p2208_p13)  ;;  %2594 = vlog2.f32 (!%p2208_p13), %v1831_v3 }
 0x476   : > { %1789 = vst.msk [vmem:[#allocation3 + $0x60] sm:$0xff] %vm4980_vm0, %v1773_v17  ;;  %v1912_v17 = vld [vmem:[#allocation5 + $0x18] sm:$0xff] (!%p2208_p13)  ;;  %2596 = vrcp.f32 (!%p2208_p13), %v1911_v38  ;;  %v1899_v3 = vld [vmem:[#allocation4 + $0x30] sm:$0xff] (!%p2208_p13)  ;;  %vm5059_vm0 = vmmov (!%p2208_p13), %vm5054_vm1 }
 0x478   : > { %v1742_v21 = vpop.xlane.xlu1 %1741 }
 0x479   : > { %v1770_v29 = vadd.f32 %v1742_v21, %v1530_v54  ;;  %v1833_v6 = vld [vmem:[#allocation3 + $0x20] sm:$0xff] (!%p2208_p13) }
 0x47a   : > { %v1813_v21 = vld [vmem:[#allocation2] sm:$0xff] (!%p2208_p13) }
 0x47b   : > { %1786 = vst.msk [vmem:[#allocation3 + $0x48] sm:$0xff] %vm5040_vm7, %v1770_v29  ;;  %v2589_v29 = vpop.eup (!%p2208_p13), %2588  ;;  %vm5060_vm7 = vmmov (!%p2208_p13), %vm5059_vm0 }
 0x47c   : > { %v1724_v57 = vpop.xlane.xlu1 %1723  ;;  %v2591_v43 = vpop.eup (!%p2208_p13), %2590  ;;  %v1941_v53 = vmul.f32 (!%p2208_p13), %v2589_v29, %v1893_v39 }
 0x47d   : > { %v1764_v40 = vadd.f32 %v1724_v57, %v1524_v22  ;;  %v1814_v22 = vld [vmem:[#allocation2 + $0x8] sm:$0xff] (!%p2208_p13)  ;;  %v2593_v12 = vpop.eup (!%p2208_p13), %2592  ;;  %v1877_v57 = vadd.f32 (!%p2208_p13), %v1846_v55, %v1813_v21  ;;  %v1848_v51 = vmul.f32 (!%p2208_p13), 0.6931472, %v2591_v43  ;;  %v1841_v38 = vld [vmem:[#allocation3 + $0x60] sm:$0xff] (!%p2208_p13)  ;;  %v1820_v55 = vld [vmem:[#allocation2 + $0x38] sm:$0xff] (!%p2208_p13) }
 0x47e   : > { %v1942_v35 = vmul.f32 (!%p2208_p13), %v2593_v12, %v1894_v42  ;;  %v1922_v42 = vld [vmem:[#allocation5 + $0x68] sm:$0xff] (!%p2208_p13) }
 0x47f   : > { %1780 = vst.msk [vmem:[#allocation3 + $0x18] sm:$0xff] %vm5044_vm3, %v1764_v40  ;;  %v1733_v19 = vpop.xlane.xlu0 %1732  ;;  %v1895_v40 = vld [vmem:[#allocation4 + $0x10] sm:$0xff] (!%p2208_p13)  ;;  %v2595_v10 = vpop.eup (!%p2208_p13), %2594  ;;  %vm5061_vm3 = vmmov (!%p2208_p13), %vm5059_vm0 }
 0x480   : > { %v1767_v1 = vadd.f32 %v1733_v19, %v1527_v61  ;;  %v1748_v37 = vpop.xlane.xlu1 %1747  ;;  %v1917_v61 = vld [vmem:[#allocation5 + $0x40] sm:$0xff] (!%p2208_p13)  ;;  %v2597_v52 = vpop.eup (!%p2208_p13), %2596  ;;  %v1957_v19 = vsub.f32 (!%p2208_p13), %v1941_v53, %v1877_v57  ;;  %v1850_v46 = vmul.f32 (!%p2208_p13), 0.6931472, %v2595_v10 }
 0x481   : > { %v1772_v47 = vadd.f32 %v1748_v37, %v1532_v26  ;;  %v1878_v26 = vadd.f32 (!%p2208_p13), %v1848_v51, %v1814_v22  ;;  %v1943_v14 = vmul.f32 (!%p2208_p13), %v2597_v52, %v1895_v40  ;;  %v1821_v40 = vld [vmem:[#allocation2 + $0x40] sm:$0xff] (!%p2208_p13)  ;;  %v1902_v52 = vld [vmem:[#allocation4 + $0x48] sm:$0xff] (!%p2208_p13) }
 0x482   : > { %1783 = vst.msk [vmem:[#allocation3 + $0x30] sm:$0xff] %vm5045_vm12, %v1767_v1  ;;  %v1838_v1 = vld [vmem:[#allocation3 + $0x48] sm:$0xff] (!%p2208_p13)  ;;  %v1879_v45 = vadd.f32 (!%p2208_p13), %v1850_v46, %v1815_v59  ;;  %vm5062_vm12 = vmmov (!%p2208_p13), %vm5059_vm0 }
 0x483   : > { %1788 = vst.msk [vmem:[#allocation3 + $0x58] sm:$0xff] %vm5046_vm5, %v1772_v47  ;;  %v1757_v36 = vpop.xlane.xlu0 %1756  ;;  %v1816_v47 = vld [vmem:[#allocation2 + $0x18] sm:$0xff] (!%p2208_p13)  ;;  %vm5063_vm5 = vmmov (!%p2208_p13), %vm5059_vm0 }
 0x484   : > { %v1775_v31 = vadd.f32 %v1757_v36, %v1535_v58  ;;  %v1730_v60 = vpop.xlane.xlu1 %1729  ;;  %v1918_v58 = vld [vmem:[#allocation5 + $0x48] sm:$0xff] (!%p2208_p13)  ;;  %1973 = vst.msk [vmem:[%s3282_s30] sm:$0xff] (!%p2208_p13), %vm5053_vm15, %v1957_v19 }
 0x485   : > { %v1766_v20 = vadd.f32 %v1730_v60, %v1526_v4  ;;  %v1958_v4 = vsub.f32 (!%p2208_p13), %v1942_v35, %v1878_v26  ;;  %v1897_v60 = vld [vmem:[#allocation4 + $0x20] sm:$0xff] (!%p2208_p13) }
 0x486   : > { %1791 = vst.msk [vmem:[#allocation3 + $0x70] sm:$0xff] %vm5047_vm2, %v1775_v31  ;;  %v1832_v49 = vld [vmem:[#allocation3 + $0x18] sm:$0xff] (!%p2208_p13)  ;;  %vm5064_vm2 = vmmov (!%p2208_p13), %vm5059_vm0 }
 0x487   : > { %1782 = vst.msk [vmem:[#allocation3 + $0x28] sm:$0xff] %vm5048_vm10, %v1766_v20  ;;  %2598 = vlog2.f32 (!%p2208_p13), %v1832_v49  ;;  %vm5065_vm10 = vmmov (!%p2208_p13), %vm5059_vm0 }
 0x488   : > { %v1754_v11 = vpop.xlane.xlu1 %1753  ;;  %2600 = vrcp.f32 (!%p2208_p13), %v1912_v17  ;;  %1974 = vst.msk [vmem:[%s3282_s30 + $0x8] sm:$0xff] (!%p2208_p13), %vm5054_vm1, %v1958_v4 }
 0x489   : > { %v1774_v24 = vadd.f32 %v1754_v11, %v1534_v62  ;;  %2602 = vlog2.f32 (!%p2208_p13), %v1833_v6  ;;  %v1835_v54 = vld [vmem:[#allocation3 + $0x30] sm:$0xff] (!%p2208_p13) }
 0x48a   : > { %2604 = vrcp.f32 (!%p2208_p13), %v1913_v2  ;;  %v1919_v11 = vld [vmem:[#allocation5 + $0x50] sm:$0xff] (!%p2208_p13)  ;;  %v1840_v5 = vld [vmem:[#allocation3 + $0x58] sm:$0xff] (!%p2208_p13)  ;;  %v1921_v2 = vld [vmem:[#allocation5 + $0x60] sm:$0xff] (!%p2208_p13) }
 0x48b   : > { %1790 = vst.msk [vmem:[#allocation3 + $0x68] sm:$0xff] %vm5049_vm9, %v1774_v24  ;;  %v1959_v24 = vsub.f32 (!%p2208_p13), %v1943_v14, %v1879_v45  ;;  %v1819_v6 = vld [vmem:[#allocation2 + $0x30] sm:$0xff] (!%p2208_p13)  ;;  %vm5066_vm9 = vmmov (!%p2208_p13), %vm5059_vm0 }
 0x48c   : > { %v1736_v33 = vpop.xlane.xlu1 %1735 }
 0x48d   : > { %v1768_v63 = vadd.f32 %v1736_v33, %v1528_v8  ;;  %1812 = sbr.rel (%p2208_p13) target bundleno = 1209 (0x4b9), region = 60  ;;  %v1898_v33 = vld [vmem:[#allocation4 + $0x28] sm:$0xff] (!%p2208_p13)  ;;  %1975 = vst.msk [vmem:[%s3282_s30 + $0x10] sm:$0xff] (!%p2208_p13), %vm5055_vm8, %v1959_v24  ;;  %v1843_v12 = vld [vmem:[#allocation3 + $0x70] sm:$0xff] (!%p2208_p13)  ;;  %v1824_v24 = vld [vmem:[#allocation2 + $0x58] sm:$0xff] (!%p2208_p13) }
 0x48e   : > { %v1834_v32 = vld [vmem:[#allocation3 + $0x28] sm:$0xff] (!%p2208_p13) }
 0x48f   : > { %1784 = vst.msk [vmem:[#allocation3 + $0x38] sm:$0xff] %vm5050_vm14, %v1768_v63  ;;  %2606 = vlog2.f32 (!%p2208_p13), %v1834_v32  ;;  %vm5067_vm14 = vmmov (!%p2208_p13), %vm5059_vm0 }
 0x490   : > { %v1760_v56 = vpop.xlane.xlu1 %1759  ;;  %2608 = vrcp.f32 (!%p2208_p13), %v1914_v16 }
 0x491   : > { %v1776_v34 = vadd.f32 %v1760_v56, %v1536_v18  ;;  %2610 = vlog2.f32 (!%p2208_p13), %v1835_v54  ;;  %v2599_v37 = vpop.eup (!%p2208_p13), %2598  ;;  %v1818_v56 = vld [vmem:[#allocation2 + $0x28] sm:$0xff] (!%p2208_p13) }
 0x492   : > { %2612 = vrcp.f32 (!%p2208_p13), %v1915_v15  ;;  %v2601_v36 = vpop.eup (!%p2208_p13), %2600  ;;  %v1852_v31 = vmul.f32 (!%p2208_p13), 0.6931472, %v2599_v37  ;;  %v1842_v21 = vld [vmem:[#allocation3 + $0x68] sm:$0xff] (!%p2208_p13) }
 0x493   : > { %1792 = vst.msk [vmem:[#allocation3 + $0x78] sm:$0xff] %vm5051_vm11, %v1776_v34  ;;  %v2603_v20 = vpop.eup (!%p2208_p13), %2602  ;;  %v1944_v62 = vmul.f32 (!%p2208_p13), %v2601_v36, %v1896_v30  ;;  %v1920_v34 = vld [vmem:[#allocation5 + $0x58] sm:$0xff] (!%p2208_p13)  ;;  %v1822_v30 = vld [vmem:[#allocation2 + $0x48] sm:$0xff] (!%p2208_p13)  ;;  %v1903_v36 = vld [vmem:[#allocation4 + $0x50] sm:$0xff] (!%p2208_p13) }
 0x494   : > { %v2605_v44 = vpop.eup %2604  ;;  %v1880_v8 = vadd.f32 %v1852_v31, %v1816_v47  ;;  %v1854_v7 = vmul.f32 0.6931472, %v2603_v20  ;;  %v1823_v31 = vld [vmem:[#allocation2 + $0x50] sm:$0xff]  ;;  %vm5068_vm11 = vmmov %vm5059_vm0 }
 0x495   : > { %v1945_v18 = vmul.f32 %v2605_v44, %v1897_v60 }
 0x496   : > { %v1836_v9 = vld [vmem:[#allocation3 + $0x38] sm:$0xff]  ;;  %v1960_v48 = vsub.f32 %v1944_v62, %v1880_v8  ;;  %v1881_v50 = vadd.f32 %v1854_v7, %v1817_v0 }
 0x497   : > { %2614 = vlog2.f32 %v1836_v9  ;;  %v1904_v0 = vld [vmem:[#allocation4 + $0x58] sm:$0xff] }
 0x498   : > { %2616 = vrcp.f32 %v1916_v28  ;;  %1976 = vst.msk [vmem:[%s3282_s30 + $0x18] sm:$0xff] %vm5056_vm13, %v1960_v48  ;;  %v1961_v16 = vsub.f32 %v1945_v18, %v1881_v50  ;;  %v1901_v28 = vld [vmem:[#allocation4 + $0x40] sm:$0xff] }
 0x499   : > { %2618 = vlog2.f32 %v1837_v23  ;;  %v2607_v63 = vpop.eup %2606  ;;  %v1923_v23 = vld [vmem:[#allocation5 + $0x70] sm:$0xff] }
 0x49a   : > { %2620 = vrcp.f32 %v1917_v61  ;;  %v2609_v13 = vpop.eup %2608  ;;  %v1856_v41 = vmul.f32 0.6931472, %v2607_v63  ;;  %1977 = vst.msk [vmem:[%s3282_s30 + $0x20] sm:$0xff] %vm5057_vm4, %v1961_v16  ;;  %v1844_v19 = vld [vmem:[#allocation3 + $0x78] sm:$0xff]  ;;  %v1905_v63 = vld [vmem:[#allocation4 + $0x60] sm:$0xff] }
 0x49b   : > { %2622 = vlog2.f32 %v1838_v1  ;;  %v2611_v49 = vpop.eup %2610  ;;  %v1946_v17 = vmul.f32 %v2609_v13, %v1898_v33  ;;  %v1924_v1 = vld [vmem:[#allocation5 + $0x78] sm:$0xff] }
 0x49c   : > { %2624 = vrcp.f32 %v1918_v58  ;;  %v2613_v32 = vpop.eup %2612  ;;  %v1882_v39 = vadd.f32 %v1856_v41, %v1818_v56  ;;  %v1858_v54 = vmul.f32 0.6931472, %v2611_v49 }
 0x49d   : > { %2626 = vlog2.f32 %v1839_v27  ;;  %v1947_v29 = vmul.f32 %v2613_v32, %v1899_v3  ;;  %v1906_v3 = vld [vmem:[#allocation4 + $0x68] sm:$0xff] }
 0x49e   : > { %2628 = vrcp.f32 %v1919_v11  ;;  %v1962_v43 = vsub.f32 %v1946_v17, %v1882_v39  ;;  %v1883_v53 = vadd.f32 %v1858_v54, %v1819_v6  ;;  %v1826_v17 = vld [vmem:[#allocation2 + $0x68] sm:$0xff]  ;;  %v1907_v39 = vld [vmem:[#allocation4 + $0x70] sm:$0xff] }
 0x49f   : > { %2630 = vlog2.f32 %v1840_v5 }
 0x4a0   : > { %2632 = vrcp.f32 %v1920_v34  ;;  %1978 = vst.msk [vmem:[%s3282_s30 + $0x28] sm:$0xff] %vm5058_vm6, %v1962_v43  ;;  %v1963_v35 = vsub.f32 %v1947_v29, %v1883_v53  ;;  %v1825_v34 = vld [vmem:[#allocation2 + $0x60] sm:$0xff] }
 0x4a1   : > { %v2615_v15 = vpop.eup %2614  ;;  %2634 = vlog2.f32 %v1841_v38 }
 0x4a2   : > { %v2617_v9 = vpop.eup %2616  ;;  %v1860_v22 = vmul.f32 0.6931472, %v2615_v15  ;;  %2636 = vrcp.f32 %v1921_v2  ;;  %1979 = vst.msk [vmem:[%s3282_s30 + $0x30] sm:$0xff] %vm5059_vm0, %v1963_v35 }
 0x4a3   : > { %v2619_v57 = vpop.eup %2618  ;;  %v1948_v51 = vmul.f32 %v2617_v9, %v1900_v25  ;;  %2638 = vlog2.f32 %v1842_v21  ;;  %v1827_v21 = vld [vmem:[#allocation2 + $0x70] sm:$0xff]  ;;  %v1908_v9 = vld [vmem:[#allocation4 + $0x78] sm:$0xff] }
 0x4a4   : > { %v2621_v10 = vpop.eup %2620  ;;  %v1884_v59 = vadd.f32 %v1860_v22, %v1820_v55  ;;  %v1862_v61 = vmul.f32 0.6931472, %v2619_v57  ;;  %2640 = vrcp.f32 %v1922_v42  ;;  %v1828_v22 = vld [vmem:[#allocation2 + $0x78] sm:$0xff] }
 0x4a5   : > { %v2623_v26 = vpop.eup %2622  ;;  %v1949_v46 = vmul.f32 %v2621_v10, %v1901_v28  ;;  %2642 = vlog2.f32 %v1843_v12 }
 0x4a6   : > { %v2625_v37 = vpop.eup %2624  ;;  %v1964_v14 = vsub.f32 %v1948_v51, %v1884_v59  ;;  %v1885_v47 = vadd.f32 %v1862_v61, %v1821_v40  ;;  %v1864_v58 = vmul.f32 0.6931472, %v2623_v26  ;;  %2644 = vrcp.f32 %v1923_v23 }
 0x4a7   : > { %v2627_v4 = vpop.eup %2626  ;;  %v1950_v45 = vmul.f32 %v2625_v37, %v1902_v52  ;;  %2646 = vlog2.f32 %v1844_v19 }
 0x4a8   : > { %v2629_v60 = vpop.eup %2628  ;;  %1980 = vst.msk [vmem:[%s3282_s30 + $0x38] sm:$0xff] %vm5060_vm7, %v1964_v14  ;;  %v1965_v27 = vsub.f32 %v1949_v46, %v1885_v47  ;;  %v1886_v20 = vadd.f32 %v1864_v58, %v1822_v30  ;;  %v1866_v62 = vmul.f32 0.6931472, %v2627_v4  ;;  %2648 = vrcp.f32 %v1924_v1 }
 0x4a9   : > { %v2631_v11 = vpop.eup %2630  ;;  %v1951_v44 = vmul.f32 %v2629_v60, %v1903_v36 }
 0x4aa   : > { %v2633_v8 = vpop.eup %2632  ;;  %1981 = vst.msk [vmem:[%s3282_s30 + $0x40] sm:$0xff] %vm5061_vm3, %v1965_v27  ;;  %v1966_v7 = vsub.f32 %v1950_v45, %v1886_v20  ;;  %v1887_v33 = vadd.f32 %v1866_v62, %v1823_v31  ;;  %v1868_v5 = vmul.f32 0.6931472, %v2631_v11 }
 0x4ab   : > { %v2635_v18 = vpop.eup %2634  ;;  %v1952_v56 = vmul.f32 %v2633_v8, %v1904_v0 }
 0x4ac   : > { %v2637_v13 = vpop.eup %2636  ;;  %1982 = vst.msk [vmem:[%s3282_s30 + $0x48] sm:$0xff] %vm5062_vm12, %v1966_v7  ;;  %v1967_v48 = vsub.f32 %v1951_v44, %v1887_v33  ;;  %v1888_v50 = vadd.f32 %v1868_v5, %v1824_v24  ;;  %v1870_v41 = vmul.f32 0.6931472, %v2635_v18 }
 0x4ad   : > { %v2639_v38 = vpop.eup %2638  ;;  %v1953_v49 = vmul.f32 %v2637_v13, %v1905_v63 }
 0x4ae   : > { %v2641_v6 = vpop.eup %2640  ;;  %1983 = vst.msk [vmem:[%s3282_s30 + $0x50] sm:$0xff] %vm5063_vm5, %v1967_v48  ;;  %v1968_v2 = vsub.f32 %v1952_v56, %v1888_v50  ;;  %v1889_v32 = vadd.f32 %v1870_v41, %v1825_v34  ;;  %v1872_v16 = vmul.f32 0.6931472, %v2639_v38 }
 0x4af   : > { %v2643_v54 = vpop.eup %2642  ;;  %v1954_v25 = vmul.f32 %v2641_v6, %v1906_v3 }
 0x4b0   : > { %v2645_v15 = vpop.eup %2644  ;;  %1984 = vst.msk [vmem:[%s3282_s30 + $0x58] sm:$0xff] %vm5064_vm2, %v1968_v2  ;;  %v1969_v29 = vsub.f32 %v1953_v49, %v1889_v32  ;;  %v1890_v55 = vadd.f32 %v1872_v16, %v1826_v17  ;;  %v1874_v42 = vmul.f32 0.6931472, %v2643_v54 }
 0x4b1   : > { %v2647_v43 = vpop.eup %2646  ;;  %v1955_v53 = vmul.f32 %v2645_v15, %v1907_v39 }
 0x4b2   : > { %v2649_v28 = vpop.eup %2648  ;;  %1985 = vst.msk [vmem:[%s3282_s30 + $0x60] sm:$0xff] %vm5065_vm10, %v1969_v29  ;;  %v1970_v12 = vsub.f32 %v1954_v25, %v1890_v55  ;;  %v1891_v57 = vadd.f32 %v1874_v42, %v1827_v21  ;;  %v1876_v51 = vmul.f32 0.6931472, %v2647_v43 }
 0x4b3   : > { %v1956_v40 = vmul.f32 %v2649_v28, %v1908_v9 }
 0x4b4   : > { %1986 = vst.msk [vmem:[%s3282_s30 + $0x68] sm:$0xff] %vm5066_vm9, %v1970_v12  ;;  %v1971_v23 = vsub.f32 %v1955_v53, %v1891_v57  ;;  %v1892_v10 = vadd.f32 %v1876_v51, %v1828_v22 }
 0x4b6   : > { %1987 = vst.msk [vmem:[%s3282_s30 + $0x70] sm:$0xff] %vm5067_vm14, %v1971_v23  ;;  %v1972_v35 = vsub.f32 %v1956_v40, %v1892_v10 }
 0x4b8   : > { %1988 = vst.msk [vmem:[%s3282_s30 + $0x78] sm:$0xff] %vm5068_vm11, %v1972_v35 }
 0x4b9 PF: > { %s5069_s15 = sld [smem:[#allocation22_spill]]  ;;  %s5070_s14 = sld [smem:[#allocation23_spill]] }
 0x4ba   : > { %s5071_s22 = sld [smem:[#allocation65_spill]]  ;;  %s2003_s8 = sshll.u32 %s3282_s30, 4  ;;  %s4651_s8 = int_to_ptr.vmem [resolvable:$true] %s2003_s8 }
 0x4bb   : > { %s1990_s0 = scalar_lea.sflag [#allocation8], %s3252_s2  ;;  %s2770_s5 = scalar_lea.vmem %s4651_s8, 2048 }
 0x4bc   : > { %p2771_p5 = scmp.ne.s32.totalorder %s4651_s8, %s2770_s5  ;;  %s2916_s29 = smov [#allocation14]  }
 0x4bd   : > { %s2774_s28 = sshll.u32 %s2916_s29, 4  ;;  %s2775_s28 = int_to_ptr.vmem [resolvable:$false] %s2774_s28 }
 0x4be   : > { %s2776_s26 = scalar_lea.vmem %s2775_s28, 4096  ;;  %p2777_p11 = scmp.lt.s32.totalorder %s4651_s8, %s2775_s28 }
 0x4bf   : > { %s2218_s18 = sshll.u32 %s5069_s15, 11  ;;  %p5073_p0 = scmp.ne.s32.totalorder %s5070_s14, 0 }
 0x4c0   : > { %s5072_s11 = smov %s5071_s22  ;;  %s4648_s21 = scalar_lea.hbm %s5071_s22, %s2218_s18 }
 0x4c1   : > { %p2772_p7 = pnand %p2771_p5, %p5073_p0  ;;  %p2778_p10 = scmp.lt.s32.totalorder %s2776_s26, %s2770_s5 }
 0x4c3   : > { %p2773_p3 = pneg %p2772_p7  ;;  %p2779_p4 = por %p2778_p10, %p2777_p11 }
 0x4c5   : > { %p2780_p8 = pnand %p2779_p4, %p2773_p3 }
 0x4c7   : > { %2783 = shalt.err (!%p2780_p8)
}
 0x4c8   : > { %s2784_s6 = scalar_lea.hbm %s4648_s21, 2048  ;;  %s2788_s27 = scalar_lea.hbm %s5072_s11, 6144 }
 0x4c9   : > { %p2785_p12 = scmp.ne.s32.totalorder %s4648_s21, %s2784_s6  ;;  %p2789_p2 = scmp.lt.u32.totalorder %s4648_s21, %s5072_s11 }
 0x4ca   : > { %p2790_p6 = scmp.lt.u32.totalorder %s2788_s27, %s2784_s6  ;;  %p2792_p5 = scmp.lt.u32.totalorder %s2784_s6, %s4648_s21 }
 0x4cb   : > { %p2786_p1 = pnand %p2785_p12, %p5073_p0 }
 0x4cc   : > { %p2791_p13 = por %p2790_p6, %p2789_p2 }
 0x4cd   : > { %p2787_p9 = pneg %p2786_p1 }
 0x4ce   : > { %p2793_p7 = por %p2792_p5, %p2791_p13 }
 0x4d0   : > { %p2794_p3 = pnand %p2793_p7, %p2787_p9 }
 0x4d2   : > { %2797 = shalt.err (!%p2794_p3)
}
 0x4d3   : > { %s2917_s18 = smov 128   ;;  %s2918_s9 = smov 8  }
 0x4d4   : > { %2275 = dma.vmem_to_hbm [thread:$0]  (%p5073_p0), %s4651_s8, 2048, %s4648_s21, %s1990_s0, %s2917_s18, %s2917_s18, %s2918_s9  }
 0x4d5 PF: > { %s5074_s4 = sld [smem:[#allocation20_spill]]  ;;  %s5075_s22 = sld [smem:[#allocation24_spill]] }
 0x4d6   : > { %p2295_p11 = scmp.ge.s32.totalorder %s2904_s25, 2 }
 0x4db   : > { %s2018_s5 = sand.u32 1, %s5074_s4   ;;  %p5076_p10 = scmp.ne.s32.totalorder %s5075_s22, 0 }
 0x4dc   : > { %s2019_s29 = scalar_lea.sflag [#allocation8], %s2018_s5 }
 0x4dd   : > { %p2291_p4 = pnand %p2295_p11, %p5076_p10 }
 0x4df   : > { %2859 = dma.done.wait (!%p2291_p4), %s2019_s29, 2048  }
 0x4e0   : > { %2861 = vsyncadd (!%p2291_p4), %s2019_s29, 4294965248  ;;  %s26_s25 = sadd.s32 1, %s2904_s25   ;;  %s5077_s2 = sld [smem:[#allocation25_spill]] }
 0x4e1   : > { %p23_p8 = scmp.ge.s32.totalorder %s26_s25, 11   ;;  %s5078_s15 = smov %s2868_s16 }
 0x4e2   : > { %s5079_s16 = smov %s2872_s17  ;;  %s5080_s17 = smov %s3163_s12 }
 0x4e3   : > { %s5081_s18 = smov %s2880_s19  ;;  %s5082_s19 = smov %s2884_s20 }
 0x4e4   : > { %s5083_s20 = smov %s3172_s10  ;;  %s5084_s21 = smov %s2896_s23 }
 0x4e5   : > { %s5085_s22 = smov %s2900_s24  ;;  %s5087_s24 = smov %s5093_s13 }
 0x4e6   : > { %s5086_s23 = smov %s5077_s2  ;;  %25 = sbr.rel (!%p23_p8) target bundleno = 18 (0x12), region = 126 }
 0x4ed   :  { %2024 = vsyncpa [#allocation7], 1 }
 0x4ee   :  { %2026 = vsyncpa [#allocation7 + $0x1], 1 }
 0x4ef   :  { %2027 = vsyncpa [#allocation10], 1 }
 0x4f0   :  { %2029 = vsyncpa [#allocation10 + $0x1], 1 }
 0x4f1   :  { %2030 = vsyncpa [#allocation13], 1 }
 0x4f2   :  { %2032 = vsyncpa [#allocation13 + $0x1], 1 }
 0x4f3   :  { %2033 = vsyncpa [#allocation8], 1 }
 0x4f4   :  { %2035 = vsyncpa [#allocation8 + $0x1], 1 }

</bundles_post_ra>
